<compile_context>
chip_gen: v7x
topology: tpu7x:2x2x1
jax: 0.10.0
libtpu: 0.0.40
codegen_flags: <defaults>
</compile_context>

<pallas_src>
import functools

import jax
import jax.numpy as jnp
from jax.experimental import pallas as pl
from jax.experimental.pallas import tpu as pltpu

LN_EPS = 1e-5          # PyTorch nn.LayerNorm default eps
NEG_BIG = -9.0e15      # matches -9000000000000000.0 in the torch code


def _mxu_operand_dtype():
    """bf16 MXU operands on v6e/v7x (bf16 VPU present); f32 on v5e/unknown."""
    try:
        kind = jax.devices()[0].device_kind.lower()
    except Exception:
        return jnp.float32
    if any(tag in kind for tag in ("v6", "v7", "7x")):
        return jnp.bfloat16
    return jnp.float32


def hetero_gnn_kernel(att_ref, avgmask_ref, bias_hh_ref,
                      bias_ah_hl_ref, bias_ah_att_ref,
                      bias_ha_att_ref, bias_ha_hl_ref,
                      w_h2h1_ref, w_h2a1_ref, w_a2h2_ref,
                      w_h2h2_ref, w_h2a2_ref,
                      ln_g_ref, ln_b_ref,
                      out_ref, *, mxu_dtype):
    D = att_ref.shape[-1]
    inv_sqrt_d = 1.0 / (float(D) ** 0.5)
    cd = mxu_dtype

    # ---- 2-D MXU matmuls (batch already folded into rows), f32 accumulation ----
    def mm(x, y):                      # (M,K) @ (K,N) -> (M,N)
        return jnp.dot(x.astype(cd), y.astype(cd),
                       preferred_element_type=jnp.float32)

    def mm_t(x, y):                    # (M,K) @ (N,K)^T -> (M,N)
        return jax.lax.dot_general(x.astype(cd), y.astype(cd),
                                   (((1,), (1,)), ((), ())),
                                   preferred_element_type=jnp.float32)

    def ln(x, idx):
        g = ln_g_ref[idx:idx + 1, :]
        b = ln_b_ref[idx:idx + 1, :]
        mu = jnp.mean(x, axis=-1, keepdims=True)
        var = jnp.mean(x * x, axis=-1, keepdims=True) - mu * mu   # single pass
        return (x - mu) * jax.lax.rsqrt(var + LN_EPS) * g + b

    def self_attn(v_ln, w_ref):
        # h2h: softmax((v W)(v W)^T / sqrt(D)) @ v.  W is pre-scaled by
        # D**-0.25 in the wrapper; bias_hh keeps batches block-diagonal.
        hide = mm(v_ln, w_ref[...])
        s = mm_t(hide, hide) + bias_hh_ref[...]
        e = jnp.exp(s - jnp.max(s, axis=-1, keepdims=True))
        r = pl.reciprocal(jnp.sum(e, axis=-1, keepdims=True), approx=True)
        return mm(e, v_ln) * r

    def split_attn(q, x1, bias1, x2, bias2):
        # Masked softmax over the concatenated key set [x1; x2] without the
        # sublane-misaligned concat: split score matmuls + joint normalization.
        # bias* are additive (0 where edge present within a batch block,
        # NEG_BIG otherwise — including all cross-batch positions).
        qs = q * inv_sqrt_d
        s1 = mm_t(qs, x1) + bias1
        s2 = mm_t(qs, x2) + bias2
        m = jnp.maximum(jnp.max(s1, axis=-1, keepdims=True),
                        jnp.max(s2, axis=-1, keepdims=True))
        e1 = jnp.exp(s1 - m)
        e2 = jnp.exp(s2 - m)
        r = pl.reciprocal(jnp.sum(e1, axis=-1, keepdims=True)
                          + jnp.sum(e2, axis=-1, keepdims=True), approx=True)
        return (mm(e1, x1) + mm(e2, x2)) * r

    att = att_ref[...].astype(jnp.float32)                 # (Bt*A, D)

    # ======================= Layer 1 =======================
    # a2h (fl_type='avg'): hl = blockdiag(avgmask) @ LN1(att)
    att_ln = ln(att, 0)
    hl = mm(avgmask_ref[...], att_ln)                      # (Bt*C, D)
    # h2h
    upd_hl1 = self_attn(ln(hl, 1), w_h2h1_ref)             # (Bt*C, D)
    # h2a ('attention'): keys = [LN3(upd_hl1) @ W_h2a , att], query = att
    x1 = mm(ln(upd_hl1, 2), w_h2a1_ref[...])               # (Bt*C, D)
    att1 = split_attn(att, x1, bias_ah_hl_ref[...],
                      att, bias_ah_att_ref[...])           # (Bt*A, D)

    # ======================= Layer 2 =======================
    # a2h ('attention'): keys = [LN1(att1) @ W_a2h , upd_hl1], query = upd_hl1
    y1 = mm(ln(att1, 3), w_a2h2_ref[...])                  # (Bt*A, D)
    hl2 = split_attn(upd_hl1, y1, bias_ha_att_ref[...],
                     upd_hl1, bias_ha_hl_ref[...])         # (Bt*C, D)
    # h2h
    upd_hl2 = self_attn(ln(hl2, 4), w_h2h2_ref)            # (Bt*C, D)
    # h2a ('attention'): keys = [LN3(upd_hl2) @ W_h2a , att1], query = att1
    z1 = mm(ln(upd_hl2, 5), w_h2a2_ref[...])               # (Bt*C, D)
    out = split_attn(att1, z1, bias_ah_hl_ref[...],
                     att1, bias_ah_att_ref[...])           # (Bt*A, D)

    out_ref[...] = out.astype(out_ref.dtype)


def hetero_gnn_forward(att_vf, params, batch_block=None):
    B, A, D = att_vf.shape
    C = params["avgmask"].shape[0]

    # Fold as many batch elements as possible into one grid step so every op is
    # a single 64-128-row 2-D matmul; cap so the widest key dim (bt*A) stays
    # within one 128-lane group, and so bt divides B.  At B=8, A=16: grid=(1,).
    if batch_block is None:
        batch_block = max(1, 128 // A)
    bt = max(1, min(batch_block, B))
    while B % bt:
        bt -= 1

    cd = _mxu_operand_dtype()

    avgmask = params["avgmask"].astype(jnp.float32)        # (C, A)
    adj_ha = params["adj_ha"]                              # (C, A + C) = [avgmask | I_C]
    adj_ah = params["adj_ah"]                              # (A, C + A) = [avgmask^T | I_A]

    eye_bt = jnp.eye(bt, dtype=jnp.float32)

    def bd_bias(block_adj):
        # Block-diagonal additive bias: 0 where the per-batch adjacency has an
        # edge, NEG_BIG everywhere else (including all cross-batch positions).
        adj_bd = jnp.kron(eye_bt, (block_adj > 0).astype(jnp.float32))
        return jnp.where(adj_bd > 0, 0.0, NEG_BIG).astype(jnp.float32)

    avgmask_bd = jnp.kron(eye_bt, avgmask).astype(cd)                    # (bt*C, bt*A)
    bias_hh = bd_bias(jnp.ones((C, C), jnp.float32))                     # (bt*C, bt*C)
    bias_ah_hl = bd_bias(adj_ah[:, :C])                                  # (bt*A, bt*C)
    bias_ah_att = bd_bias(adj_ah[:, C:])                                 # (bt*A, bt*A)
    bias_ha_att = bd_bias(adj_ha[:, :A])                                 # (bt*C, bt*A)
    bias_ha_hl = bd_bias(adj_ha[:, A:])                                  # (bt*C, bt*C)

    # Fold the h2h 1/sqrt(D) score scale into the weight (D**-0.25 per side).
    qk_scale = jnp.float32(D) ** -0.25
    w_h2h1 = (params["w_h2h1"] * qk_scale).astype(cd)
    w_h2h2 = (params["w_h2h2"] * qk_scale).astype(cd)
    w_h2a1 = params["w_h2a1"].astype(cd)
    w_a2h2 = params["w_a2h2"].astype(cd)
    w_h2a2 = params["w_h2a2"].astype(cd)

    att2d = att_vf.reshape(B * A, D)

    operands = [att2d, avgmask_bd, bias_hh,
                bias_ah_hl, bias_ah_att, bias_ha_att, bias_ha_hl,
                w_h2h1, w_h2a1, w_a2h2, w_h2h2, w_h2a2,
                params["ln_gamma"].astype(jnp.float32),
                params["ln_beta"].astype(jnp.float32)]

    def full2d(arr):
        return pl.BlockSpec(arr.shape, lambda b: (0, 0))

    in_specs = ([pl.BlockSpec((bt * A, D), lambda b: (b, 0))]
                + [full2d(a) for a in operands[1:]])
    out_specs = pl.BlockSpec((bt * A, D), lambda b: (b, 0))

    kernel = functools.partial(hetero_gnn_kernel, mxu_dtype=cd)

    out2d = pl.pallas_call(
        kernel,
        out_shape=jax.ShapeDtypeStruct((B * A, D), att_vf.dtype),
        grid_spec=pltpu.PrefetchScalarGridSpec(
            num_scalar_prefetch=0,
            grid=(B // bt,),
            in_specs=in_specs,
            out_specs=out_specs),
        compiler_params=pltpu.CompilerParams(
            dimension_semantics=("parallel",)),
    )(*operands)
    return out2d.reshape(B, A, D)


def reference_forward(att_vf, p):
    """Pure-JAX mirror of the torch forward (same default matmul precision)."""
    D = att_vf.shape[-1]
    inv = 1.0 / jnp.sqrt(jnp.float32(D))

    def ln(x, i):
        mu = x.mean(-1, keepdims=True)
        var = jnp.square(x - mu).mean(-1, keepdims=True)
        return (x - mu) / jnp.sqrt(var + LN_EPS) * p["ln_gamma"][i] + p["ln_beta"][i]

    def msm(s, adj):
        return jax.nn.softmax(jnp.where(adj > 0, s, NEG_BIG), axis=-1)

    def one(att):
        att_ln = ln(att, 0)
        hl = p["avgmask"] @ att_ln
        hl_ln = ln(hl, 1)
        hide = hl_ln @ p["w_h2h1"]
        upd_hl1 = jax.nn.softmax(hide @ hide.T * inv, axis=-1) @ hl_ln
        hidden = jnp.concatenate([ln(upd_hl1, 2) @ p["w_h2a1"], att], axis=0)
        att1 = msm(att @ hidden.T * inv, p["adj_ah"]) @ hidden
        hidden = jnp.concatenate([ln(att1, 3) @ p["w_a2h2"], upd_hl1], axis=0)
        hl2 = msm(upd_hl1 @ hidden.T * inv, p["adj_ha"]) @ hidden
        hl2_ln = ln(hl2, 4)
        hide = hl2_ln @ p["w_h2h2"]
        upd_hl2 = jax.nn.softmax(hide @ hide.T * inv, axis=-1) @ hl2_ln
        hidden = jnp.concatenate([ln(upd_hl2, 5) @ p["w_h2a2"], att1], axis=0)
        return msm(att1 @ hidden.T * inv, p["adj_ah"]) @ hidden

    return jax.vmap(one)(att_vf)


if __name__ == "__main__":
    # batch, num_attribute, num_attclass, tf_common_dim
    B, A, C, D = 8, 16, 4, 32

    key = jax.random.PRNGKey(0)
    ks = jax.random.split(key, 8)

    # att_index: 4 attributes per class -> avgmask rows of 1/4
    att_index = jnp.arange(A) // (A // C)
    avgmask = (jax.nn.one_hot(att_index, C).T / (A // C)).astype(jnp.float32)     # (C, A)
    adj_ha = jnp.concatenate([avgmask, jnp.eye(C, dtype=jnp.float32)], axis=1)    # (C, A+C)
    adj_ah = jnp.concatenate([avgmask.T, jnp.eye(A, dtype=jnp.float32)], axis=1)  # (A, C+A)

    # Note: layer1's W_a2h exists in the module but is unused when fl_type='avg'.
    # TODO(synk): confidence-mask path (att_confidence is not None) not implemented;
    # forward() here corresponds to att_confidence=None (module buffers used).
    w_scale = 1.0 / (D ** 0.5)   # well-conditioned init for the numerics check
    params = dict(
        avgmask=avgmask, adj_ha=adj_ha, adj_ah=adj_ah,
        w_h2h1=jax.random.normal(ks[1], (D, D), jnp.float32) * w_scale,
        w_h2a1=jax.random.normal(ks[2], (D, D), jnp.float32) * w_scale,
        w_a2h2=jax.random.normal(ks[3], (D, D), jnp.float32) * w_scale,
        w_h2h2=jax.random.normal(ks[4], (D, D), jnp.float32) * w_scale,
        w_h2a2=jax.random.normal(ks[5], (D, D), jnp.float32) * w_scale,
        # LayerNorm params: rows 0-2 = layer1 ln1/ln2/ln3, rows 3-5 = layer2.
        ln_gamma=jnp.ones((6, D), jnp.float32),
        ln_beta=jnp.zeros((6, D), jnp.float32),
    )

    att_vf = jax.random.normal(ks[0], (B, A, D), jnp.float32)

    out = hetero_gnn_forward(att_vf, params)
    out = jax.block_until_ready(out)

    ref = reference_forward(att_vf, params)
    assert out.shape == (B, A, D)
    assert bool(jnp.all(jnp.isfinite(out)))
    assert bool(jnp.allclose(out, ref, rtol=2e-2, atol=2e-2)), (
        float(jnp.max(jnp.abs(out - ref))))

    print("KERNEL_OK")
</pallas_src>

<mosaic_0001>
module attributes {stable_mosaic.version = 11 : i64} {
  func.func @hetero_gnn_kernel(%arg0: i32, %arg1: memref<128x32xf32, #tpu.memory_space<vmem>>, %arg2: memref<32x128xf32, #tpu.memory_space<vmem>>, %arg3: memref<32x32xf32, #tpu.memory_space<vmem>>, %arg4: memref<128x32xf32, #tpu.memory_space<vmem>>, %arg5: memref<128x128xf32, #tpu.memory_space<vmem>>, %arg6: memref<32x128xf32, #tpu.memory_space<vmem>>, %arg7: memref<32x32xf32, #tpu.memory_space<vmem>>, %arg8: memref<32x32xf32, #tpu.memory_space<vmem>>, %arg9: memref<32x32xf32, #tpu.memory_space<vmem>>, %arg10: memref<32x32xf32, #tpu.memory_space<vmem>>, %arg11: memref<32x32xf32, #tpu.memory_space<vmem>>, %arg12: memref<32x32xf32, #tpu.memory_space<vmem>>, %arg13: memref<6x32xf32, #tpu.memory_space<vmem>>, %arg14: memref<6x32xf32, #tpu.memory_space<vmem>>, %arg15: memref<128x32xf32, #tpu.memory_space<vmem>>) attributes {dimension_semantics = [#tpu.dimension_semantics<parallel>], iteration_bounds = array<i64: 1>, scalar_prefetch = 0 : i64, scratch_operands = 0 : i64, tpu.core_type = #tpu.core_type<tc>, window_params = [{transform_indices = @transform_0, window_bounds = array<i64: 128, 32>}, {pipeline_mode = #tpu.pipeline_mode<synchronous>, transform_indices = @transform_1, window_bounds = array<i64: 32, 128>}, {pipeline_mode = #tpu.pipeline_mode<synchronous>, transform_indices = @transform_2, window_bounds = array<i64: 32, 32>}, {pipeline_mode = #tpu.pipeline_mode<synchronous>, transform_indices = @transform_3, window_bounds = array<i64: 128, 32>}, {pipeline_mode = #tpu.pipeline_mode<synchronous>, transform_indices = @transform_4, window_bounds = array<i64: 128, 128>}, {pipeline_mode = #tpu.pipeline_mode<synchronous>, transform_indices = @transform_5, window_bounds = array<i64: 32, 128>}, {pipeline_mode = #tpu.pipeline_mode<synchronous>, transform_indices = @transform_6, window_bounds = array<i64: 32, 32>}, {pipeline_mode = #tpu.pipeline_mode<synchronous>, transform_indices = @transform_7, window_bounds = array<i64: 32, 32>}, {pipeline_mode = #tpu.pipeline_mode<synchronous>, transform_indices = @transform_8, window_bounds = array<i64: 32, 32>}, {pipeline_mode = #tpu.pipeline_mode<synchronous>, transform_indices = @transform_9, window_bounds = array<i64: 32, 32>}, {pipeline_mode = #tpu.pipeline_mode<synchronous>, transform_indices = @transform_10, window_bounds = array<i64: 32, 32>}, {pipeline_mode = #tpu.pipeline_mode<synchronous>, transform_indices = @transform_11, window_bounds = array<i64: 32, 32>}, {pipeline_mode = #tpu.pipeline_mode<synchronous>, transform_indices = @transform_12, window_bounds = array<i64: 6, 32>}, {pipeline_mode = #tpu.pipeline_mode<synchronous>, transform_indices = @transform_13, window_bounds = array<i64: 6, 32>}, {transform_indices = @transform_14, window_bounds = array<i64: 128, 32>}]} {
    %c0 = arith.constant 0 : index
    %c0_0 = arith.constant 0 : index
    %0 = vector.load %arg1[%c0, %c0_0] : memref<128x32xf32, #tpu.memory_space<vmem>>, vector<128x32xf32>
    %c0_1 = arith.constant 0 : index
    %c0_2 = arith.constant 0 : index
    %1 = vector.load %arg13[%c0_1, %c0_2] : memref<6x32xf32, #tpu.memory_space<vmem>>, vector<1x32xf32>
    %c0_3 = arith.constant 0 : index
    %c0_4 = arith.constant 0 : index
    %2 = vector.load %arg14[%c0_3, %c0_4] : memref<6x32xf32, #tpu.memory_space<vmem>>, vector<1x32xf32>
    %cst = arith.constant dense<0.000000e+00> : vector<128xf32>
    %3 = vector.multi_reduction <add>, %0, %cst [1] : vector<128x32xf32> to vector<128xf32>
    %4 = vector.shape_cast %3 : vector<128xf32> to vector<128x1xf32>
    %cst_5 = arith.constant 3.200000e+01 : f32
    %5 = vector.broadcast %cst_5 : f32 to vector<128x1xf32>
    %6 = arith.divf %4, %5 : vector<128x1xf32>
    %7 = arith.mulf %0, %0 : vector<128x32xf32>
    %cst_6 = arith.constant dense<0.000000e+00> : vector<128xf32>
    %8 = vector.multi_reduction <add>, %7, %cst_6 [1] : vector<128x32xf32> to vector<128xf32>
    %9 = vector.shape_cast %8 : vector<128xf32> to vector<128x1xf32>
    %cst_7 = arith.constant 3.200000e+01 : f32
    %10 = vector.broadcast %cst_7 : f32 to vector<128x1xf32>
    %11 = arith.divf %9, %10 : vector<128x1xf32>
    %12 = arith.mulf %6, %6 : vector<128x1xf32>
    %13 = arith.subf %11, %12 : vector<128x1xf32>
    %14 = vector.broadcast %6 : vector<128x1xf32> to vector<128x32xf32>
    %15 = arith.subf %0, %14 : vector<128x32xf32>
    %cst_8 = arith.constant 9.99999974E-6 : f32
    %16 = vector.broadcast %cst_8 : f32 to vector<128x1xf32>
    %17 = arith.addf %13, %16 : vector<128x1xf32>
    %18 = math.rsqrt %17 : vector<128x1xf32>
    %19 = vector.broadcast %18 : vector<128x1xf32> to vector<128x32xf32>
    %20 = arith.mulf %15, %19 : vector<128x32xf32>
    %21 = vector.broadcast %1 : vector<1x32xf32> to vector<128x32xf32>
    %22 = arith.mulf %20, %21 : vector<128x32xf32>
    %23 = vector.broadcast %2 : vector<1x32xf32> to vector<128x32xf32>
    %24 = arith.addf %22, %23 : vector<128x32xf32>
    %c0_9 = arith.constant 0 : index
    %c0_10 = arith.constant 0 : index
    %25 = vector.load %arg2[%c0_9, %c0_10] : memref<32x128xf32, #tpu.memory_space<vmem>>, vector<32x128xf32>
    %cst_11 = arith.constant dense<0.000000e+00> : vector<32x32xf32>
    %26 = tpu.matmul %25, %24, %cst_11 {dimension_numbers = #tpu.dot_dimension_numbers<[1], [0], [0], [1], [0, 0, 1, 1], [], []>} : vector<32x128xf32>, vector<128x32xf32>, vector<32x32xf32> -> vector<32x32xf32>
    %c1 = arith.constant 1 : index
    %c0_12 = arith.constant 0 : index
    %27 = vector.load %arg13[%c1, %c0_12] : memref<6x32xf32, #tpu.memory_space<vmem>>, vector<1x32xf32>
    %c1_13 = arith.constant 1 : index
    %c0_14 = arith.constant 0 : index
    %28 = vector.load %arg14[%c1_13, %c0_14] : memref<6x32xf32, #tpu.memory_space<vmem>>, vector<1x32xf32>
    %cst_15 = arith.constant dense<0.000000e+00> : vector<32xf32>
    %29 = vector.multi_reduction <add>, %26, %cst_15 [1] : vector<32x32xf32> to vector<32xf32>
    %30 = vector.shape_cast %29 : vector<32xf32> to vector<32x1xf32>
    %cst_16 = arith.constant 3.200000e+01 : f32
    %31 = vector.broadcast %cst_16 : f32 to vector<32x1xf32>
    %32 = arith.divf %30, %31 : vector<32x1xf32>
    %33 = arith.mulf %26, %26 : vector<32x32xf32>
    %cst_17 = arith.constant dense<0.000000e+00> : vector<32xf32>
    %34 = vector.multi_reduction <add>, %33, %cst_17 [1] : vector<32x32xf32> to vector<32xf32>
    %35 = vector.shape_cast %34 : vector<32xf32> to vector<32x1xf32>
    %cst_18 = arith.constant 3.200000e+01 : f32
    %36 = vector.broadcast %cst_18 : f32 to vector<32x1xf32>
    %37 = arith.divf %35, %36 : vector<32x1xf32>
    %38 = arith.mulf %32, %32 : vector<32x1xf32>
    %39 = arith.subf %37, %38 : vector<32x1xf32>
    %40 = vector.broadcast %32 : vector<32x1xf32> to vector<32x32xf32>
    %41 = arith.subf %26, %40 : vector<32x32xf32>
    %cst_19 = arith.constant 9.99999974E-6 : f32
    %42 = vector.broadcast %cst_19 : f32 to vector<32x1xf32>
    %43 = arith.addf %39, %42 : vector<32x1xf32>
    %44 = math.rsqrt %43 : vector<32x1xf32>
    %45 = vector.broadcast %44 : vector<32x1xf32> to vector<32x32xf32>
    %46 = arith.mulf %41, %45 : vector<32x32xf32>
    %47 = vector.broadcast %27 : vector<1x32xf32> to vector<32x32xf32>
    %48 = arith.mulf %46, %47 : vector<32x32xf32>
    %49 = vector.broadcast %28 : vector<1x32xf32> to vector<32x32xf32>
    %50 = arith.addf %48, %49 : vector<32x32xf32>
    %c0_20 = arith.constant 0 : index
    %c0_21 = arith.constant 0 : index
    %51 = vector.load %arg8[%c0_20, %c0_21] : memref<32x32xf32, #tpu.memory_space<vmem>>, vector<32x32xf32>
    %cst_22 = arith.constant dense<0.000000e+00> : vector<32x32xf32>
    %52 = tpu.matmul %50, %51, %cst_22 {dimension_numbers = #tpu.dot_dimension_numbers<[1], [0], [0], [1], [0, 0, 1, 1], [], []>} : vector<32x32xf32>, vector<32x32xf32>, vector<32x32xf32> -> vector<32x32xf32>
    %cst_23 = arith.constant dense<0.000000e+00> : vector<32x32xf32>
    %53 = tpu.matmul %52, %52, %cst_23 {dimension_numbers = #tpu.dot_dimension_numbers<[1], [1], [0], [0], [0, 0, 1, 0], [], []>} : vector<32x32xf32>, vector<32x32xf32>, vector<32x32xf32> -> vector<32x32xf32>
    %c0_24 = arith.constant 0 : index
    %c0_25 = arith.constant 0 : index
    %54 = vector.load %arg3[%c0_24, %c0_25] : memref<32x32xf32, #tpu.memory_space<vmem>>, vector<32x32xf32>
    %55 = arith.addf %53, %54 : vector<32x32xf32>
    %cst_26 = arith.constant dense<0xFF800000> : vector<32xf32>
    %56 = vector.multi_reduction <maximumf>, %55, %cst_26 [1] : vector<32x32xf32> to vector<32xf32>
    %57 = vector.shape_cast %56 : vector<32xf32> to vector<32x1xf32>
    %58 = vector.broadcast %57 : vector<32x1xf32> to vector<32x32xf32>
    %59 = arith.subf %55, %58 : vector<32x32xf32>
    %60 = math.exp %59 : vector<32x32xf32>
    %cst_27 = arith.constant dense<0.000000e+00> : vector<32xf32>
    %61 = vector.multi_reduction <add>, %60, %cst_27 [1] : vector<32x32xf32> to vector<32xf32>
    %62 = vector.shape_cast %61 : vector<32xf32> to vector<32x1xf32>
    %63 = tpu.reciprocal %62 {approx = true} : vector<32x1xf32> -> vector<32x1xf32>
    %cst_28 = arith.constant dense<0.000000e+00> : vector<32x32xf32>
    %64 = tpu.matmul %60, %50, %cst_28 {dimension_numbers = #tpu.dot_dimension_numbers<[1], [0], [0], [1], [0, 0, 1, 1], [], []>} : vector<32x32xf32>, vector<32x32xf32>, vector<32x32xf32> -> vector<32x32xf32>
    %65 = vector.broadcast %63 : vector<32x1xf32> to vector<32x32xf32>
    %66 = arith.mulf %64, %65 : vector<32x32xf32>
    %c2 = arith.constant 2 : index
    %c0_29 = arith.constant 0 : index
    %67 = vector.load %arg13[%c2, %c0_29] : memref<6x32xf32, #tpu.memory_space<vmem>>, vector<1x32xf32>
    %c2_30 = arith.constant 2 : index
    %c0_31 = arith.constant 0 : index
    %68 = vector.load %arg14[%c2_30, %c0_31] : memref<6x32xf32, #tpu.memory_space<vmem>>, vector<1x32xf32>
    %cst_32 = arith.constant dense<0.000000e+00> : vector<32xf32>
    %69 = vector.multi_reduction <add>, %66, %cst_32 [1] : vector<32x32xf32> to vector<32xf32>
    %70 = vector.shape_cast %69 : vector<32xf32> to vector<32x1xf32>
    %cst_33 = arith.constant 3.200000e+01 : f32
    %71 = vector.broadcast %cst_33 : f32 to vector<32x1xf32>
    %72 = arith.divf %70, %71 : vector<32x1xf32>
    %73 = arith.mulf %66, %66 : vector<32x32xf32>
    %cst_34 = arith.constant dense<0.000000e+00> : vector<32xf32>
    %74 = vector.multi_reduction <add>, %73, %cst_34 [1] : vector<32x32xf32> to vector<32xf32>
    %75 = vector.shape_cast %74 : vector<32xf32> to vector<32x1xf32>
    %cst_35 = arith.constant 3.200000e+01 : f32
    %76 = vector.broadcast %cst_35 : f32 to vector<32x1xf32>
    %77 = arith.divf %75, %76 : vector<32x1xf32>
    %78 = arith.mulf %72, %72 : vector<32x1xf32>
    %79 = arith.subf %77, %78 : vector<32x1xf32>
    %80 = vector.broadcast %72 : vector<32x1xf32> to vector<32x32xf32>
    %81 = arith.subf %66, %80 : vector<32x32xf32>
    %cst_36 = arith.constant 9.99999974E-6 : f32
    %82 = vector.broadcast %cst_36 : f32 to vector<32x1xf32>
    %83 = arith.addf %79, %82 : vector<32x1xf32>
    %84 = math.rsqrt %83 : vector<32x1xf32>
    %85 = vector.broadcast %84 : vector<32x1xf32> to vector<32x32xf32>
    %86 = arith.mulf %81, %85 : vector<32x32xf32>
    %87 = vector.broadcast %67 : vector<1x32xf32> to vector<32x32xf32>
    %88 = arith.mulf %86, %87 : vector<32x32xf32>
    %89 = vector.broadcast %68 : vector<1x32xf32> to vector<32x32xf32>
    %90 = arith.addf %88, %89 : vector<32x32xf32>
    %c0_37 = arith.constant 0 : index
    %c0_38 = arith.constant 0 : index
    %91 = vector.load %arg9[%c0_37, %c0_38] : memref<32x32xf32, #tpu.memory_space<vmem>>, vector<32x32xf32>
    %cst_39 = arith.constant dense<0.000000e+00> : vector<32x32xf32>
    %92 = tpu.matmul %90, %91, %cst_39 {dimension_numbers = #tpu.dot_dimension_numbers<[1], [0], [0], [1], [0, 0, 1, 1], [], []>} : vector<32x32xf32>, vector<32x32xf32>, vector<32x32xf32> -> vector<32x32xf32>
    %c0_40 = arith.constant 0 : index
    %c0_41 = arith.constant 0 : index
    %93 = vector.load %arg4[%c0_40, %c0_41] : memref<128x32xf32, #tpu.memory_space<vmem>>, vector<128x32xf32>
    %c0_42 = arith.constant 0 : index
    %c0_43 = arith.constant 0 : index
    %94 = vector.load %arg5[%c0_42, %c0_43] : memref<128x128xf32, #tpu.memory_space<vmem>>, vector<128x128xf32>
    %cst_44 = arith.constant 0.176776692 : f32
    %95 = vector.broadcast %cst_44 : f32 to vector<128x32xf32>
    %96 = arith.mulf %0, %95 : vector<128x32xf32>
    %cst_45 = arith.constant dense<0.000000e+00> : vector<128x32xf32>
    %97 = tpu.matmul %96, %92, %cst_45 {dimension_numbers = #tpu.dot_dimension_numbers<[1], [1], [0], [0], [0, 0, 1, 0], [], []>} : vector<128x32xf32>, vector<32x32xf32>, vector<128x32xf32> -> vector<128x32xf32>
    %98 = arith.addf %97, %93 : vector<128x32xf32>
    %cst_46 = arith.constant dense<0.000000e+00> : vector<128x128xf32>
    %99 = tpu.matmul %96, %0, %cst_46 {dimension_numbers = #tpu.dot_dimension_numbers<[1], [1], [0], [0], [0, 0, 1, 0], [], []>} : vector<128x32xf32>, vector<128x32xf32>, vector<128x128xf32> -> vector<128x128xf32>
    %100 = arith.addf %99, %94 : vector<128x128xf32>
    %cst_47 = arith.constant dense<0xFF800000> : vector<128xf32>
    %101 = vector.multi_reduction <maximumf>, %98, %cst_47 [1] : vector<128x32xf32> to vector<128xf32>
    %102 = vector.shape_cast %101 : vector<128xf32> to vector<128x1xf32>
    %cst_48 = arith.constant dense<0xFF800000> : vector<128xf32>
    %103 = vector.multi_reduction <maximumf>, %100, %cst_48 [1] : vector<128x128xf32> to vector<128xf32>
    %104 = vector.shape_cast %103 : vector<128xf32> to vector<128x1xf32>
    %105 = arith.maximumf %102, %104 : vector<128x1xf32>
    %106 = vector.broadcast %105 : vector<128x1xf32> to vector<128x32xf32>
    %107 = arith.subf %98, %106 : vector<128x32xf32>
    %108 = math.exp %107 : vector<128x32xf32>
    %109 = vector.broadcast %105 : vector<128x1xf32> to vector<128x128xf32>
    %110 = arith.subf %100, %109 : vector<128x128xf32>
    %111 = math.exp %110 : vector<128x128xf32>
    %cst_49 = arith.constant dense<0.000000e+00> : vector<128xf32>
    %112 = vector.multi_reduction <add>, %108, %cst_49 [1] : vector<128x32xf32> to vector<128xf32>
    %113 = vector.shape_cast %112 : vector<128xf32> to vector<128x1xf32>
    %cst_50 = arith.constant dense<0.000000e+00> : vector<128xf32>
    %114 = vector.multi_reduction <add>, %111, %cst_50 [1] : vector<128x128xf32> to vector<128xf32>
    %115 = vector.shape_cast %114 : vector<128xf32> to vector<128x1xf32>
    %116 = arith.addf %113, %115 : vector<128x1xf32>
    %117 = tpu.reciprocal %116 {approx = true} : vector<128x1xf32> -> vector<128x1xf32>
    %cst_51 = arith.constant dense<0.000000e+00> : vector<128x32xf32>
    %118 = tpu.matmul %108, %92, %cst_51 {dimension_numbers = #tpu.dot_dimension_numbers<[1], [0], [0], [1], [0, 0, 1, 1], [], []>} : vector<128x32xf32>, vector<32x32xf32>, vector<128x32xf32> -> vector<128x32xf32>
    %cst_52 = arith.constant dense<0.000000e+00> : vector<128x32xf32>
    %119 = tpu.matmul %111, %0, %cst_52 {dimension_numbers = #tpu.dot_dimension_numbers<[1], [0], [0], [1], [0, 0, 1, 1], [], []>} : vector<128x128xf32>, vector<128x32xf32>, vector<128x32xf32> -> vector<128x32xf32>
    %120 = arith.addf %118, %119 : vector<128x32xf32>
    %121 = vector.broadcast %117 : vector<128x1xf32> to vector<128x32xf32>
    %122 = arith.mulf %120, %121 : vector<128x32xf32>
    %c3 = arith.constant 3 : index
    %c0_53 = arith.constant 0 : index
    %123 = vector.load %arg13[%c3, %c0_53] : memref<6x32xf32, #tpu.memory_space<vmem>>, vector<1x32xf32>
    %c3_54 = arith.constant 3 : index
    %c0_55 = arith.constant 0 : index
    %124 = vector.load %arg14[%c3_54, %c0_55] : memref<6x32xf32, #tpu.memory_space<vmem>>, vector<1x32xf32>
    %cst_56 = arith.constant dense<0.000000e+00> : vector<128xf32>
    %125 = vector.multi_reduction <add>, %122, %cst_56 [1] : vector<128x32xf32> to vector<128xf32>
    %126 = vector.shape_cast %125 : vector<128xf32> to vector<128x1xf32>
    %cst_57 = arith.constant 3.200000e+01 : f32
    %127 = vector.broadcast %cst_57 : f32 to vector<128x1xf32>
    %128 = arith.divf %126, %127 : vector<128x1xf32>
    %129 = arith.mulf %122, %122 : vector<128x32xf32>
    %cst_58 = arith.constant dense<0.000000e+00> : vector<128xf32>
    %130 = vector.multi_reduction <add>, %129, %cst_58 [1] : vector<128x32xf32> to vector<128xf32>
    %131 = vector.shape_cast %130 : vector<128xf32> to vector<128x1xf32>
    %cst_59 = arith.constant 3.200000e+01 : f32
    %132 = vector.broadcast %cst_59 : f32 to vector<128x1xf32>
    %133 = arith.divf %131, %132 : vector<128x1xf32>
    %134 = arith.mulf %128, %128 : vector<128x1xf32>
    %135 = arith.subf %133, %134 : vector<128x1xf32>
    %136 = vector.broadcast %128 : vector<128x1xf32> to vector<128x32xf32>
    %137 = arith.subf %122, %136 : vector<128x32xf32>
    %cst_60 = arith.constant 9.99999974E-6 : f32
    %138 = vector.broadcast %cst_60 : f32 to vector<128x1xf32>
    %139 = arith.addf %135, %138 : vector<128x1xf32>
    %140 = math.rsqrt %139 : vector<128x1xf32>
    %141 = vector.broadcast %140 : vector<128x1xf32> to vector<128x32xf32>
    %142 = arith.mulf %137, %141 : vector<128x32xf32>
    %143 = vector.broadcast %123 : vector<1x32xf32> to vector<128x32xf32>
    %144 = arith.mulf %142, %143 : vector<128x32xf32>
    %145 = vector.broadcast %124 : vector<1x32xf32> to vector<128x32xf32>
    %146 = arith.addf %144, %145 : vector<128x32xf32>
    %c0_61 = arith.constant 0 : index
    %c0_62 = arith.constant 0 : index
    %147 = vector.load %arg10[%c0_61, %c0_62] : memref<32x32xf32, #tpu.memory_space<vmem>>, vector<32x32xf32>
    %cst_63 = arith.constant dense<0.000000e+00> : vector<128x32xf32>
    %148 = tpu.matmul %146, %147, %cst_63 {dimension_numbers = #tpu.dot_dimension_numbers<[1], [0], [0], [1], [0, 0, 1, 1], [], []>} : vector<128x32xf32>, vector<32x32xf32>, vector<128x32xf32> -> vector<128x32xf32>
    %c0_64 = arith.constant 0 : index
    %c0_65 = arith.constant 0 : index
    %149 = vector.load %arg6[%c0_64, %c0_65] : memref<32x128xf32, #tpu.memory_space<vmem>>, vector<32x128xf32>
    %c0_66 = arith.constant 0 : index
    %c0_67 = arith.constant 0 : index
    %150 = vector.load %arg7[%c0_66, %c0_67] : memref<32x32xf32, #tpu.memory_space<vmem>>, vector<32x32xf32>
    %cst_68 = arith.constant 0.176776692 : f32
    %151 = vector.broadcast %cst_68 : f32 to vector<32x32xf32>
    %152 = arith.mulf %66, %151 : vector<32x32xf32>
    %cst_69 = arith.constant dense<0.000000e+00> : vector<32x128xf32>
    %153 = tpu.matmul %152, %148, %cst_69 {dimension_numbers = #tpu.dot_dimension_numbers<[1], [1], [0], [0], [0, 0, 1, 0], [], []>} : vector<32x32xf32>, vector<128x32xf32>, vector<32x128xf32> -> vector<32x128xf32>
    %154 = arith.addf %153, %149 : vector<32x128xf32>
    %cst_70 = arith.constant dense<0.000000e+00> : vector<32x32xf32>
    %155 = tpu.matmul %152, %66, %cst_70 {dimension_numbers = #tpu.dot_dimension_numbers<[1], [1], [0], [0], [0, 0, 1, 0], [], []>} : vector<32x32xf32>, vector<32x32xf32>, vector<32x32xf32> -> vector<32x32xf32>
    %156 = arith.addf %155, %150 : vector<32x32xf32>
    %cst_71 = arith.constant dense<0xFF800000> : vector<32xf32>
    %157 = vector.multi_reduction <maximumf>, %154, %cst_71 [1] : vector<32x128xf32> to vector<32xf32>
    %158 = vector.shape_cast %157 : vector<32xf32> to vector<32x1xf32>
    %cst_72 = arith.constant dense<0xFF800000> : vector<32xf32>
    %159 = vector.multi_reduction <maximumf>, %156, %cst_72 [1] : vector<32x32xf32> to vector<32xf32>
    %160 = vector.shape_cast %159 : vector<32xf32> to vector<32x1xf32>
    %161 = arith.maximumf %158, %160 : vector<32x1xf32>
    %162 = vector.broadcast %161 : vector<32x1xf32> to vector<32x128xf32>
    %163 = arith.subf %154, %162 : vector<32x128xf32>
    %164 = math.exp %163 : vector<32x128xf32>
    %165 = vector.broadcast %161 : vector<32x1xf32> to vector<32x32xf32>
    %166 = arith.subf %156, %165 : vector<32x32xf32>
    %167 = math.exp %166 : vector<32x32xf32>
    %cst_73 = arith.constant dense<0.000000e+00> : vector<32xf32>
    %168 = vector.multi_reduction <add>, %164, %cst_73 [1] : vector<32x128xf32> to vector<32xf32>
    %169 = vector.shape_cast %168 : vector<32xf32> to vector<32x1xf32>
    %cst_74 = arith.constant dense<0.000000e+00> : vector<32xf32>
    %170 = vector.multi_reduction <add>, %167, %cst_74 [1] : vector<32x32xf32> to vector<32xf32>
    %171 = vector.shape_cast %170 : vector<32xf32> to vector<32x1xf32>
    %172 = arith.addf %169, %171 : vector<32x1xf32>
    %173 = tpu.reciprocal %172 {approx = true} : vector<32x1xf32> -> vector<32x1xf32>
    %cst_75 = arith.constant dense<0.000000e+00> : vector<32x32xf32>
    %174 = tpu.matmul %164, %148, %cst_75 {dimension_numbers = #tpu.dot_dimension_numbers<[1], [0], [0], [1], [0, 0, 1, 1], [], []>} : vector<32x128xf32>, vector<128x32xf32>, vector<32x32xf32> -> vector<32x32xf32>
    %cst_76 = arith.constant dense<0.000000e+00> : vector<32x32xf32>
    %175 = tpu.matmul %167, %66, %cst_76 {dimension_numbers = #tpu.dot_dimension_numbers<[1], [0], [0], [1], [0, 0, 1, 1], [], []>} : vector<32x32xf32>, vector<32x32xf32>, vector<32x32xf32> -> vector<32x32xf32>
    %176 = arith.addf %174, %175 : vector<32x32xf32>
    %177 = vector.broadcast %173 : vector<32x1xf32> to vector<32x32xf32>
    %178 = arith.mulf %176, %177 : vector<32x32xf32>
    %c4 = arith.constant 4 : index
    %c0_77 = arith.constant 0 : index
    %179 = vector.load %arg13[%c4, %c0_77] : memref<6x32xf32, #tpu.memory_space<vmem>>, vector<1x32xf32>
    %c4_78 = arith.constant 4 : index
    %c0_79 = arith.constant 0 : index
    %180 = vector.load %arg14[%c4_78, %c0_79] : memref<6x32xf32, #tpu.memory_space<vmem>>, vector<1x32xf32>
    %cst_80 = arith.constant dense<0.000000e+00> : vector<32xf32>
    %181 = vector.multi_reduction <add>, %178, %cst_80 [1] : vector<32x32xf32> to vector<32xf32>
    %182 = vector.shape_cast %181 : vector<32xf32> to vector<32x1xf32>
    %cst_81 = arith.constant 3.200000e+01 : f32
    %183 = vector.broadcast %cst_81 : f32 to vector<32x1xf32>
    %184 = arith.divf %182, %183 : vector<32x1xf32>
    %185 = arith.mulf %178, %178 : vector<32x32xf32>
    %cst_82 = arith.constant dense<0.000000e+00> : vector<32xf32>
    %186 = vector.multi_reduction <add>, %185, %cst_82 [1] : vector<32x32xf32> to vector<32xf32>
    %187 = vector.shape_cast %186 : vector<32xf32> to vector<32x1xf32>
    %cst_83 = arith.constant 3.200000e+01 : f32
    %188 = vector.broadcast %cst_83 : f32 to vector<32x1xf32>
    %189 = arith.divf %187, %188 : vector<32x1xf32>
    %190 = arith.mulf %184, %184 : vector<32x1xf32>
    %191 = arith.subf %189, %190 : vector<32x1xf32>
    %192 = vector.broadcast %184 : vector<32x1xf32> to vector<32x32xf32>
    %193 = arith.subf %178, %192 : vector<32x32xf32>
    %cst_84 = arith.constant 9.99999974E-6 : f32
    %194 = vector.broadcast %cst_84 : f32 to vector<32x1xf32>
    %195 = arith.addf %191, %194 : vector<32x1xf32>
    %196 = math.rsqrt %195 : vector<32x1xf32>
    %197 = vector.broadcast %196 : vector<32x1xf32> to vector<32x32xf32>
    %198 = arith.mulf %193, %197 : vector<32x32xf32>
    %199 = vector.broadcast %179 : vector<1x32xf32> to vector<32x32xf32>
    %200 = arith.mulf %198, %199 : vector<32x32xf32>
    %201 = vector.broadcast %180 : vector<1x32xf32> to vector<32x32xf32>
    %202 = arith.addf %200, %201 : vector<32x32xf32>
    %c0_85 = arith.constant 0 : index
    %c0_86 = arith.constant 0 : index
    %203 = vector.load %arg11[%c0_85, %c0_86] : memref<32x32xf32, #tpu.memory_space<vmem>>, vector<32x32xf32>
    %cst_87 = arith.constant dense<0.000000e+00> : vector<32x32xf32>
    %204 = tpu.matmul %202, %203, %cst_87 {dimension_numbers = #tpu.dot_dimension_numbers<[1], [0], [0], [1], [0, 0, 1, 1], [], []>} : vector<32x32xf32>, vector<32x32xf32>, vector<32x32xf32> -> vector<32x32xf32>
    %cst_88 = arith.constant dense<0.000000e+00> : vector<32x32xf32>
    %205 = tpu.matmul %204, %204, %cst_88 {dimension_numbers = #tpu.dot_dimension_numbers<[1], [1], [0], [0], [0, 0, 1, 0], [], []>} : vector<32x32xf32>, vector<32x32xf32>, vector<32x32xf32> -> vector<32x32xf32>
    %c0_89 = arith.constant 0 : index
    %c0_90 = arith.constant 0 : index
    %206 = vector.load %arg3[%c0_89, %c0_90] : memref<32x32xf32, #tpu.memory_space<vmem>>, vector<32x32xf32>
    %207 = arith.addf %205, %206 : vector<32x32xf32>
    %cst_91 = arith.constant dense<0xFF800000> : vector<32xf32>
    %208 = vector.multi_reduction <maximumf>, %207, %cst_91 [1] : vector<32x32xf32> to vector<32xf32>
    %209 = vector.shape_cast %208 : vector<32xf32> to vector<32x1xf32>
    %210 = vector.broadcast %209 : vector<32x1xf32> to vector<32x32xf32>
    %211 = arith.subf %207, %210 : vector<32x32xf32>
    %212 = math.exp %211 : vector<32x32xf32>
    %cst_92 = arith.constant dense<0.000000e+00> : vector<32xf32>
    %213 = vector.multi_reduction <add>, %212, %cst_92 [1] : vector<32x32xf32> to vector<32xf32>
    %214 = vector.shape_cast %213 : vector<32xf32> to vector<32x1xf32>
    %215 = tpu.reciprocal %214 {approx = true} : vector<32x1xf32> -> vector<32x1xf32>
    %cst_93 = arith.constant dense<0.000000e+00> : vector<32x32xf32>
    %216 = tpu.matmul %212, %202, %cst_93 {dimension_numbers = #tpu.dot_dimension_numbers<[1], [0], [0], [1], [0, 0, 1, 1], [], []>} : vector<32x32xf32>, vector<32x32xf32>, vector<32x32xf32> -> vector<32x32xf32>
    %217 = vector.broadcast %215 : vector<32x1xf32> to vector<32x32xf32>
    %218 = arith.mulf %216, %217 : vector<32x32xf32>
    %c5 = arith.constant 5 : index
    %c0_94 = arith.constant 0 : index
    %219 = vector.load %arg13[%c5, %c0_94] : memref<6x32xf32, #tpu.memory_space<vmem>>, vector<1x32xf32>
    %c5_95 = arith.constant 5 : index
    %c0_96 = arith.constant 0 : index
    %220 = vector.load %arg14[%c5_95, %c0_96] : memref<6x32xf32, #tpu.memory_space<vmem>>, vector<1x32xf32>
    %cst_97 = arith.constant dense<0.000000e+00> : vector<32xf32>
    %221 = vector.multi_reduction <add>, %218, %cst_97 [1] : vector<32x32xf32> to vector<32xf32>
    %222 = vector.shape_cast %221 : vector<32xf32> to vector<32x1xf32>
    %cst_98 = arith.constant 3.200000e+01 : f32
    %223 = vector.broadcast %cst_98 : f32 to vector<32x1xf32>
    %224 = arith.divf %222, %223 : vector<32x1xf32>
    %225 = arith.mulf %218, %218 : vector<32x32xf32>
    %cst_99 = arith.constant dense<0.000000e+00> : vector<32xf32>
    %226 = vector.multi_reduction <add>, %225, %cst_99 [1] : vector<32x32xf32> to vector<32xf32>
    %227 = vector.shape_cast %226 : vector<32xf32> to vector<32x1xf32>
    %cst_100 = arith.constant 3.200000e+01 : f32
    %228 = vector.broadcast %cst_100 : f32 to vector<32x1xf32>
    %229 = arith.divf %227, %228 : vector<32x1xf32>
    %230 = arith.mulf %224, %224 : vector<32x1xf32>
    %231 = arith.subf %229, %230 : vector<32x1xf32>
    %232 = vector.broadcast %224 : vector<32x1xf32> to vector<32x32xf32>
    %233 = arith.subf %218, %232 : vector<32x32xf32>
    %cst_101 = arith.constant 9.99999974E-6 : f32
    %234 = vector.broadcast %cst_101 : f32 to vector<32x1xf32>
    %235 = arith.addf %231, %234 : vector<32x1xf32>
    %236 = math.rsqrt %235 : vector<32x1xf32>
    %237 = vector.broadcast %236 : vector<32x1xf32> to vector<32x32xf32>
    %238 = arith.mulf %233, %237 : vector<32x32xf32>
    %239 = vector.broadcast %219 : vector<1x32xf32> to vector<32x32xf32>
    %240 = arith.mulf %238, %239 : vector<32x32xf32>
    %241 = vector.broadcast %220 : vector<1x32xf32> to vector<32x32xf32>
    %242 = arith.addf %240, %241 : vector<32x32xf32>
    %c0_102 = arith.constant 0 : index
    %c0_103 = arith.constant 0 : index
    %243 = vector.load %arg12[%c0_102, %c0_103] : memref<32x32xf32, #tpu.memory_space<vmem>>, vector<32x32xf32>
    %cst_104 = arith.constant dense<0.000000e+00> : vector<32x32xf32>
    %244 = tpu.matmul %242, %243, %cst_104 {dimension_numbers = #tpu.dot_dimension_numbers<[1], [0], [0], [1], [0, 0, 1, 1], [], []>} : vector<32x32xf32>, vector<32x32xf32>, vector<32x32xf32> -> vector<32x32xf32>
    %c0_105 = arith.constant 0 : index
    %c0_106 = arith.constant 0 : index
    %245 = vector.load %arg4[%c0_105, %c0_106] : memref<128x32xf32, #tpu.memory_space<vmem>>, vector<128x32xf32>
    %c0_107 = arith.constant 0 : index
    %c0_108 = arith.constant 0 : index
    %246 = vector.load %arg5[%c0_107, %c0_108] : memref<128x128xf32, #tpu.memory_space<vmem>>, vector<128x128xf32>
    %cst_109 = arith.constant 0.176776692 : f32
    %247 = vector.broadcast %cst_109 : f32 to vector<128x32xf32>
    %248 = arith.mulf %122, %247 : vector<128x32xf32>
    %cst_110 = arith.constant dense<0.000000e+00> : vector<128x32xf32>
    %249 = tpu.matmul %248, %244, %cst_110 {dimension_numbers = #tpu.dot_dimension_numbers<[1], [1], [0], [0], [0, 0, 1, 0], [], []>} : vector<128x32xf32>, vector<32x32xf32>, vector<128x32xf32> -> vector<128x32xf32>
    %250 = arith.addf %249, %245 : vector<128x32xf32>
    %cst_111 = arith.constant dense<0.000000e+00> : vector<128x128xf32>
    %251 = tpu.matmul %248, %122, %cst_111 {dimension_numbers = #tpu.dot_dimension_numbers<[1], [1], [0], [0], [0, 0, 1, 0], [], []>} : vector<128x32xf32>, vector<128x32xf32>, vector<128x128xf32> -> vector<128x128xf32>
    %252 = arith.addf %251, %246 : vector<128x128xf32>
    %cst_112 = arith.constant dense<0xFF800000> : vector<128xf32>
    %253 = vector.multi_reduction <maximumf>, %250, %cst_112 [1] : vector<128x32xf32> to vector<128xf32>
    %254 = vector.shape_cast %253 : vector<128xf32> to vector<128x1xf32>
    %cst_113 = arith.constant dense<0xFF800000> : vector<128xf32>
    %255 = vector.multi_reduction <maximumf>, %252, %cst_113 [1] : vector<128x128xf32> to vector<128xf32>
    %256 = vector.shape_cast %255 : vector<128xf32> to vector<128x1xf32>
    %257 = arith.maximumf %254, %256 : vector<128x1xf32>
    %258 = vector.broadcast %257 : vector<128x1xf32> to vector<128x32xf32>
    %259 = arith.subf %250, %258 : vector<128x32xf32>
    %260 = math.exp %259 : vector<128x32xf32>
    %261 = vector.broadcast %257 : vector<128x1xf32> to vector<128x128xf32>
    %262 = arith.subf %252, %261 : vector<128x128xf32>
    %263 = math.exp %262 : vector<128x128xf32>
    %cst_114 = arith.constant dense<0.000000e+00> : vector<128xf32>
    %264 = vector.multi_reduction <add>, %260, %cst_114 [1] : vector<128x32xf32> to vector<128xf32>
    %265 = vector.shape_cast %264 : vector<128xf32> to vector<128x1xf32>
    %cst_115 = arith.constant dense<0.000000e+00> : vector<128xf32>
    %266 = vector.multi_reduction <add>, %263, %cst_115 [1] : vector<128x128xf32> to vector<128xf32>
    %267 = vector.shape_cast %266 : vector<128xf32> to vector<128x1xf32>
    %268 = arith.addf %265, %267 : vector<128x1xf32>
    %269 = tpu.reciprocal %268 {approx = true} : vector<128x1xf32> -> vector<128x1xf32>
    %cst_116 = arith.constant dense<0.000000e+00> : vector<128x32xf32>
    %270 = tpu.matmul %260, %244, %cst_116 {dimension_numbers = #tpu.dot_dimension_numbers<[1], [0], [0], [1], [0, 0, 1, 1], [], []>} : vector<128x32xf32>, vector<32x32xf32>, vector<128x32xf32> -> vector<128x32xf32>
    %cst_117 = arith.constant dense<0.000000e+00> : vector<128x32xf32>
    %271 = tpu.matmul %263, %122, %cst_117 {dimension_numbers = #tpu.dot_dimension_numbers<[1], [0], [0], [1], [0, 0, 1, 1], [], []>} : vector<128x128xf32>, vector<128x32xf32>, vector<128x32xf32> -> vector<128x32xf32>
    %272 = arith.addf %270, %271 : vector<128x32xf32>
    %273 = vector.broadcast %269 : vector<128x1xf32> to vector<128x32xf32>
    %274 = arith.mulf %272, %273 : vector<128x32xf32>
    %c0_118 = arith.constant 0 : index
    %c0_119 = arith.constant 0 : index
    %275 = vector.load %arg15[%c0_118, %c0_119] : memref<128x32xf32, #tpu.memory_space<vmem>>, vector<128x32xf32>
    tpu.vector_store %arg15[%c0_118, %c0_119], %274 {strides = array<i32>} : memref<128x32xf32, #tpu.memory_space<vmem>>, vector<128x32xf32>,
    return
  }
  func.func @transform_0(%arg0: i32) -> (i32, i32) {
    %c0_i32 = arith.constant 0 : i32
    %c0_i32_0 = arith.constant 0 : i32
    return %arg0, %c0_i32 : i32, i32
  }
  func.func @transform_1(%arg0: i32) -> (i32, i32) {
    %c0_i32 = arith.constant 0 : i32
    %c0_i32_0 = arith.constant 0 : i32
    %c0_i32_1 = arith.constant 0 : i32
    return %c0_i32, %c0_i32_0 : i32, i32
  }
  func.func @transform_2(%arg0: i32) -> (i32, i32) {
    %c0_i32 = arith.constant 0 : i32
    %c0_i32_0 = arith.constant 0 : i32
    %c0_i32_1 = arith.constant 0 : i32
    return %c0_i32, %c0_i32_0 : i32, i32
  }
  func.func @transform_3(%arg0: i32) -> (i32, i32) {
    %c0_i32 = arith.constant 0 : i32
    %c0_i32_0 = arith.constant 0 : i32
    %c0_i32_1 = arith.constant 0 : i32
    return %c0_i32, %c0_i32_0 : i32, i32
  }
  func.func @transform_4(%arg0: i32) -> (i32, i32) {
    %c0_i32 = arith.constant 0 : i32
    %c0_i32_0 = arith.constant 0 : i32
    %c0_i32_1 = arith.constant 0 : i32
    return %c0_i32, %c0_i32_0 : i32, i32
  }
  func.func @transform_5(%arg0: i32) -> (i32, i32) {
    %c0_i32 = arith.constant 0 : i32
    %c0_i32_0 = arith.constant 0 : i32
    %c0_i32_1 = arith.constant 0 : i32
    return %c0_i32, %c0_i32_0 : i32, i32
  }
  func.func @transform_6(%arg0: i32) -> (i32, i32) {
    %c0_i32 = arith.constant 0 : i32
    %c0_i32_0 = arith.constant 0 : i32
    %c0_i32_1 = arith.constant 0 : i32
    return %c0_i32, %c0_i32_0 : i32, i32
  }
  func.func @transform_7(%arg0: i32) -> (i32, i32) {
    %c0_i32 = arith.constant 0 : i32
    %c0_i32_0 = arith.constant 0 : i32
    %c0_i32_1 = arith.constant 0 : i32
    return %c0_i32, %c0_i32_0 : i32, i32
  }
  func.func @transform_8(%arg0: i32) -> (i32, i32) {
    %c0_i32 = arith.constant 0 : i32
    %c0_i32_0 = arith.constant 0 : i32
    %c0_i32_1 = arith.constant 0 : i32
    return %c0_i32, %c0_i32_0 : i32, i32
  }
  func.func @transform_9(%arg0: i32) -> (i32, i32) {
    %c0_i32 = arith.constant 0 : i32
    %c0_i32_0 = arith.constant 0 : i32
    %c0_i32_1 = arith.constant 0 : i32
    return %c0_i32, %c0_i32_0 : i32, i32
  }
  func.func @transform_10(%arg0: i32) -> (i32, i32) {
    %c0_i32 = arith.constant 0 : i32
    %c0_i32_0 = arith.constant 0 : i32
    %c0_i32_1 = arith.constant 0 : i32
    return %c0_i32, %c0_i32_0 : i32, i32
  }
  func.func @transform_11(%arg0: i32) -> (i32, i32) {
    %c0_i32 = arith.constant 0 : i32
    %c0_i32_0 = arith.constant 0 : i32
    %c0_i32_1 = arith.constant 0 : i32
    return %c0_i32, %c0_i32_0 : i32, i32
  }
  func.func @transform_12(%arg0: i32) -> (i32, i32) {
    %c0_i32 = arith.constant 0 : i32
    %c0_i32_0 = arith.constant 0 : i32
    %c0_i32_1 = arith.constant 0 : i32
    return %c0_i32, %c0_i32_0 : i32, i32
  }
  func.func @transform_13(%arg0: i32) -> (i32, i32) {
    %c0_i32 = arith.constant 0 : i32
    %c0_i32_0 = arith.constant 0 : i32
    %c0_i32_1 = arith.constant 0 : i32
    return %c0_i32, %c0_i32_0 : i32, i32
  }
  func.func @transform_14(%arg0: i32) -> (i32, i32) {
    %c0_i32 = arith.constant 0 : i32
    %c0_i32_0 = arith.constant 0 : i32
    return %arg0, %c0_i32 : i32, i32
  }
}

</mosaic_0001>

<bundles_post_ra>
// kernel: tpu_custom_call.1
= control target key start
LH: loop header
LB: loop body
LE: loop exit
PB: predicated region body
PF: predicated region fallthrough
CT: control target
= control target key end

     0   :  { %19 = vsyncpa [#allocation3], 0  ;;  %s9290_s0 = inlined_call_operand.vmem [shape: f32[128,32], index: 0, kind: input, shape index: {}]   ;;  %s9291_s1 = inlined_call_operand.vmem [shape: f32[32,128], index: 1, kind: input, shape index: {}]   ;;  %s9292_s2 = inlined_call_operand.vmem [shape: f32[32,32], index: 2, kind: input, shape index: {}]   ;;  %s9293_s3 = inlined_call_operand.vmem [shape: f32[128,32], index: 3, kind: input, shape index: {}]   ;;  %s9294_s4 = inlined_call_operand.vmem [shape: f32[128,128], index: 4, kind: input, shape index: {}]   ;;  %s9295_s5 = inlined_call_operand.vmem [shape: f32[32,128], index: 5, kind: input, shape index: {}]   ;;  %s9296_s6 = inlined_call_operand.vmem [shape: f32[32,32], index: 6, kind: input, shape index: {}]   ;;  %s9297_s7 = inlined_call_operand.vmem [shape: f32[32,32], index: 7, kind: input, shape index: {}]   ;;  %s9298_s8 = inlined_call_operand.hbm [shape: f32[32,32], index: 8, kind: input, shape index: {}]   ;;  %s9299_s9 = inlined_call_operand.vmem [shape: f32[32,32], index: 9, kind: input, shape index: {}]   ;;  %s9300_s10 = inlined_call_operand.hbm [shape: f32[32,32], index: 10, kind: input, shape index: {}]   ;;  %s9301_s11 = inlined_call_operand.hbm [shape: f32[32,32], index: 11, kind: input, shape index: {}]   ;;  %s9302_s12 = inlined_call_operand.vmem [shape: f32[6,32], index: 12, kind: input, shape index: {}]   ;;  %s9303_s13 = inlined_call_operand.vmem [shape: f32[6,32], index: 13, kind: input, shape index: {}]   ;;  %s9304_s14 = inlined_call_operand.vmem [shape: f32[128,32], index: 14, kind: output, shape index: {}]  }
   0x1   :  { %20 = vsyncpa [#allocation5], 0  ;;  %s7043_s29 = smov [#allocation4]   ;;  %s7044_s15 = smov [#allocation2]  }
   0x2   :  { %s56_s30 = sshll.u32 %s7043_s29, 4  ;;  %s42_s16 = sshll.u32 %s7044_s15, 4  ;;  %s57_s30 = int_to_ptr.vmem [resolvable:$true] %s56_s30  ;;  %s7123_s16 = int_to_ptr.vmem [resolvable:$true] %s42_s16 }
   0x3   :  { %s6973_s19 = scalar_lea.hbm %s9300_s10, 512 }
   0x4   :  { %p6974_p0 = scmp.ne.s32.totalorder %s9300_s10, %s6973_s19  ;;  %p6977_p1 = scmp.lt.u32.totalorder %s6973_s19, %s9300_s10 }
   0x6   :  { %p6979_p2 = pnand %p6977_p1, %p6974_p0 }
   0x8   :  { %6982 = shalt.err (!%p6979_p2)
}
   0x9   :  { %s6983_s24 = scalar_lea.vmem %s57_s30, 512  ;;  %p6988_p4 = scmp.lt.s32.totalorder %s57_s30, %s57_s30 }
   0xa   :  { %p6984_p3 = scmp.ne.s32.totalorder %s57_s30, %s6983_s24  ;;  %p6989_p5 = scmp.lt.s32.totalorder %s6983_s24, %s6983_s24 }
   0xc   :  { %p6990_p6 = por %p6989_p5, %p6988_p4 }
   0xe   :  { %p6991_p7 = pnand %p6990_p6, %p6984_p3 }
  0x10   :  { %6994 = shalt.err (!%p6991_p7)
}
  0x11   :  { %s7045_s25 = smov 128   ;;  %s7046_s26 = smov 8  }
  0x12   :  { %62 = dma.hbm_to_vmem [thread:$0]  %s9300_s10, 512, %s57_s30, [#allocation5], %s7045_s25, %s7045_s25, %s7046_s26  }
  0x13   :  { %s6995_s17 = scalar_lea.hbm %s9298_s8, 512 }
  0x14   :  { %p6996_p8 = scmp.ne.s32.totalorder %s9298_s8, %s6995_s17  ;;  %p6999_p9 = scmp.lt.u32.totalorder %s6995_s17, %s9298_s8 }
  0x16   :  { %p7001_p10 = pnand %p6999_p9, %p6996_p8 }
  0x18   :  { %7004 = shalt.err (!%p7001_p10)
}
  0x19   :  { %s7005_s22 = scalar_lea.vmem %s7123_s16, 512  ;;  %p7010_p12 = scmp.lt.s32.totalorder %s7123_s16, %s7123_s16 }
  0x1a   :  { %p7006_p11 = scmp.ne.s32.totalorder %s7123_s16, %s7005_s22  ;;  %p7011_p13 = scmp.lt.s32.totalorder %s7005_s22, %s7005_s22 }
  0x1c   :  { %p7012_p0 = por %p7011_p13, %p7010_p12 }
  0x1e   :  { %p7013_p1 = pnand %p7012_p0, %p7006_p11 }
  0x20   :  { %7016 = shalt.err (!%p7013_p1)
}
  0x21   :  { %48 = dma.hbm_to_vmem [thread:$0]  %s9298_s8, 512, %s7123_s16, [#allocation3], %s7045_s25, %s7045_s25, %s7046_s26  }
  0x22   :  { %s7047_s23 = smov [#allocation6]   ;;  %s7017_s29 = scalar_lea.hbm %s9301_s11, 512 }
  0x23   :  { %s68_s24 = sshll.u32 %s7047_s23, 4  ;;  %p7018_p2 = scmp.ne.s32.totalorder %s9301_s11, %s7017_s29  ;;  %s69_s24 = int_to_ptr.vmem [resolvable:$true] %s68_s24 }
  0x24   :  { %p7021_p3 = scmp.lt.u32.totalorder %s7017_s29, %s9301_s11 }
  0x26   :  { %p7023_p4 = pnand %p7021_p3, %p7018_p2 }
  0x28   :  { %7026 = shalt.err (!%p7023_p4)
}
  0x29   :  { %s7027_s20 = scalar_lea.vmem %s69_s24, 512  ;;  %p7032_p6 = scmp.lt.s32.totalorder %s69_s24, %s69_s24 }
  0x2a   :  { %p7028_p5 = scmp.ne.s32.totalorder %s69_s24, %s7027_s20  ;;  %p7033_p7 = scmp.lt.s32.totalorder %s7027_s20, %s7027_s20 }
  0x2c   :  { %p7034_p8 = por %p7033_p7, %p7032_p6 }
  0x2e   :  { %p7035_p9 = pnand %p7034_p8, %p7028_p5 }
  0x30   :  { %7038 = shalt.err (!%p7035_p9)
}
  0x31   :  { %74 = dma.hbm_to_vmem [thread:$0]  %s9301_s11, 512, %s69_s24, [#allocation5], %s7045_s25, %s7045_s25, %s7046_s26  }
  0x32   :  { %7039 = dma.done.wait [#allocation3], 512  }
  0x33   :  { %7040 = vsyncadd [#allocation3], 4294966784 }
  0x34   :  { %7041 = dma.done.wait [#allocation5], 1024  }
  0x35   :  { %7042 = vsyncadd [#allocation5], 4294966272  ;;  %vm106_vm0 = vcmask 261120   ;;  %v7178_v0 = vld [vmem:[%s9290_s0 + $0x18] sm:$0xff]  ;;  %v7183_v1 = vld [vmem:[%s9290_s0] sm:$0xff] }
  0x36   :  { %v7188_v2 = vld [vmem:[%s9290_s0 + $0x8] sm:$0xff]  ;;  %v116_v3 = vsel %vm106_vm0, %v7178_v0, 0.0  ;;  %v107_v4 = vsel %vm106_vm0, %v7183_v1, 0.0  ;;  %v172_v5 = vmul.f32 %v7183_v1, %v7183_v1  ;;  %v7204_v9 = vld [vmem:[%s9290_s0 + $0x10] sm:$0xff]  ;;  %v175_v12 = vmul.f32 %v7178_v0, %v7178_v0  ;;  %v7223_v17 = vld [vmem:[%s9290_s0 + $0x20] sm:$0xff] }
  0x37   :  { %117 = vadd.xlane.f32.xlu1 %v116_v3  ;;  %108 = vadd.xlane.f32.xlu0 %v107_v4  ;;  %v110_v7 = vsel %vm106_vm0, %v7188_v2, 0.0  ;;  %v173_v8 = vmul.f32 %v7188_v2, %v7188_v2  ;;  %v113_v11 = vsel %vm106_vm0, %v7204_v9, 0.0  ;;  %v174_v13 = vmul.f32 %v7204_v9, %v7204_v9  ;;  %v7218_v16 = vld [vmem:[%s9290_s0 + $0x28] sm:$0xff]  ;;  %v7238_v24 = vld [vmem:[%s9290_s0 + $0x38] sm:$0xff]  ;;  %v7243_v25 = vld [vmem:[%s9290_s0 + $0x30] sm:$0xff] }
  0x38   :  { %v188_v6 = vsel %vm106_vm0, %v172_v5, 0.0  ;;  %v197_v14 = vsel %vm106_vm0, %v175_v12, 0.0  ;;  %v122_v18 = vsel %vm106_vm0, %v7218_v16, 0.0  ;;  %v119_v19 = vsel %vm106_vm0, %v7223_v17, 0.0  ;;  %v7258_v32 = vld [vmem:[%s9290_s0 + $0x48] sm:$0xff]  ;;  %v7263_v33 = vld [vmem:[%s9290_s0 + $0x40] sm:$0xff]  ;;  %vm7521_vm1 = vmpackc.low %vm106_vm0, %vm106_vm0 }
  0x39   :  { %v191_v10 = vsel %vm106_vm0, %v173_v8, 0.0  ;;  %v194_v15 = vsel %vm106_vm0, %v174_v13, 0.0  ;;  %v177_v20 = vmul.f32 %v7218_v16, %v7218_v16  ;;  %v176_v21 = vmul.f32 %v7223_v17, %v7223_v17  ;;  %v7278_v40 = vld [vmem:[%s9290_s0 + $0x58] sm:$0xff]  ;;  %v7283_v41 = vld [vmem:[%s9290_s0 + $0x50] sm:$0xff]  ;;  %v7298_v48 = vld [vmem:[%s9290_s0 + $0x68] sm:$0xff] }
  0x3a   :  { %v128_v26 = vsel %vm106_vm0, %v7238_v24, 0.0  ;;  %v125_v27 = vsel %vm106_vm0, %v7243_v25, 0.0  ;;  %v179_v28 = vmul.f32 %v7238_v24, %v7238_v24  ;;  %v178_v29 = vmul.f32 %v7243_v25, %v7243_v25  ;;  %v7303_v49 = vld [vmem:[%s9290_s0 + $0x60] sm:$0xff]  ;;  %v7318_v56 = vld [vmem:[%s9290_s0 + $0x78] sm:$0xff]  ;;  %v7323_v57 = vld [vmem:[%s9290_s0 + $0x70] sm:$0xff] }
  0x3b   :  { %189 = vadd.xlane.f32.xlu1 %v188_v6  ;;  %111 = vadd.xlane.f32.xlu0 %v110_v7  ;;  %v203_v22 = vsel %vm106_vm0, %v177_v20, 0.0  ;;  %v200_v23 = vsel %vm106_vm0, %v176_v21, 0.0  ;;  %v134_v34 = vsel %vm106_vm0, %v7258_v32, 0.0  ;;  %v131_v35 = vsel %vm106_vm0, %v7263_v33, 0.0  ;;  %v388_v3 = vld [vmem:[%s9291_s1] sm:$0xff] }
  0x3c   :  { %v209_v30 = vsel %vm106_vm0, %v179_v28, 0.0  ;;  %v206_v31 = vsel %vm106_vm0, %v178_v29, 0.0  ;;  %v181_v36 = vmul.f32 %v7258_v32, %v7258_v32  ;;  %v180_v37 = vmul.f32 %v7263_v33, %v7263_v33  ;;  %5502 = vmatprep.mubr.f32.mxu0 %v388_v3 }
  0x3d   :  { %v140_v42 = vsel %vm106_vm0, %v7278_v40, 0.0  ;;  %v137_v43 = vsel %vm106_vm0, %v7283_v41, 0.0  ;;  %v183_v44 = vmul.f32 %v7278_v40, %v7278_v40  ;;  %v182_v45 = vmul.f32 %v7283_v41, %v7283_v41 }
  0x3e   :  { %v215_v38 = vsel %vm106_vm0, %v181_v36, 0.0  ;;  %v212_v39 = vsel %vm106_vm0, %v180_v37, 0.0  ;;  %v146_v50 = vsel %vm106_vm0, %v7298_v48, 0.0  ;;  %v143_v51 = vsel %vm106_vm0, %v7303_v49, 0.0 }
  0x3f   :  { %192 = vadd.xlane.f32.xlu1 %v191_v10  ;;  %114 = vadd.xlane.f32.xlu0 %v113_v11  ;;  %v221_v46 = vsel %vm106_vm0, %v183_v44, 0.0  ;;  %v218_v47 = vsel %vm106_vm0, %v182_v45, 0.0  ;;  %v185_v52 = vmul.f32 %v7298_v48, %v7298_v48  ;;  %v184_v53 = vmul.f32 %v7303_v49, %v7303_v49 }
  0x40   :  { %v152_v58 = vsel %vm106_vm0, %v7318_v56, 0.0  ;;  %v149_v59 = vsel %vm106_vm0, %v7323_v57, 0.0  ;;  %v187_v60 = vmul.f32 %v7318_v56, %v7318_v56  ;;  %v186_v61 = vmul.f32 %v7323_v57, %v7323_v57 }
  0x41   :  { %v227_v54 = vsel %vm106_vm0, %v185_v52, 0.0  ;;  %v224_v55 = vsel %vm106_vm0, %v184_v53, 0.0 }
  0x42   :  { %v233_v62 = vsel %vm106_vm0, %v187_v60, 0.0  ;;  %v230_v63 = vsel %vm106_vm0, %v186_v61, 0.0  ;;  %v7358_v60 = vld [vmem:[%s9302_s12] ss:$0 sm:$0xff] }
  0x43   :  { %198 = vadd.xlane.f32.xlu1 %v197_v14  ;;  %195 = vadd.xlane.f32.xlu0 %v194_v15 }
  0x47   :  { %123 = vadd.xlane.f32.xlu1 %v122_v18  ;;  %120 = vadd.xlane.f32.xlu0 %v119_v19 }
  0x4b   :  { %204 = vadd.xlane.f32.xlu1 %v203_v22  ;;  %201 = vadd.xlane.f32.xlu0 %v200_v23 }
  0x4f   :  { %129 = vadd.xlane.f32.xlu1 %v128_v26  ;;  %126 = vadd.xlane.f32.xlu0 %v125_v27 }
  0x53   :  { %210 = vadd.xlane.f32.xlu1 %v209_v30  ;;  %207 = vadd.xlane.f32.xlu0 %v206_v31 }
  0x57   :  { %135 = vadd.xlane.f32.xlu1 %v134_v34  ;;  %132 = vadd.xlane.f32.xlu0 %v131_v35 }
  0x5b   :  { %216 = vadd.xlane.f32.xlu1 %v215_v38  ;;  %213 = vadd.xlane.f32.xlu0 %v212_v39 }
  0x5f   :  { %141 = vadd.xlane.f32.xlu1 %v140_v42  ;;  %138 = vadd.xlane.f32.xlu0 %v137_v43 }
  0x63   :  { %222 = vadd.xlane.f32.xlu1 %v221_v46  ;;  %219 = vadd.xlane.f32.xlu0 %v218_v47 }
  0x67   :  { %147 = vadd.xlane.f32.xlu1 %v146_v50  ;;  %144 = vadd.xlane.f32.xlu0 %v143_v51 }
  0x6b   :  { %228 = vadd.xlane.f32.xlu1 %v227_v54  ;;  %225 = vadd.xlane.f32.xlu0 %v224_v55 }
  0x6f   :  { %153 = vadd.xlane.f32.xlu1 %v152_v58  ;;  %150 = vadd.xlane.f32.xlu0 %v149_v59 }
  0x73   :  { %234 = vadd.xlane.f32.xlu1 %v233_v62  ;;  %231 = vadd.xlane.f32.xlu0 %v230_v63 }
  0xc4   :  { %v118_v4 = vpop.xlane.xlu1 %117  ;;  %v109_v5 = vpop.xlane.xlu0 %108 }
  0xc5   :  { %v156_v6 = vmul.f32 0.03125, %v109_v5  ;;  %v7338_v14 = vmul.f32 0.03125, %v118_v4 }
  0xc7   :  { %v252_v10 = vmul.f32 %v156_v6, %v156_v6  ;;  %v255_v26 = vmul.f32 %v7338_v14, %v7338_v14  ;;  %v284_v45 = vsub.f32 %v7183_v1, %v156_v6 }
  0xc8   :  { %v190_v7 = vpop.xlane.xlu1 %189  ;;  %v112_v8 = vpop.xlane.xlu0 %111 }
  0xc9   :  { %v236_v11 = vmul.f32 0.03125, %v190_v7  ;;  %v157_v12 = vmul.f32 0.03125, %v112_v8 }
  0xcb   :  { %v268_v13 = vsub.f32 %v236_v11, %v252_v10  ;;  %v253_v20 = vmul.f32 %v157_v12, %v157_v12  ;;  %v285_v1 = vsub.f32 %v7188_v2, %v157_v12  ;;  %v7369_v10 = vld [vmem:[%s9303_s13] ss:$0 sm:$0xff]  ;;  %v287_v2 = vsub.f32 %v7178_v0, %v7338_v14 }
  0xcc   :  { %v193_v15 = vpop.xlane.xlu1 %192  ;;  %v115_v18 = vpop.xlane.xlu0 %114 }
  0xcd   :  { %v300_v19 = vadd.f32 1e-05, %v268_v13  ;;  %v237_v21 = vmul.f32 0.03125, %v193_v15  ;;  %v7340_v22 = vmul.f32 0.03125, %v115_v18 }
  0xcf   :  { %6577 = vrsqrt.f32 %v300_v19  ;;  %v269_v23 = vsub.f32 %v237_v21, %v253_v20  ;;  %v254_v30 = vmul.f32 %v7340_v22, %v7340_v22  ;;  %v286_v11 = vsub.f32 %v7204_v9, %v7340_v22 }
  0xd0   :  { %v199_v27 = vpop.xlane.xlu1 %198  ;;  %v196_v28 = vpop.xlane.xlu0 %195 }
  0xd1   :  { %v301_v29 = vadd.f32 1e-05, %v269_v23  ;;  %v239_v31 = vmul.f32 0.03125, %v199_v27  ;;  %v238_v34 = vmul.f32 0.03125, %v196_v28 }
  0xd3   :  { %6579 = vrsqrt.f32 %v301_v29  ;;  %v271_v35 = vsub.f32 %v239_v31, %v255_v26  ;;  %v270_v36 = vsub.f32 %v238_v34, %v254_v30 }
  0xd4   :  { %v124_v37 = vpop.xlane.xlu1 %123  ;;  %v121_v38 = vpop.xlane.xlu0 %120 }
  0xd5   :  { %v303_v39 = vadd.f32 1e-05, %v271_v35  ;;  %v302_v42 = vadd.f32 1e-05, %v270_v36  ;;  %v7346_v43 = vmul.f32 0.03125, %v124_v37  ;;  %v7348_v44 = vmul.f32 0.03125, %v121_v38 }
  0xd7   :  { %6581 = vrsqrt.f32 %v303_v39  ;;  %v257_v51 = vmul.f32 %v7346_v43, %v7346_v43  ;;  %v256_v52 = vmul.f32 %v7348_v44, %v7348_v44 }
  0xd8   :  { %6583 = vrsqrt.f32 %v302_v42  ;;  %v205_v46 = vpop.xlane.xlu1 %204  ;;  %v202_v47 = vpop.xlane.xlu0 %201 }
  0xd9   :  { %v6578_v50 = vpop.eup %6577  ;;  %v241_v53 = vmul.f32 0.03125, %v205_v46  ;;  %v240_v54 = vmul.f32 0.03125, %v202_v47  ;;  %v288_v46 = vsub.f32 %v7223_v17, %v7348_v44 }
  0xda   :  { %v332_v55 = vmul.f32 %v6578_v50, %v284_v45  ;;  %v289_v45 = vsub.f32 %v7218_v16, %v7346_v43 }
  0xdb   :  { %v273_v58 = vsub.f32 %v241_v53, %v257_v51  ;;  %v272_v59 = vsub.f32 %v240_v54, %v256_v52 }
  0xdc   :  { %v130_v61 = vpop.xlane.xlu1 %129  ;;  %v127_v62 = vpop.xlane.xlu0 %126  ;;  %v352_v8 = vmul.f32 %v7358_v60, %v332_v55 }
  0xdd   :  { %v6580_v63 = vpop.eup %6579  ;;  %v305_v3 = vadd.f32 1e-05, %v273_v58  ;;  %v304_v4 = vadd.f32 1e-05, %v272_v59  ;;  %v7361_v5 = vmul.f32 0.03125, %v130_v61  ;;  %v7363_v6 = vmul.f32 0.03125, %v127_v62 }
  0xde   :  { %v333_v7 = vmul.f32 %v6580_v63, %v285_v1  ;;  %v372_v0 = vadd.f32 %v7369_v10, %v352_v8 }
  0xdf   :  { %6585 = vrsqrt.f32 %v305_v3  ;;  %v259_v19 = vmul.f32 %v7361_v5, %v7361_v5  ;;  %v258_v20 = vmul.f32 %v7363_v6, %v7363_v6 }
  0xe0   :  { %6587 = vrsqrt.f32 %v304_v4  ;;  %v211_v12 = vpop.xlane.xlu1 %210  ;;  %v208_v13 = vpop.xlane.xlu0 %207  ;;  %v353_v15 = vmul.f32 %v7358_v60, %v333_v7 }
  0xe1   :  { %v6582_v18 = vpop.eup %6581  ;;  %v243_v21 = vmul.f32 0.03125, %v211_v12  ;;  %v242_v23 = vmul.f32 0.03125, %v208_v13  ;;  %v291_v12 = vsub.f32 %v7238_v24, %v7361_v5  ;;  %v290_v13 = vsub.f32 %v7243_v25, %v7363_v6 }
  0xe2   :  { %v6584_v26 = vpop.eup %6583  ;;  %v373_v14 = vadd.f32 %v7369_v10, %v353_v15  ;;  %v335_v9 = vmul.f32 %v6582_v18, %v287_v2 }
  0xe3   :  { %v275_v22 = vsub.f32 %v243_v21, %v259_v19  ;;  %v274_v27 = vsub.f32 %v242_v23, %v258_v20  ;;  %v334_v28 = vmul.f32 %v6584_v26, %v286_v11 }
  0xe4   :  { %v136_v29 = vpop.xlane.xlu1 %135  ;;  %v133_v30 = vpop.xlane.xlu0 %132  ;;  %v6108_v31 = vpack.c.bf16 %v373_v14, %v372_v0  ;;  %v355_v34 = vmul.f32 %v7358_v60, %v335_v9 }
  0xe5   :  { %v307_v35 = vadd.f32 1e-05, %v275_v22  ;;  %v306_v36 = vadd.f32 1e-05, %v274_v27  ;;  %v7383_v37 = vmul.f32 0.03125, %v136_v29  ;;  %v7385_v38 = vmul.f32 0.03125, %v133_v30 }
  0xe6   :  { %6109 = vmatprep.subr.bf16.mxu0 %v6108_v31  ;;  %v354_v39 = vmul.f32 %v7358_v60, %v334_v28  ;;  %v375_v42 = vadd.f32 %v7369_v10, %v355_v34 }
  0xe7   :  { %6589 = vrsqrt.f32 %v307_v35  ;;  %6111 = vmatpush3.bf16.msra.mxu0 %v6108_v31  ;;  %v261_v53 = vmul.f32 %v7383_v37, %v7383_v37  ;;  %v260_v54 = vmul.f32 %v7385_v38, %v7385_v38 }
  0xe8   :  { %6591 = vrsqrt.f32 %v306_v36  ;;  %v217_v47 = vpop.xlane.xlu1 %216  ;;  %v214_v50 = vpop.xlane.xlu0 %213  ;;  %v374_v51 = vadd.f32 %v7369_v10, %v354_v39  ;;  %v293_v39 = vsub.f32 %v7258_v32, %v7383_v37 }
  0xe9   :  { %v6586_v52 = vpop.eup %6585  ;;  %v245_v55 = vmul.f32 0.03125, %v217_v47  ;;  %v244_v58 = vmul.f32 0.03125, %v214_v50 }
  0xea   :  { %v6588_v59 = vpop.eup %6587  ;;  %v6112_v1 = vpack.c.bf16 %v375_v42, %v374_v51  ;;  %v337_v16 = vmul.f32 %v6586_v52, %v289_v45  ;;  %v292_v42 = vsub.f32 %v7263_v33, %v7385_v38 }
  0xeb   :  { %v277_v43 = vsub.f32 %v245_v55, %v261_v53  ;;  %v276_v61 = vsub.f32 %v244_v58, %v260_v54  ;;  %v336_v17 = vmul.f32 %v6588_v59, %v288_v46 }
  0xec   :  { %6113 = vmatprep.subr.bf16.mxu0 %v6112_v1  ;;  %v142_v44 = vpop.xlane.xlu1 %141  ;;  %v139_v62 = vpop.xlane.xlu0 %138  ;;  %v357_v63 = vmul.f32 %v7358_v60, %v337_v16 }
  0xed   :  { %v309_v3 = vadd.f32 1e-05, %v277_v43  ;;  %v308_v4 = vadd.f32 1e-05, %v276_v61  ;;  %6115 = vmatpush3.bf16.msra.mxu0 %v6112_v1  ;;  %v7399_v7 = vmul.f32 0.03125, %v142_v44  ;;  %v7401_v8 = vmul.f32 0.03125, %v139_v62 }
  0xee   :  { %v356_v2 = vmul.f32 %v7358_v60, %v336_v17  ;;  %v377_v11 = vadd.f32 %v7369_v10, %v357_v63 }
  0xef   :  { %6593 = vrsqrt.f32 %v309_v3  ;;  %v263_v21 = vmul.f32 %v7399_v7, %v7399_v7  ;;  %v262_v23 = vmul.f32 %v7401_v8, %v7401_v8  ;;  %v295_v3 = vsub.f32 %v7278_v40, %v7399_v7 }
  0xf0   :  { %6595 = vrsqrt.f32 %v308_v4  ;;  %v223_v15 = vpop.xlane.xlu1 %222  ;;  %v220_v18 = vpop.xlane.xlu0 %219  ;;  %v376_v19 = vadd.f32 %v7369_v10, %v356_v2  ;;  %v294_v4 = vsub.f32 %v7283_v41, %v7401_v8 }
  0xf1   :  { %v6590_v20 = vpop.eup %6589  ;;  %v247_v26 = vmul.f32 0.03125, %v223_v15  ;;  %v246_v0 = vmul.f32 0.03125, %v220_v18 }
  0xf2   :  { %v6592_v14 = vpop.eup %6591  ;;  %v6116_v9 = vpack.c.bf16 %v377_v11, %v376_v19  ;;  %v339_v24 = vmul.f32 %v6590_v20, %v291_v12 }
  0xf3   :  { %v279_v5 = vsub.f32 %v247_v26, %v263_v21  ;;  %v278_v22 = vsub.f32 %v246_v0, %v262_v23  ;;  %v338_v25 = vmul.f32 %v6592_v14, %v290_v13 }
  0xf4   :  { %6117 = vmatprep.subr.bf16.mxu0 %v6116_v9  ;;  %v148_v6 = vpop.xlane.xlu1 %147  ;;  %v145_v27 = vpop.xlane.xlu0 %144  ;;  %v359_v28 = vmul.f32 %v7358_v60, %v339_v24 }
  0xf5   :  { %v311_v29 = vadd.f32 1e-05, %v279_v5  ;;  %v310_v30 = vadd.f32 1e-05, %v278_v22  ;;  %6119 = vmatpush3.bf16.msra.mxu0 %v6116_v9  ;;  %v7415_v31 = vmul.f32 0.03125, %v148_v6  ;;  %v7417_v34 = vmul.f32 0.03125, %v145_v27 }
  0xf6   :  { %v358_v35 = vmul.f32 %v7358_v60, %v338_v25  ;;  %v379_v36 = vadd.f32 %v7369_v10, %v359_v28 }
  0xf7   :  { %6597 = vrsqrt.f32 %v311_v29  ;;  %v265_v51 = vmul.f32 %v7415_v31, %v7415_v31  ;;  %v264_v52 = vmul.f32 %v7417_v34, %v7417_v34  ;;  %v297_v22 = vsub.f32 %v7298_v48, %v7415_v31 }
  0xf8   :  { %6599 = vrsqrt.f32 %v310_v30  ;;  %v229_v45 = vpop.xlane.xlu1 %228  ;;  %v226_v46 = vpop.xlane.xlu0 %225  ;;  %v378_v47 = vadd.f32 %v7369_v10, %v358_v35  ;;  %v296_v6 = vsub.f32 %v7303_v49, %v7417_v34 }
  0xf9   :  { %v6594_v50 = vpop.eup %6593  ;;  %v249_v53 = vmul.f32 0.03125, %v229_v45  ;;  %v248_v54 = vmul.f32 0.03125, %v226_v46 }
  0xfa   :  { %v6596_v55 = vpop.eup %6595  ;;  %v6120_v58 = vpack.c.bf16 %v379_v36, %v378_v47  ;;  %v341_v32 = vmul.f32 %v6594_v50, %v293_v39 }
  0xfb   :  { %v281_v37 = vsub.f32 %v249_v53, %v265_v51  ;;  %v280_v59 = vsub.f32 %v248_v54, %v264_v52  ;;  %v340_v33 = vmul.f32 %v6596_v55, %v292_v42 }
  0xfc   :  { %6121 = vmatprep.subr.bf16.mxu0 %v6120_v58  ;;  %v154_v38 = vpop.xlane.xlu1 %153  ;;  %v151_v1 = vpop.xlane.xlu0 %150  ;;  %v361_v16 = vmul.f32 %v7358_v60, %v341_v32 }
  0xfd   :  { %v313_v43 = vadd.f32 1e-05, %v281_v37  ;;  %v312_v61 = vadd.f32 1e-05, %v280_v59  ;;  %6123 = vmatpush3.bf16.msra.mxu0 %v6120_v58  ;;  %v171_v17 = vmul.f32 0.03125, %v154_v38  ;;  %v170_v44 = vmul.f32 0.03125, %v151_v1 }
  0xfe   :  { %v360_v62 = vmul.f32 %v7358_v60, %v340_v33  ;;  %v381_v63 = vadd.f32 %v7369_v10, %v361_v16 }
  0xff   :  { %6601 = vrsqrt.f32 %v313_v43  ;;  %v267_v15 = vmul.f32 %v171_v17, %v171_v17  ;;  %v266_v18 = vmul.f32 %v170_v44, %v170_v44  ;;  %v299_v48 = vsub.f32 %v7318_v56, %v171_v17  ;;  %v389_v56 = vld [vmem:[%s9291_s1 + $0x8] sm:$0xff] }
 0x100   :  { %6603 = vrsqrt.f32 %v312_v61  ;;  %v235_v2 = vpop.xlane.xlu1 %234  ;;  %v232_v11 = vpop.xlane.xlu0 %231  ;;  %v380_v12 = vadd.f32 %v7369_v10, %v360_v62  ;;  %v298_v45 = vsub.f32 %v7323_v57, %v170_v44  ;;  %v390_v57 = vld [vmem:[%s9291_s1 + $0x10] sm:$0xff] }
 0x101   :  { %v6598_v13 = vpop.eup %6597  ;;  %v251_v19 = vmul.f32 0.03125, %v235_v2  ;;  %v250_v20 = vmul.f32 0.03125, %v232_v11  ;;  %v557_v2 = vld [vmem:[%s9297_s7 + $0x10] sm:$0xff] }
 0x102   :  { %v6600_v21 = vpop.eup %6599  ;;  %v6124_v23 = vpack.c.bf16 %v381_v63, %v380_v12  ;;  %v343_v26 = vmul.f32 %v6598_v13, %v295_v3  ;;  %v555_v3 = vld [vmem:[%s9297_s7] sm:$0xff]  ;;  %v558_v12 = vld [vmem:[%s9297_s7 + $0x18] sm:$0xff] }
 0x103   :  { %v283_v0 = vsub.f32 %v251_v19, %v267_v15  ;;  %v282_v14 = vsub.f32 %v250_v20, %v266_v18  ;;  %v342_v9 = vmul.f32 %v6600_v21, %v294_v4  ;;  %v556_v4 = vld [vmem:[%s9297_s7 + $0x8] sm:$0xff]  ;;  %v6144_v13 = vpack.c.bf16 %v558_v12, %v557_v2  ;;  %v656_v2 = vld [vmem:[%s9292_s2] sm:$0xff] }
 0x104   :  { %6125 = vmatprep.subr.bf16.mxu0 %v6124_v23  ;;  %v363_v40 = vmul.f32 %v7358_v60, %v343_v26  ;;  %v6140_v11 = vpack.c.bf16 %v556_v4, %v555_v3  ;;  %v657_v4 = vld [vmem:[%s9292_s2 + $0x8] sm:$0xff] }
 0x105   :  { %v315_v41 = vadd.f32 1e-05, %v283_v0  ;;  %v314_v7 = vadd.f32 1e-05, %v282_v14  ;;  %6127 = vmatpush3.bf16.msra.mxu0 %v6124_v23  ;;  %v362_v8 = vmul.f32 %v7358_v60, %v342_v9 }
 0x106   :  { %v383_v24 = vadd.f32 %v7369_v10, %v363_v40  ;;  %6141 = vmatprep.subr.bf16.mxu1 %v6140_v11 }
 0x107   :  { %6605 = vrsqrt.f32 %v315_v41  ;;  %v382_v5 = vadd.f32 %v7369_v10, %v362_v8  ;;  %6143 = vmatpush3.bf16.msra.mxu1 %v6140_v11 }
 0x108   :  { %6607 = vrsqrt.f32 %v314_v7  ;;  %6145 = vmatprep.subr.bf16.mxu1 %v6144_v13 }
 0x109   :  { %v6602_v25 = vpop.eup %6601  ;;  %v6128_v27 = vpack.c.bf16 %v383_v24, %v382_v5 }
 0x10a   :  { %v6604_v28 = vpop.eup %6603  ;;  %v345_v29 = vmul.f32 %v6602_v25, %v297_v22 }
 0x10b   :  { %6129 = vmatprep.subr.bf16.mxu0 %v6128_v27  ;;  %v344_v30 = vmul.f32 %v6604_v28, %v296_v6  ;;  %6147 = vmatpush3.bf16.msra.mxu1 %v6144_v13 }
 0x10c   :  { %6131 = vmatpush3.bf16.msra.mxu0 %v6128_v27  ;;  %v365_v35 = vmul.f32 %v7358_v60, %v345_v29 }
 0x10d   :  { %v364_v36 = vmul.f32 %v7358_v60, %v344_v30 }
 0x10e   :  { %v385_v39 = vadd.f32 %v7369_v10, %v365_v35 }
 0x10f   :  { %v384_v42 = vadd.f32 %v7369_v10, %v364_v36 }
 0x111   :  { %v6606_v31 = vpop.eup %6605  ;;  %v6132_v49 = vpack.c.bf16 %v385_v39, %v384_v42 }
 0x112   :  { %v6608_v34 = vpop.eup %6607  ;;  %v347_v46 = vmul.f32 %v6606_v31, %v299_v48 }
 0x113   :  { %6133 = vmatprep.subr.bf16.mxu0 %v6132_v49  ;;  %v346_v47 = vmul.f32 %v6608_v34, %v298_v45  ;;  %v4868_v34 = vld [vmem:[%s9302_s12 + $0x1] ss:$0 sm:$0xff] }
 0x114   :  { %6135 = vmatpush3.bf16.msra.mxu0 %v6132_v49  ;;  %v367_v50 = vmul.f32 %v7358_v60, %v347_v46 }
 0x115   :  { %v366_v51 = vmul.f32 %v7358_v60, %v346_v47  ;;  %v391_v60 = vld [vmem:[%s9291_s1 + $0x18] sm:$0xff] }
 0x116   :  { %v387_v52 = vadd.f32 %v7369_v10, %v367_v50  ;;  %v4869_v50 = vld [vmem:[%s9303_s13 + $0x1] ss:$0 sm:$0xff] }
 0x117   :  { %v386_v53 = vadd.f32 %v7369_v10, %v366_v51 }
 0x119   :  { %v6136_v54 = vpack.c.bf16 %v387_v52, %v386_v53 }
 0x11b   :  { %6137 = vmatprep.subr.bf16.mxu0 %v6136_v54 }
 0x11c   :  { %6139 = vmatpush3.bf16.msra.mxu0 %v6136_v54 }
 0x11f   :  { %5503 = vmatmul.mubr.f32.vlgmr.msra.gmra.mrb[0].mxu0 %v389_v56 }
 0x120   :  { %5505 = vmatprep.mubr.f32.mxu0 %v390_v57 }
 0x123   :  { %5506 = vmatmul.mubr.f32.gmra.mrb[2].mxu0 %v391_v60 }
 0x1f2   :  { %v7465_v55 = vpop.f32.mrb[0].mxu0 }
 0x1f3   :  { %v7467_v10 = vpop.f32.mrb[1].mxu0  ;;  %v482_v58 = vsel %vm106_vm0, %v7465_v55, 0.0  ;;  %v496_v32 = vmul.f32 %v7465_v55, %v7465_v55 }
 0x1f4   :  { %483 = vadd.xlane.f32.xlu1 %v482_v58  ;;  %v479_v37 = vsel %vm106_vm0, %v7467_v10, 0.0  ;;  %v495_v59 = vmul.f32 %v7467_v10, %v7467_v10 }
 0x1f5   :  { %480 = vadd.xlane.f32.xlu0 %v479_v37  ;;  %v502_v38 = vsel %vm106_vm0, %v496_v32, 0.0 }
 0x1f6   :  { %v7477_v33 = vpop.f32.mrb[2].mxu0  ;;  %v499_v16 = vsel %vm106_vm0, %v495_v59, 0.0 }
 0x1f7   :  { %v7480_v1 = vpop.f32.mrb[3].mxu0  ;;  %v488_v43 = vsel %vm106_vm0, %v7477_v33, 0.0  ;;  %v498_v17 = vmul.f32 %v7477_v33, %v7477_v33 }
 0x1f8   :  { %503 = vadd.xlane.f32.xlu1 %v502_v38  ;;  %v485_v61 = vsel %vm106_vm0, %v7480_v1, 0.0  ;;  %v497_v44 = vmul.f32 %v7480_v1, %v7480_v1 }
 0x1f9   :  { %500 = vadd.xlane.f32.xlu0 %v499_v16  ;;  %v508_v62 = vsel %vm106_vm0, %v498_v17, 0.0 }
 0x1fa   :  { %v505_v63 = vsel %vm106_vm0, %v497_v44, 0.0 }
 0x1fc   :  { %489 = vadd.xlane.f32.xlu1 %v488_v43 }
 0x1fd   :  { %486 = vadd.xlane.f32.xlu0 %v485_v61 }
 0x200   :  { %509 = vadd.xlane.f32.xlu1 %v508_v62 }
 0x201   :  { %506 = vadd.xlane.f32.xlu0 %v505_v63 }
 0x281   :  { %v484_v15 = vpop.xlane.xlu1 %483 }
 0x282   :  { %v492_v18 = vmul.f32 0.03125, %v484_v15  ;;  %v481_v19 = vpop.xlane.xlu0 %480 }
 0x283   :  { %v491_v20 = vmul.f32 0.03125, %v481_v19 }
 0x284   :  { %v516_v23 = vmul.f32 %v492_v18, %v492_v18  ;;  %v524_v31 = vsub.f32 %v7465_v55, %v492_v18  ;;  %v659_v18 = vld [vmem:[%s9292_s2 + $0x18] sm:$0xff] }
 0x285   :  { %v504_v21 = vpop.xlane.xlu1 %503  ;;  %v515_v14 = vmul.f32 %v491_v20, %v491_v20  ;;  %v523_v49 = vsub.f32 %v7467_v10, %v491_v20  ;;  %v658_v20 = vld [vmem:[%s9292_s2 + $0x10] sm:$0xff] }
 0x286   :  { %v512_v26 = vmul.f32 0.03125, %v504_v21  ;;  %v501_v0 = vpop.xlane.xlu0 %500 }
 0x287   :  { %v511_v9 = vmul.f32 0.03125, %v501_v0 }
 0x288   :  { %v520_v40 = vsub.f32 %v512_v26, %v516_v23 }
 0x289   :  { %v519_v41 = vsub.f32 %v511_v9, %v515_v14  ;;  %v490_v7 = vpop.xlane.xlu1 %489 }
 0x28a   :  { %v528_v8 = vadd.f32 1e-05, %v520_v40  ;;  %v494_v24 = vmul.f32 0.03125, %v490_v7  ;;  %v487_v5 = vpop.xlane.xlu0 %486 }
 0x28b   :  { %v527_v22 = vadd.f32 1e-05, %v519_v41  ;;  %v493_v25 = vmul.f32 0.03125, %v487_v5 }
 0x28c   :  { %6609 = vrsqrt.f32 %v528_v8  ;;  %v518_v27 = vmul.f32 %v494_v24, %v494_v24  ;;  %v526_v57 = vsub.f32 %v7477_v33, %v494_v24 }
 0x28d   :  { %6611 = vrsqrt.f32 %v527_v22  ;;  %v510_v6 = vpop.xlane.xlu1 %509  ;;  %v517_v30 = vmul.f32 %v493_v25, %v493_v25  ;;  %v525_v55 = vsub.f32 %v7480_v1, %v493_v25 }
 0x28e   :  { %v514_v28 = vmul.f32 0.03125, %v510_v6  ;;  %v507_v29 = vpop.xlane.xlu0 %506 }
 0x28f   :  { %v513_v35 = vmul.f32 0.03125, %v507_v29 }
 0x290   :  { %v522_v36 = vsub.f32 %v514_v28, %v518_v27 }
 0x291   :  { %v521_v39 = vsub.f32 %v513_v35, %v517_v30 }
 0x292   :  { %v530_v42 = vadd.f32 1e-05, %v522_v36 }
 0x293   :  { %v529_v48 = vadd.f32 1e-05, %v521_v39 }
 0x294   :  { %6613 = vrsqrt.f32 %v530_v42 }
 0x295   :  { %6615 = vrsqrt.f32 %v529_v48 }
 0x296   :  { %v6610_v45 = vpop.eup %6609 }
 0x297   :  { %v6612_v46 = vpop.eup %6611  ;;  %v536_v47 = vmul.f32 %v6610_v45, %v524_v31 }
 0x298   :  { %v535_v51 = vmul.f32 %v6612_v46, %v523_v49 }
 0x299   :  { %v544_v52 = vmul.f32 %v4868_v34, %v536_v47 }
 0x29a   :  { %v543_v53 = vmul.f32 %v4868_v34, %v535_v51 }
 0x29b   :  { %v552_v54 = vadd.f32 %v4869_v50, %v544_v52 }
 0x29c   :  { %v551_v56 = vadd.f32 %v4869_v50, %v543_v53 }
 0x29e   :  { %v6614_v60 = vpop.eup %6613  ;;  %5516 = vmatprep.mubr.msk.f32.mxu1 %vm106_vm0, %v551_v56  ;;  %v6160_v10 = vpack.c.bf16 %v552_v54, %v551_v56 }
 0x29f   :  { %v6616_v58 = vpop.eup %6615  ;;  %5517 = vmatmul.mubr.msk.f32.vlgmr.msra.gmra.mrb[0].mxu1 %vm106_vm0, %v552_v54  ;;  %v538_v32 = vmul.f32 %v6614_v60, %v526_v57 }
 0x2a0   :  { %v537_v37 = vmul.f32 %v6616_v58, %v525_v55 }
 0x2a1   :  { %v546_v59 = vmul.f32 %v4868_v34, %v538_v32 }
 0x2a2   :  { %v545_v38 = vmul.f32 %v4868_v34, %v537_v37 }
 0x2a3   :  { %v554_v16 = vadd.f32 %v4869_v50, %v546_v59 }
 0x2a4   :  { %v553_v43 = vadd.f32 %v4869_v50, %v545_v38 }
 0x2a6   :  { %5519 = vmatprep.mubr.msk.f32.mxu1 %vm106_vm0, %v553_v43  ;;  %v6164_v61 = vpack.c.bf16 %v554_v16, %v553_v43 }
 0x2a7   :  { %5520 = vmatmul.mubr.msk.f32.gmra.mrb[2].mxu1 %vm106_vm0, %v554_v16 }
 0x372   :  { %v5518_v33 = vpop.f32.mrb[0].mxu1 }
 0x373   :  { %v637_v17 = vpop.f32.mrb[1].mxu1 }
 0x374   :  { %v6148_v44 = vpack.c.bf16 %v5518_v33, %v637_v17  ;;  %5530 = vmatprep.mubr.msk.f32.mxu1 %vm106_vm0, %v637_v17 }
 0x376   :  { %6150 = vmatprep.subr.msk.bf16.mxu1 %vm7521_vm1, %v6148_v44 }
 0x377   :  { %6153 = vmatpush3.bf16.xpose.msk.msra.mxu1 %vm7521_vm1, %v6148_v44 }
 0x37a   :  { %v5521_v62 = vpop.f32.mrb[2].mxu1 }
 0x37b   :  { %v647_v63 = vpop.f32.mrb[3].mxu1 }
 0x37c   :  { %v6154_v3 = vpack.c.bf16 %v5521_v62, %v647_v63 }
 0x37e   :  { %6156 = vmatprep.subr.msk.bf16.mxu1 %vm7521_vm1, %v6154_v3 }
 0x37f   :  { %6159 = vmatpush3.bf16.xpose.msk.msra.mxu1 %vm7521_vm1, %v6154_v3 }
 0x380   :  { %6161 = vmatprep.subr.bf16.mxu1 %v6160_v10 }
 0x386   :  { %5531 = vmatmul.mubr.msk.f32.vlgmr.msra.gmra.mrb[4].mxu1 %vm106_vm0, %v5518_v33 }
 0x387   :  { %5533 = vmatprep.mubr.msk.f32.mxu1 %vm106_vm0, %v647_v63  ;;  %6163 = vmatpush3.bf16.msra.mxu1 %v6160_v10 }
 0x388   :  { %6165 = vmatprep.subr.bf16.mxu1 %v6164_v61 }
 0x38a   :  { %5534 = vmatmul.mubr.msk.f32.gmra.mrb[6].mxu1 %vm106_vm0, %v5521_v62 }
 0x38b   :  { %6167 = vmatpush3.bf16.msra.mxu1 %v6164_v61 }
 0x459   :  { %v5532_v11 = vpop.f32.mrb[4].mxu1 }
 0x45a   :  { %v744_v12 = vadd.f32 %v5532_v11, %v657_v4  ;;  %v738_v13 = vpop.f32.mrb[5].mxu1  ;;  %v977_v11 = vld [vmem:[#allocation2 + $0x8] sm:$0xff] }
 0x45b   :  { %v739_v15 = vadd.f32 %v738_v13, %v656_v2  ;;  %v976_v2 = vld [vmem:[#allocation2] sm:$0xff]  ;;  %v978_v13 = vld [vmem:[#allocation2 + $0x10] sm:$0xff] }
 0x45c   :  { %v760_v19 = vsel %vm106_vm0, %v744_v12, -inf }
 0x45d   :  { %761 = vmax.xlane.f32.xlu1 %v760_v19  ;;  %v5535_v21 = vpop.f32.mrb[6].mxu1  ;;  %v757_v23 = vsel %vm106_vm0, %v739_v15, -inf  ;;  %v6921_v19 = vld [vmem:[%s9290_s0] sm:$0xff] }
 0x45e   :  { %v754_v26 = vadd.f32 %v5535_v21, %v659_v18  ;;  %v748_v0 = vpop.f32.mrb[7].mxu1  ;;  %758 = vmax.xlane.f32.xlu0 %v757_v23  ;;  %v7603_v23 = vmul.f32 0.17677669, %v6921_v19 }
 0x45f   :  { %v749_v14 = vadd.f32 %v748_v0, %v658_v20  ;;  %v7595_v20 = vld [vmem:[%s9290_s0 + $0x8] sm:$0xff] }
 0x460   :  { %v766_v9 = vsel %vm106_vm0, %v754_v26, -inf  ;;  %v7598_v21 = vpack.c.bf16 %v7595_v20, %v6921_v19 }
 0x461   :  { %767 = vmax.xlane.f32.xlu1 %v766_v9  ;;  %v763_v40 = vsel %vm106_vm0, %v749_v14, -inf }
 0x462   :  { %764 = vmax.xlane.f32.xlu0 %v763_v40 }
 0x4ea   :  { %v762_v41 = vpop.xlane.xlu1 %761 }
 0x4eb   :  { %v770_v7 = vsub.f32 %v744_v12, %v762_v41  ;;  %v759_v8 = vpop.xlane.xlu0 %758  ;;  %v6168_v12 = vpack.c.bf16 %v977_v11, %v976_v2 }
 0x4ec   :  { %v769_v24 = vsub.f32 %v739_v15, %v759_v8  ;;  %v979_v15 = vld [vmem:[#allocation2 + $0x18] sm:$0xff] }
 0x4ed   :  { %v775_v5 = vmul.f32 1.442695, %v770_v7  ;;  %6169 = vmatprep.subr.bf16.mxu0 %v6168_v12  ;;  %v6172_v18 = vpack.c.bf16 %v979_v15, %v978_v13  ;;  %v6925_v15 = vld [vmem:[%s9290_s0 + $0x28] sm:$0xff] }
 0x4ee   :  { %v773_v22 = vmul.f32 1.442695, %v769_v24  ;;  %v768_v25 = vpop.xlane.xlu1 %767  ;;  %6171 = vmatpush3.bf16.msra.mxu0 %v6168_v12 }
 0x4ef   :  { %6617 = vpow2.f32 %v775_v5  ;;  %v772_v6 = vsub.f32 %v754_v26, %v768_v25  ;;  %v765_v27 = vpop.xlane.xlu0 %764  ;;  %6173 = vmatprep.subr.bf16.mxu0 %v6172_v18 }
 0x4f0   :  { %6619 = vpow2.f32 %v773_v22  ;;  %v771_v28 = vsub.f32 %v749_v14, %v765_v27 }
 0x4f1   :  { %v779_v29 = vmul.f32 1.442695, %v772_v6 }
 0x4f2   :  { %v777_v30 = vmul.f32 1.442695, %v771_v28  ;;  %6175 = vmatpush3.bf16.msra.mxu0 %v6172_v18  ;;  %v6926_v18 = vld [vmem:[%s9290_s0 + $0x20] sm:$0xff] }
 0x4f3   :  { %6621 = vpow2.f32 %v779_v29  ;;  %6190 = vmatprep.subr.msk.bf16.mxu0 %vm7521_vm1, %v7598_v21  ;;  %v7645_v19 = vpack.c.bf16 %v6925_v15, %v6926_v18 }
 0x4f4   :  { %6623 = vpow2.f32 %v777_v30 }
 0x4f9   :  { %v6618_v35 = vpop.eup %6617 }
 0x4fa   :  { %v6620_v36 = vpop.eup %6619  ;;  %v784_v39 = vsel %vm106_vm0, %v6618_v35, 0.0 }
 0x4fb   :  { %785 = vadd.xlane.f32.xlu1 %v784_v39  ;;  %5544 = vmatprep.mubr.msk.f32.mxu1 %vm106_vm0, %v6620_v36  ;;  %v781_v42 = vsel %vm106_vm0, %v6620_v36, 0.0 }
 0x4fc   :  { %5545 = vmatmul.mubr.msk.f32.vlgmr.msra.gmra.mrb[8].mxu1 %vm106_vm0, %v6618_v35  ;;  %782 = vadd.xlane.f32.xlu0 %v781_v42 }
 0x4fd   :  { %v6622_v48 = vpop.eup %6621 }
 0x4fe   :  { %v6624_v31 = vpop.eup %6623  ;;  %v790_v45 = vsel %vm106_vm0, %v6622_v48, 0.0 }
 0x4ff   :  { %791 = vadd.xlane.f32.xlu1 %v790_v45  ;;  %5547 = vmatprep.mubr.msk.f32.mxu1 %vm106_vm0, %v6624_v31  ;;  %v787_v49 = vsel %vm106_vm0, %v6624_v31, 0.0 }
 0x500   :  { %5548 = vmatmul.mubr.msk.f32.gmra.mrb[10].mxu1 %vm106_vm0, %v6622_v48  ;;  %788 = vadd.xlane.f32.xlu0 %v787_v49 }
 0x501   :  { %5572 = vmatprep.mubr.msk.f32.mxu1 %vm106_vm0, %v7603_v23 }
 0x588   :  { %v786_v34 = vpop.xlane.xlu1 %785 }
 0x589   :  { %v783_v46 = vpop.xlane.xlu0 %782  ;;  %6625 = vrcp.f32 %v786_v34 }
 0x58a   :  { %6627 = vrcp.f32 %v783_v46 }
 0x58c   :  { %v792_v47 = vpop.xlane.xlu1 %791 }
 0x58d   :  { %v789_v50 = vpop.xlane.xlu0 %788  ;;  %6629 = vrcp.f32 %v792_v47 }
 0x58e   :  { %6631 = vrcp.f32 %v789_v50 }
 0x593   :  { %v6626_v51 = vpop.eup %6625 }
 0x594   :  { %v6628_v53 = vpop.eup %6627 }
 0x597   :  { %v6630_v59 = vpop.eup %6629 }
 0x598   :  { %v6632_v38 = vpop.eup %6631 }
 0x5cf   :  { %v5546_v52 = vpop.f32.mrb[8].mxu1 }
 0x5d0   :  { %v7561_v54 = vmul.f32 %v6626_v51, %v5546_v52  ;;  %v875_v56 = vpop.f32.mrb[9].mxu1 }
 0x5d1   :  { %v7563_v57 = vmul.f32 %v6628_v53, %v875_v56  ;;  %v4886_v53 = vld [vmem:[%s9302_s12 + $0x2] ss:$0 sm:$0xff] }
 0x5d2   :  { %v903_v60 = vsel %vm106_vm0, %v7561_v54, 0.0  ;;  %v917_v55 = vmul.f32 %v7561_v54, %v7561_v54 }
 0x5d3   :  { %904 = vadd.xlane.f32.xlu1 %v903_v60  ;;  %v5549_v10 = vpop.f32.mrb[10].mxu1  ;;  %v900_v58 = vsel %vm106_vm0, %v7563_v57, 0.0  ;;  %v916_v32 = vmul.f32 %v7563_v57, %v7563_v57 }
 0x5d4   :  { %v885_v37 = vpop.f32.mrb[11].mxu1  ;;  %901 = vadd.xlane.f32.xlu0 %v900_v58  ;;  %v7573_v16 = vmul.f32 %v6630_v59, %v5549_v10  ;;  %v923_v43 = vsel %vm106_vm0, %v917_v55, 0.0  ;;  %v4887_v10 = vld [vmem:[%s9303_s13 + $0x2] ss:$0 sm:$0xff] }
 0x5d5   :  { %v7576_v61 = vmul.f32 %v6632_v38, %v885_v37  ;;  %v920_v33 = vsel %vm106_vm0, %v916_v32, 0.0 }
 0x5d6   :  { %v909_v17 = vsel %vm106_vm0, %v7573_v16, 0.0  ;;  %v919_v44 = vmul.f32 %v7573_v16, %v7573_v16 }
 0x5d7   :  { %924 = vadd.xlane.f32.xlu1 %v923_v43  ;;  %v906_v62 = vsel %vm106_vm0, %v7576_v61, 0.0  ;;  %v918_v63 = vmul.f32 %v7576_v61, %v7576_v61  ;;  %v7619_v43 = vld [vmem:[%s9290_s0 + $0x18] sm:$0xff] }
 0x5d8   :  { %921 = vadd.xlane.f32.xlu0 %v920_v33  ;;  %v929_v3 = vsel %vm106_vm0, %v919_v44, 0.0  ;;  %v7624_v33 = vld [vmem:[%s9290_s0 + $0x10] sm:$0xff] }
 0x5d9   :  { %v926_v4 = vsel %vm106_vm0, %v918_v63, 0.0 }
 0x5db   :  { %910 = vadd.xlane.f32.xlu1 %v909_v17  ;;  %v7628_v17 = vpack.c.bf16 %v7619_v43, %v7624_v33 }
 0x5dc   :  { %907 = vadd.xlane.f32.xlu0 %v906_v62 }
 0x5df   :  { %930 = vadd.xlane.f32.xlu1 %v929_v3 }
 0x5e0   :  { %927 = vadd.xlane.f32.xlu0 %v926_v4 }
 0x660   :  { %v905_v26 = vpop.xlane.xlu1 %904 }
 0x661   :  { %v913_v0 = vmul.f32 0.03125, %v905_v26  ;;  %v902_v14 = vpop.xlane.xlu0 %901  ;;  %v6927_v26 = vld [vmem:[%s9290_s0 + $0x38] sm:$0xff] }
 0x662   :  { %v912_v9 = vmul.f32 0.03125, %v902_v14 }
 0x663   :  { %v937_v41 = vmul.f32 %v913_v0, %v913_v0  ;;  %v945_v50 = vsub.f32 %v7561_v54, %v913_v0  ;;  %v6928_v0 = vld [vmem:[%s9290_s0 + $0x30] sm:$0xff] }
 0x664   :  { %v925_v40 = vpop.xlane.xlu1 %924  ;;  %v936_v24 = vmul.f32 %v912_v9, %v912_v9  ;;  %v944_v52 = vsub.f32 %v7563_v57, %v912_v9  ;;  %v7663_v14 = vpack.c.bf16 %v6927_v26, %v6928_v0  ;;  %v6930_v9 = vld [vmem:[%s9290_s0 + $0x40] sm:$0xff] }
 0x665   :  { %v933_v7 = vmul.f32 0.03125, %v925_v40  ;;  %v922_v8 = vpop.xlane.xlu0 %921 }
 0x666   :  { %v932_v5 = vmul.f32 0.03125, %v922_v8 }
 0x667   :  { %v941_v22 = vsub.f32 %v933_v7, %v937_v41  ;;  %v6931_v41 = vld [vmem:[%s9290_s0 + $0x58] sm:$0xff]  ;;  %v6932_v7 = vld [vmem:[%s9290_s0 + $0x50] sm:$0xff] }
 0x668   :  { %v940_v25 = vsub.f32 %v932_v5, %v936_v24  ;;  %v911_v6 = vpop.xlane.xlu1 %910  ;;  %v7691_v8 = vpack.c.bf16 %v6931_v41, %v6932_v7  ;;  %v6933_v24 = vld [vmem:[%s9290_s0 + $0x68] sm:$0xff]  ;;  %v6934_v5 = vld [vmem:[%s9290_s0 + $0x60] sm:$0xff] }
 0x669   :  { %v949_v27 = vadd.f32 1e-05, %v941_v22  ;;  %v915_v28 = vmul.f32 0.03125, %v911_v6  ;;  %v908_v29 = vpop.xlane.xlu0 %907  ;;  %v7705_v22 = vpack.c.bf16 %v6933_v24, %v6934_v5  ;;  %v6936_v6 = vld [vmem:[%s9290_s0 + $0x70] sm:$0xff] }
 0x66a   :  { %v948_v30 = vadd.f32 1e-05, %v940_v25  ;;  %v914_v35 = vmul.f32 0.03125, %v908_v29  ;;  %v6935_v25 = vld [vmem:[%s9290_s0 + $0x78] sm:$0xff]  ;;  %v2464_v29 = vld [vmem:[%s9299_s9 + $0x8] sm:$0xff] }
 0x66b   :  { %6633 = vrsqrt.f32 %v949_v27  ;;  %v939_v39 = vmul.f32 %v915_v28, %v915_v28  ;;  %v947_v59 = vsub.f32 %v7573_v16, %v915_v28  ;;  %v7719_v27 = vpack.c.bf16 %v6935_v25, %v6936_v6  ;;  %v2463_v28 = vld [vmem:[%s9299_s9] sm:$0xff] }
 0x66c   :  { %6635 = vrsqrt.f32 %v948_v30  ;;  %v931_v36 = vpop.xlane.xlu1 %930  ;;  %v938_v31 = vmul.f32 %v914_v35, %v914_v35  ;;  %v946_v62 = vsub.f32 %v7576_v61, %v914_v35  ;;  %v6276_v30 = vpack.c.bf16 %v2464_v29, %v2463_v28  ;;  %v2465_v35 = vld [vmem:[%s9299_s9 + $0x10] sm:$0xff] }
 0x66d   :  { %v935_v42 = vmul.f32 0.03125, %v931_v36  ;;  %v928_v48 = vpop.xlane.xlu0 %927  ;;  %v2466_v36 = vld [vmem:[%s9299_s9 + $0x18] sm:$0xff] }
 0x66e   :  { %v934_v45 = vmul.f32 0.03125, %v928_v48  ;;  %v7746_v48 = vpack.c.bf16 %v7561_v54, %v7563_v57 }
 0x66f   :  { %v943_v49 = vsub.f32 %v935_v42, %v939_v39  ;;  %v1110_v39 = vmul.f32 0.17677669, %v7595_v20  ;;  %v6280_v42 = vpack.c.bf16 %v2466_v36, %v2465_v35  ;;  %v1113_v20 = vmul.f32 0.17677669, %v6926_v18  ;;  %v1103_v35 = vld [vmem:[%s9294_s4 + $0x50] sm:$0xff] }
 0x670   :  { %v942_v34 = vsub.f32 %v934_v45, %v938_v31  ;;  %v1111_v31 = vmul.f32 0.17677669, %v7624_v33  ;;  %v1112_v45 = vmul.f32 0.17677669, %v7619_v43 }
 0x671   :  { %v951_v46 = vadd.f32 1e-05, %v943_v49  ;;  %v1114_v49 = vmul.f32 0.17677669, %v6925_v15 }
 0x672   :  { %v950_v47 = vadd.f32 1e-05, %v942_v34  ;;  %v1115_v34 = vmul.f32 0.17677669, %v6928_v0 }
 0x673   :  { %6637 = vrsqrt.f32 %v951_v46  ;;  %v1116_v46 = vmul.f32 0.17677669, %v6927_v26  ;;  %v1097_v26 = vld [vmem:[%s9294_s4 + $0x20] sm:$0xff] }
 0x674   :  { %6639 = vrsqrt.f32 %v950_v47  ;;  %v1117_v47 = vmul.f32 0.17677669, %v6930_v9 }
 0x675   :  { %v6634_v51 = vpop.eup %6633 }
 0x676   :  { %v6636_v56 = vpop.eup %6635  ;;  %v957_v60 = vmul.f32 %v6634_v51, %v945_v50  ;;  %v1119_v51 = vmul.f32 0.17677669, %v6932_v7 }
 0x677   :  { %v956_v55 = vmul.f32 %v6636_v56, %v944_v52  ;;  %v1120_v52 = vmul.f32 0.17677669, %v6931_v41  ;;  %v1122_v56 = vmul.f32 0.17677669, %v6933_v24  ;;  %v1099_v41 = vld [vmem:[%s9294_s4 + $0x30] sm:$0xff] }
 0x678   :  { %v965_v58 = vmul.f32 %v4886_v53, %v957_v60  ;;  %v1123_v60 = vmul.f32 0.17677669, %v6936_v6 }
 0x679   :  { %v964_v32 = vmul.f32 %v4886_v53, %v956_v55  ;;  %v1124_v55 = vmul.f32 0.17677669, %v6935_v25  ;;  %v1101_v25 = vld [vmem:[%s9294_s4 + $0x40] sm:$0xff] }
 0x67a   :  { %v973_v38 = vadd.f32 %v4887_v10, %v965_v58 }
 0x67b   :  { %v972_v37 = vadd.f32 %v4887_v10, %v964_v32 }
 0x67d   :  { %v6638_v44 = vpop.eup %6637  ;;  %5558 = vmatprep.mubr.msk.f32.mxu0 %vm106_vm0, %v972_v37 }
 0x67e   :  { %v6640_v63 = vpop.eup %6639  ;;  %5559 = vmatmul.mubr.msk.f32.vlgmr.msra.gmra.mrb[4].mxu0 %vm106_vm0, %v973_v38  ;;  %v959_v3 = vmul.f32 %v6638_v44, %v947_v59  ;;  %v1093_v44 = vld [vmem:[%s9294_s4] sm:$0xff] }
 0x67f   :  { %6193 = vmatpush3.bf16.xpose.msk.msra.mxu0 %vm7521_vm1, %v7598_v21  ;;  %v958_v4 = vmul.f32 %v6640_v63, %v946_v62  ;;  %v1096_v63 = vld [vmem:[%s9294_s4 + $0x18] sm:$0xff] }
 0x680   :  { %6196 = vmatprep.subr.msk.bf16.mxu0 %vm7521_vm1, %v7628_v17  ;;  %v967_v2 = vmul.f32 %v4886_v53, %v959_v3 }
 0x681   :  { %v966_v11 = vmul.f32 %v4886_v53, %v958_v4  ;;  %v1121_v53 = vmul.f32 0.17677669, %v6934_v5 }
 0x682   :  { %v975_v13 = vadd.f32 %v4887_v10, %v967_v2 }
 0x683   :  { %v974_v12 = vadd.f32 %v4887_v10, %v966_v11  ;;  %v1095_v11 = vld [vmem:[%s9294_s4 + $0x10] sm:$0xff] }
 0x685   :  { %5561 = vmatprep.mubr.msk.f32.mxu0 %vm106_vm0, %v974_v12 }
 0x686   :  { %5562 = vmatmul.mubr.msk.f32.gmra.mrb[6].mxu0 %vm106_vm0, %v975_v13  ;;  %v1098_v13 = vld [vmem:[%s9294_s4 + $0x28] sm:$0xff] }
 0x687   :  { %6199 = vmatpush3.bf16.xpose.msk.msra.mxu0 %vm7521_vm1, %v7628_v17  ;;  %5628 = vmatprep.mubr.msk.f32.mxu0 %vm106_vm0, %v7603_v23  ;;  %v6929_v23 = vld [vmem:[%s9290_s0 + $0x48] sm:$0xff] }
 0x688   :  { %6202 = vmatprep.subr.msk.bf16.mxu0 %vm7521_vm1, %v7645_v19  ;;  %v7677_v40 = vpack.c.bf16 %v6929_v23, %v6930_v9  ;;  %v1118_v50 = vmul.f32 0.17677669, %v6929_v23 }
 0x68f   :  { %6205 = vmatpush3.bf16.xpose.msk.msra.mxu0 %vm7521_vm1, %v7645_v19 }
 0x690   :  { %6208 = vmatprep.subr.msk.bf16.mxu0 %vm7521_vm1, %v7663_v14 }
 0x697   :  { %6211 = vmatpush3.bf16.xpose.msk.msra.mxu0 %vm7521_vm1, %v7663_v14 }
 0x698   :  { %6214 = vmatprep.subr.msk.bf16.mxu0 %vm7521_vm1, %v7677_v40 }
 0x69f   :  { %6217 = vmatpush3.bf16.xpose.msk.msra.mxu0 %vm7521_vm1, %v7677_v40 }
 0x6a0   :  { %6220 = vmatprep.subr.msk.bf16.mxu0 %vm7521_vm1, %v7691_v8 }
 0x6a7   :  { %6223 = vmatpush3.bf16.xpose.msk.msra.mxu0 %vm7521_vm1, %v7691_v8 }
 0x6a8   :  { %6226 = vmatprep.subr.msk.bf16.mxu0 %vm7521_vm1, %v7705_v22 }
 0x6af   :  { %6229 = vmatpush3.bf16.xpose.msk.msra.mxu0 %vm7521_vm1, %v7705_v22 }
 0x6b0   :  { %6232 = vmatprep.subr.msk.bf16.mxu0 %vm7521_vm1, %v7719_v27 }
 0x6b7   :  { %6235 = vmatpush3.bf16.xpose.msk.msra.mxu0 %vm7521_vm1, %v7719_v27 }
 0x6b8   :  { %6277 = vmatprep.subr.bf16.mxu0 %v6276_v30 }
 0x6be   :  { %5629 = vmatmul.mubr.msk.f32.vlgmr.msra.gmra.mrb[8].mxu0 %vm106_vm0, %v1110_v39 }
 0x6bf   :  { %6279 = vmatpush3.bf16.msra.mxu0 %v6276_v30  ;;  %5631 = vmatprep.mubr.msk.f32.mxu0 %vm106_vm0, %v1111_v31 }
 0x6c0   :  { %6281 = vmatprep.subr.bf16.mxu0 %v6280_v42 }
 0x6c2   :  { %5632 = vmatmul.mubr.msk.f32.gmra.mrb[10].mxu0 %vm106_vm0, %v1112_v45 }
 0x6c3   :  { %6283 = vmatpush3.bf16.msra.mxu0 %v6280_v42  ;;  %5634 = vmatprep.mubr.msk.f32.mxu0 %vm106_vm0, %v1113_v20  ;;  %v1106_v42 = vld [vmem:[%s9294_s4 + $0x68] sm:$0xff] }
 0x6c4   :  { %6334 = vmatprep.subr.msk.bf16.mxu0 %vm7521_vm1, %v7746_v48 }
 0x6c6   :  { %5635 = vmatmul.mubr.msk.f32.gmra.mrb[12].mxu0 %vm106_vm0, %v1114_v49 }
 0x6c7   :  { %5637 = vmatprep.mubr.msk.f32.mxu0 %vm106_vm0, %v1115_v34 }
 0x6ca   :  { %5638 = vmatmul.mubr.msk.f32.gmra.mrb[14].mxu0 %vm106_vm0, %v1116_v46 }
 0x6cb   :  { %5640 = vmatprep.mubr.msk.f32.mxu0 %vm106_vm0, %v1117_v47 }
 0x6ce   :  { %5641 = vmatmul.mubr.msk.f32.gmra.mrb[16].mxu0 %vm106_vm0, %v1118_v50 }
 0x6cf   :  { %5643 = vmatprep.mubr.msk.f32.mxu0 %vm106_vm0, %v1119_v51 }
 0x6d2   :  { %5644 = vmatmul.mubr.msk.f32.gmra.mrb[18].mxu0 %vm106_vm0, %v1120_v52 }
 0x6d3   :  { %5646 = vmatprep.mubr.msk.f32.mxu0 %vm106_vm0, %v1121_v53 }
 0x6d6   :  { %5647 = vmatmul.mubr.msk.f32.gmra.mrb[20].mxu0 %vm106_vm0, %v1122_v56 }
 0x6d7   :  { %5649 = vmatprep.mubr.msk.f32.mxu0 %vm106_vm0, %v1123_v60 }
 0x6da   :  { %5650 = vmatmul.mubr.msk.f32.gmra.mrb[22].mxu0 %vm106_vm0, %v1124_v55 }
 0x751   :  { %v5560_v10 = vpop.f32.mrb[4].mxu0 }
 0x752   :  { %v1058_v58 = vpop.f32.mrb[5].mxu0 }
 0x753   :  { %v7767_v32 = vpack.c.bf16 %v5560_v10, %v1058_v58  ;;  %v1080_v58 = vld [vmem:[%s9293_s3 + $0x18] sm:$0xff] }
 0x755   :  { %6178 = vmatprep.subr.msk.bf16.mxu1 %vm7521_vm1, %v7767_v32 }
 0x756   :  { %6181 = vmatpush3.bf16.xpose.msk.msra.mxu1 %vm7521_vm1, %v7767_v32 }
 0x759   :  { %v5563_v37 = vpop.f32.mrb[6].mxu0 }
 0x75a   :  { %v1068_v59 = vpop.f32.mrb[7].mxu0 }
 0x75b   :  { %v7775_v38 = vpack.c.bf16 %v5563_v37, %v1068_v59 }
 0x75d   :  { %6184 = vmatprep.subr.msk.bf16.mxu1 %vm7521_vm1, %v7775_v38 }
 0x75e   :  { %6187 = vmatpush3.bf16.xpose.msk.msra.mxu1 %vm7521_vm1, %v7775_v38 }
 0x75f   :  { %6237 = vmatprep.subr.bf16.mxu1 %v7598_v21 }
 0x765   :  { %5573 = vmatmul.mubr.msk.f32.vlgmr.msra.gmra.mrb[12].mxu1 %vm106_vm0, %v1110_v39 }
 0x766   :  { %6239 = vmatpush3.bf16.msra.mxu1 %v7598_v21  ;;  %5575 = vmatprep.mubr.msk.f32.mxu1 %vm106_vm0, %v1111_v31  ;;  %v1094_v21 = vld [vmem:[%s9294_s4 + $0x8] sm:$0xff] }
 0x767   :  { %6241 = vmatprep.subr.bf16.mxu1 %v7628_v17 }
 0x769   :  { %5576 = vmatmul.mubr.msk.f32.gmra.mrb[14].mxu1 %vm106_vm0, %v1112_v45 }
 0x76a   :  { %6243 = vmatpush3.bf16.msra.mxu1 %v7628_v17  ;;  %5578 = vmatprep.mubr.msk.f32.mxu1 %vm106_vm0, %v1113_v20  ;;  %v1105_v20 = vld [vmem:[%s9294_s4 + $0x60] sm:$0xff] }
 0x76b   :  { %6245 = vmatprep.subr.bf16.mxu1 %v7645_v19 }
 0x76d   :  { %5579 = vmatmul.mubr.msk.f32.gmra.mrb[16].mxu1 %vm106_vm0, %v1114_v49 }
 0x76e   :  { %6247 = vmatpush3.bf16.msra.mxu1 %v7645_v19  ;;  %5581 = vmatprep.mubr.msk.f32.mxu1 %vm106_vm0, %v1115_v34 }
 0x76f   :  { %6249 = vmatprep.subr.bf16.mxu1 %v7663_v14 }
 0x771   :  { %5582 = vmatmul.mubr.msk.f32.gmra.mrb[18].mxu1 %vm106_vm0, %v1116_v46 }
 0x772   :  { %6251 = vmatpush3.bf16.msra.mxu1 %v7663_v14  ;;  %5584 = vmatprep.mubr.msk.f32.mxu1 %vm106_vm0, %v1117_v47  ;;  %v1100_v14 = vld [vmem:[%s9294_s4 + $0x38] sm:$0xff]  ;;  %v1107_v47 = vld [vmem:[%s9294_s4 + $0x70] sm:$0xff] }
 0x773   :  { %6253 = vmatprep.subr.bf16.mxu1 %v7677_v40 }
 0x775   :  { %5585 = vmatmul.mubr.msk.f32.gmra.mrb[20].mxu1 %vm106_vm0, %v1118_v50 }
 0x776   :  { %6255 = vmatpush3.bf16.msra.mxu1 %v7677_v40  ;;  %5587 = vmatprep.mubr.msk.f32.mxu1 %vm106_vm0, %v1119_v51  ;;  %v1108_v51 = vld [vmem:[%s9294_s4 + $0x78] sm:$0xff] }
 0x777   :  { %6257 = vmatprep.subr.bf16.mxu1 %v7691_v8 }
 0x779   :  { %5588 = vmatmul.mubr.msk.f32.gmra.mrb[22].mxu1 %vm106_vm0, %v1120_v52 }
 0x77a   :  { %6259 = vmatpush3.bf16.msra.mxu1 %v7691_v8  ;;  %5590 = vmatprep.mubr.msk.f32.mxu1 %vm106_vm0, %v1121_v53  ;;  %v1102_v8 = vld [vmem:[%s9294_s4 + $0x48] sm:$0xff] }
 0x77b   :  { %6261 = vmatprep.subr.bf16.mxu1 %v7705_v22  ;;  %v1078_v53 = vld [vmem:[%s9293_s3 + $0x8] sm:$0xff] }
 0x77d   :  { %5591 = vmatmul.mubr.msk.f32.gmra.mrb[24].mxu1 %vm106_vm0, %v1122_v56 }
 0x77e   :  { %6263 = vmatpush3.bf16.msra.mxu1 %v7705_v22  ;;  %5593 = vmatprep.mubr.msk.f32.mxu1 %vm106_vm0, %v1123_v60  ;;  %v1077_v60 = vld [vmem:[%s9293_s3] sm:$0xff] }
 0x77f   :  { %6265 = vmatprep.subr.bf16.mxu1 %v7719_v27 }
 0x781   :  { %5594 = vmatmul.mubr.msk.f32.gmra.mrb[26].mxu1 %vm106_vm0, %v1124_v55 }
 0x782   :  { %6267 = vmatpush3.bf16.msra.mxu1 %v7719_v27  ;;  %v1104_v27 = vld [vmem:[%s9294_s4 + $0x58] sm:$0xff] }
 0x783   :  { %6269 = vmatprep.subr.bf16.mxu1 %v7767_v32 }
 0x791   :  { %v5630_v43 = vpop.f32.mrb[8].mxu0 }
 0x792   :  { %v7818_v33 = vadd.f32 %v5630_v43, %v1094_v21  ;;  %v1444_v17 = vpop.f32.mrb[9].mxu0 }
 0x793   :  { %v7824_v62 = vadd.f32 %v1444_v17, %v1093_v44 }
 0x794   :  { %1573 = vmax.xlane.f32.xlu1 %v7818_v33 }
 0x795   :  { %v5633_v3 = vpop.f32.mrb[10].mxu0 }
 0x796   :  { %v7830_v4 = vadd.f32 %v5633_v3, %v1096_v63  ;;  %v1454_v2 = vpop.f32.mrb[11].mxu0  ;;  %v1079_v63 = vld [vmem:[%s9293_s3 + $0x10] sm:$0xff] }
 0x797   :  { %v7836_v12 = vadd.f32 %v1454_v2, %v1095_v11 }
 0x798   :  { %1571 = vmax.xlane.f32.xlu1 %v7824_v62 }
 0x799   :  { %v5636_v15 = vpop.f32.mrb[12].mxu0 }
 0x79a   :  { %v7842_v18 = vadd.f32 %v5636_v15, %v1098_v13  ;;  %v1464_v19 = vpop.f32.mrb[13].mxu0  ;;  %v1082_v13 = vld [vmem:[%s9293_s3 + $0x28] sm:$0xff] }
 0x79b   :  { %v7848_v0 = vadd.f32 %v1464_v19, %v1097_v26 }
 0x79c   :  { %1577 = vmax.xlane.f32.xlu1 %v7830_v4 }
 0x79d   :  { %v5639_v23 = vpop.f32.mrb[14].mxu0 }
 0x79e   :  { %v7854_v9 = vadd.f32 %v5639_v23, %v1100_v14  ;;  %v1474_v40 = vpop.f32.mrb[15].mxu0 }
 0x79f   :  { %v7860_v7 = vadd.f32 %v1474_v40, %v1099_v41  ;;  %v1081_v40 = vld [vmem:[%s9293_s3 + $0x20] sm:$0xff] }
 0x7a0   :  { %1575 = vmax.xlane.f32.xlu1 %v7836_v12 }
 0x7a1   :  { %v5642_v24 = vpop.f32.mrb[16].mxu0 }
 0x7a2   :  { %v7866_v5 = vadd.f32 %v5642_v24, %v1102_v8  ;;  %v1484_v22 = vpop.f32.mrb[17].mxu0 }
 0x7a3   :  { %v7872_v6 = vadd.f32 %v1484_v22, %v1101_v25  ;;  %v1084_v22 = vld [vmem:[%s9293_s3 + $0x38] sm:$0xff] }
 0x7a4   :  { %1581 = vmax.xlane.f32.xlu1 %v7842_v18 }
 0x7a5   :  { %v5645_v28 = vpop.f32.mrb[18].mxu0 }
 0x7a6   :  { %v7878_v29 = vadd.f32 %v5645_v28, %v1104_v27  ;;  %v1494_v30 = vpop.f32.mrb[19].mxu0 }
 0x7a7   :  { %v7884_v36 = vadd.f32 %v1494_v30, %v1103_v35 }
 0x7a8   :  { %1579 = vmax.xlane.f32.xlu1 %v7848_v0 }
 0x7a9   :  { %v5648_v39 = vpop.f32.mrb[20].mxu0 }
 0x7aa   :  { %v7890_v31 = vadd.f32 %v5648_v39, %v1106_v42  ;;  %v1504_v45 = vpop.f32.mrb[21].mxu0  ;;  %v1083_v39 = vld [vmem:[%s9293_s3 + $0x30] sm:$0xff] }
 0x7ab   :  { %v7896_v49 = vadd.f32 %v1504_v45, %v1105_v20 }
 0x7ac   :  { %1585 = vmax.xlane.f32.xlu1 %v7854_v9 }
 0x7ad   :  { %v5651_v34 = vpop.f32.mrb[22].mxu0 }
 0x7ae   :  { %v1514_v46 = vpop.f32.mrb[23].mxu0  ;;  %v7907_v52 = vadd.f32 %v5651_v34, %v1108_v51  ;;  %v1086_v34 = vld [vmem:[%s9293_s3 + $0x48] sm:$0xff] }
 0x7af   :  { %v7902_v50 = vadd.f32 %v1514_v46, %v1107_v47 }
 0x7b0   :  { %1583 = vmax.xlane.f32.xlu1 %v7860_v7 }
 0x7b4   :  { %1589 = vmax.xlane.f32.xlu1 %v7866_v5 }
 0x7b8   :  { %1587 = vmax.xlane.f32.xlu1 %v7872_v6 }
 0x7bc   :  { %1593 = vmax.xlane.f32.xlu1 %v7878_v29 }
 0x7c0   :  { %1591 = vmax.xlane.f32.xlu1 %v7884_v36 }
 0x7c4   :  { %1597 = vmax.xlane.f32.xlu1 %v7890_v31 }
 0x7c8   :  { %1595 = vmax.xlane.f32.xlu1 %v7896_v49 }
 0x7cc   :  { %1599 = vmax.xlane.f32.xlu1 %v7902_v50 }
 0x7d0   :  { %1601 = vmax.xlane.f32.xlu1 %v7907_v52 }
 0x838   :  { %v5574_v56 = vpop.f32.mrb[12].mxu1 }
 0x839   :  { %v7917_v55 = vadd.f32 %v5574_v56, %v1078_v53  ;;  %v1251_v10 = vpop.f32.mrb[13].mxu1 }
 0x83a   :  { %v7922_v37 = vadd.f32 %v1251_v10, %v1077_v60  ;;  %v1085_v60 = vld [vmem:[%s9293_s3 + $0x40] sm:$0xff] }
 0x83b   :  { %v1526_v59 = vsel %vm106_vm0, %v7917_v55, -inf }
 0x83c   :  { %1527 = vmax.xlane.f32.xlu0 %v1526_v59  ;;  %v5577_v21 = vpop.f32.mrb[14].mxu1  ;;  %v1523_v44 = vsel %vm106_vm0, %v7922_v37, -inf }
 0x83d   :  { %v7926_v43 = vadd.f32 %v5577_v21, %v1080_v58  ;;  %v1261_v17 = vpop.f32.mrb[15].mxu1  ;;  %v1088_v58 = vld [vmem:[%s9293_s3 + $0x58] sm:$0xff] }
 0x83e   :  { %v7938_v15 = vadd.f32 %v1261_v17, %v1079_v63 }
 0x83f   :  { %v1532_v2 = vsel %vm106_vm0, %v7926_v43, -inf }
 0x840   :  { %1524 = vmax.xlane.f32.xlu0 %v1523_v44  ;;  %v5580_v3 = vpop.f32.mrb[16].mxu1  ;;  %v1529_v23 = vsel %vm106_vm0, %v7938_v15, -inf  ;;  %v1087_v44 = vld [vmem:[%s9293_s3 + $0x50] sm:$0xff] }
 0x841   :  { %v1271_v11 = vpop.f32.mrb[17].mxu1  ;;  %v7940_v26 = vadd.f32 %v5580_v3, %v1082_v13  ;;  %v1090_v3 = vld [vmem:[%s9293_s3 + $0x68] sm:$0xff] }
 0x842   :  { %v7952_v25 = vadd.f32 %v1271_v11, %v1081_v40 }
 0x843   :  { %v1538_v8 = vsel %vm106_vm0, %v7940_v26, -inf }
 0x844   :  { %1533 = vmax.xlane.f32.xlu0 %v1532_v2  ;;  %v5583_v19 = vpop.f32.mrb[18].mxu1  ;;  %v1535_v35 = vsel %vm106_vm0, %v7952_v25, -inf }
 0x845   :  { %v1281_v14 = vpop.f32.mrb[19].mxu1  ;;  %v7954_v28 = vadd.f32 %v5583_v19, %v1084_v22  ;;  %v1089_v19 = vld [vmem:[%s9293_s3 + $0x60] sm:$0xff] }
 0x846   :  { %v7966_v46 = vadd.f32 %v1281_v14, %v1083_v39 }
 0x847   :  { %v1544_v45 = vsel %vm106_vm0, %v7954_v28, -inf }
 0x848   :  { %1530 = vmax.xlane.f32.xlu0 %v1529_v23  ;;  %v5586_v41 = vpop.f32.mrb[20].mxu1  ;;  %v1541_v56 = vsel %vm106_vm0, %v7966_v46, -inf  ;;  %v1091_v23 = vld [vmem:[%s9293_s3 + $0x70] sm:$0xff] }
 0x849   :  { %v1291_v24 = vpop.f32.mrb[21].mxu1  ;;  %v7968_v51 = vadd.f32 %v5586_v41, %v1086_v34 }
 0x84a   :  { %v7980_v59 = vadd.f32 %v1291_v24, %v1085_v60  ;;  %v1092_v24 = vld [vmem:[%s9293_s3 + $0x78] sm:$0xff] }
 0x84b   :  { %v1550_v10 = vsel %vm106_vm0, %v7968_v51, -inf }
 0x84c   :  { %1539 = vmax.xlane.f32.xlu0 %v1538_v8  ;;  %v5589_v27 = vpop.f32.mrb[22].mxu1  ;;  %v1547_v17 = vsel %vm106_vm0, %v7980_v59, -inf }
 0x84d   :  { %v1301_v30 = vpop.f32.mrb[23].mxu1  ;;  %v7982_v21 = vadd.f32 %v5589_v27, %v1088_v58 }
 0x84e   :  { %v7994_v2 = vadd.f32 %v1301_v30, %v1087_v44 }
 0x84f   :  { %v1556_v63 = vsel %vm106_vm0, %v7982_v21, -inf }
 0x850   :  { %1536 = vmax.xlane.f32.xlu0 %v1535_v35  ;;  %v5592_v42 = vpop.f32.mrb[24].mxu1  ;;  %v1553_v13 = vsel %vm106_vm0, %v7994_v2, -inf  ;;  %v1574_v35 = vpop.xlane.xlu1 %1573 }
 0x851   :  { %v1311_v20 = vpop.f32.mrb[25].mxu1  ;;  %v7996_v11 = vadd.f32 %v5592_v42, %v1090_v3 }
 0x852   :  { %v8008_v40 = vadd.f32 %v1311_v20, %v1089_v19 }
 0x853   :  { %v1562_v14 = vsel %vm106_vm0, %v7996_v11, -inf }
 0x854   :  { %1545 = vmax.xlane.f32.xlu0 %v1544_v45  ;;  %v5595_v47 = vpop.f32.mrb[26].mxu1  ;;  %v1559_v8 = vsel %vm106_vm0, %v8008_v40, -inf  ;;  %v1572_v39 = vpop.xlane.xlu1 %1571 }
 0x855   :  { %v1321_v53 = vpop.f32.mrb[27].mxu1  ;;  %v8019_v27 = vadd.f32 %v5595_v47, %v1092_v24 }
 0x856   :  { %v8010_v41 = vadd.f32 %v1321_v53, %v1091_v23 }
 0x857   :  { %v1568_v30 = vsel %vm106_vm0, %v8019_v27, -inf }
 0x858   :  { %1542 = vmax.xlane.f32.xlu0 %v1541_v56  ;;  %v1565_v22 = vsel %vm106_vm0, %v8010_v41, -inf  ;;  %v1578_v42 = vpop.xlane.xlu1 %1577 }
 0x85c   :  { %1551 = vmax.xlane.f32.xlu0 %v1550_v10  ;;  %v1576_v45 = vpop.xlane.xlu1 %1575 }
 0x860   :  { %1548 = vmax.xlane.f32.xlu0 %v1547_v17  ;;  %v1582_v20 = vpop.xlane.xlu1 %1581 }
 0x864   :  { %1557 = vmax.xlane.f32.xlu0 %v1556_v63  ;;  %v1580_v53 = vpop.xlane.xlu1 %1579 }
 0x868   :  { %1554 = vmax.xlane.f32.xlu0 %v1553_v13  ;;  %v1586_v17 = vpop.xlane.xlu1 %1585 }
 0x86c   :  { %1563 = vmax.xlane.f32.xlu0 %v1562_v14 }
 0x870   :  { %1560 = vmax.xlane.f32.xlu0 %v1559_v8 }
 0x874   :  { %1566 = vmax.xlane.f32.xlu0 %v1565_v22  ;;  %v1584_v22 = vpop.xlane.xlu1 %1583 }
 0x878   :  { %1569 = vmax.xlane.f32.xlu0 %v1568_v30 }
 0x8c9   :  { %v1528_v34 = vpop.xlane.xlu0 %1527 }
 0x8ca   :  { %v1604_v56 = vmax.f32 %v1528_v34, %v1574_v35 }
 0x8cc   :  { %v1668_v10 = vsub.f32 %v7818_v33, %v1604_v56  ;;  %v1620_v47 = vsub.f32 %v7917_v55, %v1604_v56 }
 0x8cd   :  { %v1525_v60 = vpop.xlane.xlu0 %1524 }
 0x8ce   :  { %v1603_v58 = vmax.f32 %v1525_v60, %v1572_v39  ;;  %v1685_v13 = vmul.f32 1.442695, %v1668_v10  ;;  %v1637_v8 = vmul.f32 1.442695, %v1620_v47  ;;  %v1590_v10 = vpop.xlane.xlu1 %1589 }
 0x8d0   :  { %v1619_v44 = vsub.f32 %v7922_v37, %v1603_v58  ;;  %v1667_v63 = vsub.f32 %v7824_v62, %v1603_v58 }
 0x8d1   :  { %v1534_v3 = vpop.xlane.xlu0 %1533 }
 0x8d2   :  { %v1635_v19 = vmul.f32 1.442695, %v1619_v44  ;;  %v1683_v14 = vmul.f32 1.442695, %v1667_v63  ;;  %v1606_v23 = vmax.f32 %v1534_v3, %v1578_v42 }
 0x8d4   :  { %6641 = vpow2.f32 %v1635_v19  ;;  %v1670_v33 = vsub.f32 %v7830_v4, %v1606_v23  ;;  %v1622_v55 = vsub.f32 %v7926_v43, %v1606_v23 }
 0x8d5   :  { %6643 = vpow2.f32 %v1683_v14  ;;  %v1531_v24 = vpop.xlane.xlu0 %1530 }
 0x8d6   :  { %6645 = vpow2.f32 %v1685_v13  ;;  %v1605_v30 = vmax.f32 %v1531_v24, %v1576_v45  ;;  %v1689_v39 = vmul.f32 1.442695, %v1670_v33  ;;  %v1641_v60 = vmul.f32 1.442695, %v1622_v55 }
 0x8d7   :  { %6647 = vpow2.f32 %v1637_v8 }
 0x8d8   :  { %v1621_v37 = vsub.f32 %v7938_v15, %v1605_v30  ;;  %v1669_v62 = vsub.f32 %v7836_v12, %v1605_v30 }
 0x8d9   :  { %v1540_v35 = vpop.xlane.xlu0 %1539 }
 0x8da   :  { %v1639_v34 = vmul.f32 1.442695, %v1621_v37  ;;  %v1687_v42 = vmul.f32 1.442695, %v1669_v62  ;;  %v1608_v56 = vmax.f32 %v1540_v35, %v1582_v20 }
 0x8dc   :  { %6649 = vpow2.f32 %v1639_v34  ;;  %v1672_v4 = vsub.f32 %v7842_v18, %v1608_v56  ;;  %v1624_v12 = vsub.f32 %v7940_v26, %v1608_v56 }
 0x8dd   :  { %6651 = vpow2.f32 %v1687_v42  ;;  %v1537_v58 = vpop.xlane.xlu0 %1536 }
 0x8de   :  { %v8031_v47 = vpop.eup %6641  ;;  %6653 = vpow2.f32 %v1689_v39  ;;  %v1607_v43 = vmax.f32 %v1537_v58, %v1580_v53  ;;  %v1588_v53 = vpop.xlane.xlu1 %1587  ;;  %v1693_v13 = vmul.f32 1.442695, %v1672_v4  ;;  %v1645_v23 = vmul.f32 1.442695, %v1624_v12 }
 0x8df   :  { %v6644_v45 = vpop.eup %6643  ;;  %6655 = vpow2.f32 %v1641_v60  ;;  %v1715_v15 = vsel %vm106_vm0, %v8031_v47, 0.0 }
 0x8e0   :  { %v6646_v44 = vpop.eup %6645  ;;  %v1623_v20 = vsub.f32 %v7952_v25, %v1607_v43  ;;  %v1671_v63 = vsub.f32 %v7848_v0, %v1607_v43  ;;  %1763 = vadd.xlane.f32.xlu1 %v6644_v45  ;;  %5684 = vmatprep.mubr.f32.mxu1 %v6644_v45 }
 0x8e1   :  { %v8039_v3 = vpop.eup %6647  ;;  %5685 = vmatmul.mubr.f32.vlgmr.msra.gmra.mrb[28].mxu1 %v6646_v44  ;;  %1716 = vadd.xlane.f32.xlu0 %v1715_v15  ;;  %v1546_v18 = vpop.xlane.xlu0 %1545 }
 0x8e2   :  { %v1643_v19 = vmul.f32 1.442695, %v1623_v20  ;;  %v1691_v14 = vmul.f32 1.442695, %v1671_v63  ;;  %6271 = vmatpush3.bf16.msra.mxu1 %v7767_v32  ;;  %v1610_v26 = vmax.f32 %v1546_v18, %v1586_v17  ;;  %v1718_v0 = vsel %vm106_vm0, %v8039_v3, 0.0  ;;  %v1594_v55 = vpop.xlane.xlu1 %1593 }
 0x8e3   :  { %6273 = vmatprep.subr.bf16.mxu1 %v7775_v38 }
 0x8e4   :  { %6657 = vpow2.f32 %v1643_v19  ;;  %1765 = vadd.xlane.f32.xlu1 %v6646_v44  ;;  %v1674_v24 = vsub.f32 %v7854_v9, %v1610_v26  ;;  %v1626_v33 = vsub.f32 %v7954_v28, %v1610_v26 }
 0x8e5   :  { %6659 = vpow2.f32 %v1691_v14  ;;  %1719 = vadd.xlane.f32.xlu0 %v1718_v0  ;;  %v1543_v25 = vpop.xlane.xlu0 %1542 }
 0x8e6   :  { %v8045_v8 = vpop.eup %6649  ;;  %6661 = vpow2.f32 %v1693_v13  ;;  %6275 = vmatpush3.bf16.msra.mxu1 %v7775_v38  ;;  %v1609_v32 = vmax.f32 %v1543_v25, %v1584_v22  ;;  %v1697_v9 = vmul.f32 1.442695, %v1674_v24  ;;  %v1649_v42 = vmul.f32 1.442695, %v1626_v33 }
 0x8e7   :  { %v6652_v17 = vpop.eup %6651  ;;  %6663 = vpow2.f32 %v1645_v23  ;;  %v1721_v30 = vsel %vm106_vm0, %v8045_v8, 0.0 }
 0x8e8   :  { %v6654_v37 = vpop.eup %6653  ;;  %v1625_v62 = vsub.f32 %v7966_v46, %v1609_v32  ;;  %v1673_v35 = vsub.f32 %v7860_v7, %v1609_v32  ;;  %1767 = vadd.xlane.f32.xlu1 %v6652_v17  ;;  %5687 = vmatprep.mubr.f32.mxu1 %v6652_v17  ;;  %v1592_v46 = vpop.xlane.xlu1 %1591 }
 0x8e9   :  { %v8054_v39 = vpop.eup %6655  ;;  %5688 = vmatmul.mubr.f32.gmra.mrb[30].mxu1 %v6654_v37  ;;  %1722 = vadd.xlane.f32.xlu0 %v1721_v30  ;;  %v1552_v38 = vpop.xlane.xlu0 %1551 }
 0x8ea   :  { %v1647_v22 = vmul.f32 1.442695, %v1625_v62  ;;  %v1695_v34 = vmul.f32 1.442695, %v1673_v35  ;;  %v1612_v28 = vmax.f32 %v1552_v38, %v1590_v10  ;;  %v1724_v56 = vsel %vm106_vm0, %v8054_v39, 0.0 }
 0x8ec   :  { %6665 = vpow2.f32 %v1647_v22  ;;  %1769 = vadd.xlane.f32.xlu1 %v6654_v37  ;;  %v1676_v58 = vsub.f32 %v7866_v5, %v1612_v28  ;;  %v1628_v10 = vsub.f32 %v7968_v51, %v1612_v28  ;;  %v1598_v19 = vpop.xlane.xlu1 %1597 }
 0x8ed   :  { %6667 = vpow2.f32 %v1695_v34  ;;  %1725 = vadd.xlane.f32.xlu0 %v1724_v56  ;;  %v1549_v7 = vpop.xlane.xlu0 %1548 }
 0x8ee   :  { %v8058_v60 = vpop.eup %6657  ;;  %6669 = vpow2.f32 %v1697_v9  ;;  %v1611_v4 = vmax.f32 %v1549_v7, %v1588_v53  ;;  %v1701_v63 = vmul.f32 1.442695, %v1676_v58  ;;  %v1653_v51 = vmul.f32 1.442695, %v1628_v10 }
 0x8ef   :  { %v6660_v43 = vpop.eup %6659  ;;  %6671 = vpow2.f32 %v1649_v42  ;;  %v1727_v45 = vsel %vm106_vm0, %v8058_v60, 0.0 }
 0x8f0   :  { %v6662_v12 = vpop.eup %6661  ;;  %v1627_v15 = vsub.f32 %v7980_v59, %v1611_v4  ;;  %v1675_v44 = vsub.f32 %v7872_v6, %v1611_v4  ;;  %1771 = vadd.xlane.f32.xlu1 %v6660_v43  ;;  %5690 = vmatprep.mubr.f32.mxu1 %v6660_v43 }
 0x8f1   :  { %v8066_v20 = vpop.eup %6663  ;;  %5691 = vmatmul.mubr.f32.gmra.mrb[32].mxu1 %v6662_v12  ;;  %1728 = vadd.xlane.f32.xlu0 %v1727_v45  ;;  %v1558_v5 = vpop.xlane.xlu0 %1557 }
 0x8f2   :  { %v1651_v18 = vmul.f32 1.442695, %v1627_v15  ;;  %v1699_v53 = vmul.f32 1.442695, %v1675_v44  ;;  %v1614_v13 = vmax.f32 %v1558_v5, %v1594_v55  ;;  %v1730_v59 = vsel %vm106_vm0, %v8066_v20, 0.0  ;;  %v1596_v55 = vpop.xlane.xlu1 %1595 }
 0x8f4   :  { %6673 = vpow2.f32 %v1651_v18  ;;  %1773 = vadd.xlane.f32.xlu1 %v6662_v12  ;;  %v1678_v26 = vsub.f32 %v7878_v29, %v1614_v13  ;;  %v1630_v25 = vsub.f32 %v7982_v21, %v1614_v13 }
 0x8f5   :  { %6675 = vpow2.f32 %v1699_v53  ;;  %1731 = vadd.xlane.f32.xlu0 %v1730_v59  ;;  %v1555_v6 = vpop.xlane.xlu0 %1554 }
 0x8f6   :  { %v8070_v14 = vpop.eup %6665  ;;  %6677 = vpow2.f32 %v1701_v63  ;;  %v1613_v23 = vmax.f32 %v1555_v6, %v1592_v46  ;;  %v1705_v37 = vmul.f32 1.442695, %v1678_v26  ;;  %v1657_v38 = vmul.f32 1.442695, %v1630_v25  ;;  %v1600_v56 = vpop.xlane.xlu1 %1599 }
 0x8f7   :  { %v6668_v0 = vpop.eup %6667  ;;  %6679 = vpow2.f32 %v1653_v51  ;;  %v1733_v24 = vsel %vm106_vm0, %v8070_v14, 0.0 }
 0x8f8   :  { %v6670_v32 = vpop.eup %6669  ;;  %v1629_v17 = vsub.f32 %v7994_v2, %v1613_v23  ;;  %v1677_v33 = vsub.f32 %v7884_v36, %v1613_v23  ;;  %1775 = vadd.xlane.f32.xlu1 %v6668_v0  ;;  %5693 = vmatprep.mubr.f32.mxu1 %v6668_v0 }
 0x8f9   :  { %v8078_v30 = vpop.eup %6671  ;;  %5694 = vmatmul.mubr.f32.gmra.mrb[34].mxu1 %v6670_v32  ;;  %1734 = vadd.xlane.f32.xlu0 %v1733_v24  ;;  %v1564_v29 = vpop.xlane.xlu0 %1563 }
 0x8fa   :  { %v1655_v62 = vmul.f32 1.442695, %v1629_v17  ;;  %v1703_v35 = vmul.f32 1.442695, %v1677_v33  ;;  %v1616_v21 = vmax.f32 %v1564_v29, %v1598_v19  ;;  %v1736_v2 = vsel %vm106_vm0, %v8078_v30, 0.0 }
 0x8fc   :  { %6681 = vpow2.f32 %v1655_v62  ;;  %1777 = vadd.xlane.f32.xlu1 %v6670_v32  ;;  %v1680_v22 = vsub.f32 %v7890_v31, %v1616_v21  ;;  %v1632_v42 = vsub.f32 %v7996_v11, %v1616_v21 }
 0x8fd   :  { %6683 = vpow2.f32 %v1703_v35  ;;  %1737 = vadd.xlane.f32.xlu0 %v1736_v2  ;;  %v1561_v36 = vpop.xlane.xlu0 %1560 }
 0x8fe   :  { %v8082_v9 = vpop.eup %6673  ;;  %6685 = vpow2.f32 %v1705_v37  ;;  %v1615_v34 = vmax.f32 %v1561_v36, %v1596_v55  ;;  %v1709_v10 = vmul.f32 1.442695, %v1680_v22  ;;  %v1661_v15 = vmul.f32 1.442695, %v1632_v42 }
 0x8ff   :  { %v6676_v28 = vpop.eup %6675  ;;  %6687 = vpow2.f32 %v1657_v38  ;;  %v1739_v7 = vsel %vm106_vm0, %v8082_v9, 0.0 }
 0x900   :  { %v6678_v46 = vpop.eup %6677  ;;  %v1631_v58 = vsub.f32 %v8008_v40, %v1615_v34  ;;  %v1679_v4 = vsub.f32 %v7896_v49, %v1615_v34  ;;  %1779 = vadd.xlane.f32.xlu1 %v6676_v28  ;;  %5696 = vmatprep.mubr.f32.mxu1 %v6676_v28  ;;  %v1602_v40 = vpop.xlane.xlu1 %1601 }
 0x901   :  { %v8090_v43 = vpop.eup %6679  ;;  %5697 = vmatmul.mubr.f32.gmra.mrb[36].mxu1 %v6678_v46  ;;  %1740 = vadd.xlane.f32.xlu0 %v1739_v7  ;;  %v1567_v31 = vpop.xlane.xlu0 %1566 }
 0x902   :  { %v1659_v45 = vmul.f32 1.442695, %v1631_v58  ;;  %v1707_v12 = vmul.f32 1.442695, %v1679_v4  ;;  %v1617_v11 = vmax.f32 %v1567_v31, %v1600_v56  ;;  %v1742_v49 = vsel %vm106_vm0, %v8090_v43, 0.0 }
 0x904   :  { %6689 = vpow2.f32 %v1659_v45  ;;  %v1633_v44 = vsub.f32 %v8010_v41, %v1617_v11  ;;  %v1681_v5 = vsub.f32 %v7902_v50, %v1617_v11  ;;  %1781 = vadd.xlane.f32.xlu1 %v6678_v46 }
 0x905   :  { %6691 = vpow2.f32 %v1707_v12  ;;  %1743 = vadd.xlane.f32.xlu0 %v1742_v49  ;;  %v1570_v63 = vpop.xlane.xlu0 %1569 }
 0x906   :  { %v6682_v18 = vpop.eup %6681  ;;  %6693 = vpow2.f32 %v1709_v10  ;;  %v1711_v53 = vmul.f32 1.442695, %v1681_v5  ;;  %v1618_v13 = vmax.f32 %v1570_v63, %v1602_v40  ;;  %v1663_v19 = vmul.f32 1.442695, %v1633_v44 }
 0x907   :  { %v6684_v51 = vpop.eup %6683  ;;  %6695 = vpow2.f32 %v1661_v15  ;;  %v1745_v59 = vsel %vm106_vm0, %v6682_v18, 0.0 }
 0x908   :  { %v6686_v41 = vpop.eup %6685  ;;  %v1634_v50 = vsub.f32 %v8019_v27, %v1618_v13  ;;  %v1682_v6 = vsub.f32 %v7907_v52, %v1618_v13  ;;  %1783 = vadd.xlane.f32.xlu1 %v6684_v51  ;;  %5699 = vmatprep.mubr.f32.mxu1 %v6684_v51  ;;  %6697 = vpow2.f32 %v1711_v53 }
 0x909   :  { %v6688_v26 = vpop.eup %6687  ;;  %5700 = vmatmul.mubr.f32.gmra.mrb[38].mxu1 %v6686_v41  ;;  %1746 = vadd.xlane.f32.xlu0 %v1745_v59  ;;  %6699 = vpow2.f32 %v1663_v19 }
 0x90a   :  { %v1713_v23 = vmul.f32 1.442695, %v1682_v6  ;;  %v1665_v0 = vmul.f32 1.442695, %v1634_v50  ;;  %v1748_v25 = vsel %vm106_vm0, %v6688_v26, 0.0 }
 0x90c   :  { %1785 = vadd.xlane.f32.xlu1 %v6686_v41  ;;  %6701 = vpow2.f32 %v1713_v23 }
 0x90d   :  { %1749 = vadd.xlane.f32.xlu0 %v1748_v25  ;;  %6703 = vpow2.f32 %v1665_v0 }
 0x90e   :  { %v6690_v24 = vpop.eup %6689 }
 0x90f   :  { %v6692_v32 = vpop.eup %6691  ;;  %v1751_v27 = vsel %vm106_vm0, %v6690_v24, 0.0 }
 0x910   :  { %v6694_v52 = vpop.eup %6693  ;;  %1787 = vadd.xlane.f32.xlu1 %v6692_v32  ;;  %5702 = vmatprep.mubr.f32.mxu1 %v6692_v32 }
 0x911   :  { %v6696_v17 = vpop.eup %6695  ;;  %5703 = vmatmul.mubr.f32.gmra.mrb[40].mxu1 %v6694_v52  ;;  %1752 = vadd.xlane.f32.xlu0 %v1751_v27 }
 0x912   :  { %v6698_v33 = vpop.eup %6697  ;;  %v1754_v55 = vsel %vm106_vm0, %v6696_v17, 0.0 }
 0x913   :  { %5705 = vmatprep.mubr.f32.mxu1 %v6698_v33  ;;  %v6700_v29 = vpop.eup %6699 }
 0x914   :  { %1789 = vadd.xlane.f32.xlu1 %v6694_v52  ;;  %v1757_v62 = vsel %vm106_vm0, %v6700_v29, 0.0 }
 0x915   :  { %1755 = vadd.xlane.f32.xlu0 %v1754_v55 }
 0x916   :  { %v6702_v37 = vpop.eup %6701 }
 0x917   :  { %5706 = vmatmul.mubr.f32.gmra.mrb[42].mxu1 %v6702_v37  ;;  %v6704_v35 = vpop.eup %6703 }
 0x918   :  { %1791 = vadd.xlane.f32.xlu1 %v6698_v33  ;;  %5716 = vmatprep.mubr.msk.f32.mxu1 %vm106_vm0, %v8031_v47  ;;  %v1760_v21 = vsel %vm106_vm0, %v6704_v35, 0.0  ;;  %v8130_v47 = vmul.f32 0.17677669, %v7563_v57 }
 0x919   :  { %1758 = vadd.xlane.f32.xlu0 %v1757_v62 }
 0x91b   :  { %5717 = vmatmul.mubr.msk.f32.vlgmr.msra.gmra.mrb[28].mxu1 %vm106_vm0, %v8039_v3 }
 0x91c   :  { %1793 = vadd.xlane.f32.xlu1 %v6702_v37  ;;  %5719 = vmatprep.mubr.msk.f32.mxu1 %vm106_vm0, %v8045_v8 }
 0x91d   :  { %1761 = vadd.xlane.f32.xlu0 %v1760_v21 }
 0x91f   :  { %5720 = vmatmul.mubr.msk.f32.gmra.mrb[30].mxu1 %vm106_vm0, %v8054_v39 }
 0x920   :  { %5722 = vmatprep.mubr.msk.f32.mxu1 %vm106_vm0, %v8058_v60 }
 0x923   :  { %5723 = vmatmul.mubr.msk.f32.gmra.mrb[32].mxu1 %vm106_vm0, %v8066_v20 }
 0x924   :  { %5725 = vmatprep.mubr.msk.f32.mxu1 %vm106_vm0, %v8070_v14 }
 0x927   :  { %5726 = vmatmul.mubr.msk.f32.gmra.mrb[34].mxu1 %vm106_vm0, %v8078_v30 }
 0x928   :  { %5728 = vmatprep.mubr.msk.f32.mxu1 %vm106_vm0, %v8082_v9 }
 0x92b   :  { %5729 = vmatmul.mubr.msk.f32.gmra.mrb[36].mxu1 %vm106_vm0, %v8090_v43 }
 0x92c   :  { %5731 = vmatprep.mubr.msk.f32.mxu1 %vm106_vm0, %v6682_v18 }
 0x92f   :  { %5732 = vmatmul.mubr.msk.f32.gmra.mrb[38].mxu1 %vm106_vm0, %v6688_v26 }
 0x930   :  { %5734 = vmatprep.mubr.msk.f32.mxu1 %vm106_vm0, %v6690_v24 }
 0x933   :  { %5735 = vmatmul.mubr.msk.f32.gmra.mrb[40].mxu1 %vm106_vm0, %v6696_v17 }
 0x934   :  { %5737 = vmatprep.mubr.msk.f32.mxu1 %vm106_vm0, %v6700_v29 }
 0x937   :  { %5738 = vmatmul.mubr.msk.f32.gmra.mrb[42].mxu1 %vm106_vm0, %v6704_v35 }
 0x938   :  { %5804 = vmatprep.mubr.msk.f32.mxu1 %vm106_vm0, %v8130_v47 }
 0x96d   :  { %v1764_v3 = vpop.xlane.xlu1 %1763 }
 0x96e   :  { %v1717_v8 = vpop.xlane.xlu0 %1716 }
 0x96f   :  { %v1795_v42 = vadd.f32 %v1764_v3, %v1717_v8 }
 0x971   :  { %v1766_v39 = vpop.xlane.xlu1 %1765 }
 0x972   :  { %v1720_v60 = vpop.xlane.xlu0 %1719 }
 0x973   :  { %v1796_v28 = vadd.f32 %v1766_v39, %v1720_v60 }
 0x975   :  { %v1768_v20 = vpop.xlane.xlu1 %1767  ;;  %6705 = vrcp.f32 %v1796_v28 }
 0x976   :  { %v1723_v14 = vpop.xlane.xlu0 %1722  ;;  %6707 = vrcp.f32 %v1795_v42 }
 0x977   :  { %v1797_v58 = vadd.f32 %v1768_v20, %v1723_v14 }
 0x979   :  { %v1770_v30 = vpop.xlane.xlu1 %1769 }
 0x97a   :  { %v1726_v38 = vpop.xlane.xlu0 %1725 }
 0x97b   :  { %v1798_v46 = vadd.f32 %v1770_v30, %v1726_v38 }
 0x97d   :  { %v1772_v2 = vpop.xlane.xlu1 %1771  ;;  %6709 = vrcp.f32 %v1798_v46 }
 0x97e   :  { %v1729_v36 = vpop.xlane.xlu0 %1728  ;;  %6711 = vrcp.f32 %v1797_v58 }
 0x97f   :  { %v6706_v31 = vpop.eup %6705  ;;  %v1799_v15 = vadd.f32 %v1772_v2, %v1729_v36 }
 0x980   :  { %v6708_v11 = vpop.eup %6707 }
 0x981   :  { %v1774_v9 = vpop.xlane.xlu1 %1773 }
 0x982   :  { %v1732_v22 = vpop.xlane.xlu0 %1731 }
 0x983   :  { %v1800_v10 = vadd.f32 %v1774_v9, %v1732_v22 }
 0x985   :  { %v1776_v34 = vpop.xlane.xlu1 %1775  ;;  %6713 = vrcp.f32 %v1800_v10 }
 0x986   :  { %v1735_v57 = vpop.xlane.xlu0 %1734  ;;  %6715 = vrcp.f32 %v1799_v15 }
 0x987   :  { %v6710_v59 = vpop.eup %6709  ;;  %v1801_v27 = vadd.f32 %v1776_v34, %v1735_v57 }
 0x988   :  { %v6712_v50 = vpop.eup %6711 }
 0x989   :  { %v1778_v56 = vpop.xlane.xlu1 %1777 }
 0x98a   :  { %v1738_v7 = vpop.xlane.xlu0 %1737 }
 0x98b   :  { %v1802_v0 = vadd.f32 %v1778_v56, %v1738_v7 }
 0x98d   :  { %v1780_v4 = vpop.xlane.xlu1 %1779  ;;  %6717 = vrcp.f32 %v1802_v0 }
 0x98e   :  { %v1741_v43 = vpop.xlane.xlu0 %1740  ;;  %6719 = vrcp.f32 %v1801_v27 }
 0x98f   :  { %v6714_v3 = vpop.eup %6713  ;;  %v1803_v2 = vadd.f32 %v1780_v4, %v1741_v43 }
 0x990   :  { %v6716_v8 = vpop.eup %6715 }
 0x991   :  { %v1782_v45 = vpop.xlane.xlu1 %1781 }
 0x992   :  { %v1744_v44 = vpop.xlane.xlu0 %1743 }
 0x993   :  { %v1804_v20 = vadd.f32 %v1782_v45, %v1744_v44 }
 0x995   :  { %v1784_v41 = vpop.xlane.xlu1 %1783  ;;  %6721 = vrcp.f32 %v1804_v20 }
 0x996   :  { %v1747_v6 = vpop.xlane.xlu0 %1746  ;;  %6723 = vrcp.f32 %v1803_v2 }
 0x997   :  { %v6718_v46 = vpop.eup %6717  ;;  %v1805_v15 = vadd.f32 %v1784_v41, %v1747_v6 }
 0x998   :  { %v6720_v58 = vpop.eup %6719 }
 0x999   :  { %v1786_v55 = vpop.xlane.xlu1 %1785 }
 0x99a   :  { %v1750_v35 = vpop.xlane.xlu0 %1749 }
 0x99d   :  { %v1788_v9 = vpop.xlane.xlu1 %1787 }
 0x99e   :  { %v1753_v22 = vpop.xlane.xlu0 %1752 }
 0x9a1   :  { %v1790_v10 = vpop.xlane.xlu1 %1789 }
 0x9a2   :  { %v1756_v44 = vpop.xlane.xlu0 %1755 }
 0x9a6   :  { %v1759_v6 = vpop.xlane.xlu0 %1758 }
 0x9ee   :  { %v5718_v12 = vpop.f32.mrb[28].mxu1 }
 0x9ef   :  { %v8135_v5 = vmul.f32 %v6706_v31, %v5718_v12  ;;  %v2086_v49 = vpop.f32.mrb[29].mxu1  ;;  %v1806_v31 = vadd.f32 %v1786_v55, %v1750_v35 }
 0x9f0   :  { %v8137_v40 = vmul.f32 %v6708_v11, %v2086_v49 }
 0x9f1   :  { %v2186_v63 = vsel %vm106_vm0, %v8135_v5, 0.0  ;;  %v2248_v18 = vmul.f32 %v8135_v5, %v8135_v5  ;;  %6725 = vrcp.f32 %v1806_v31 }
 0x9f2   :  { %v5721_v53 = vpop.f32.mrb[30].mxu1  ;;  %2187 = vadd.xlane.f32.xlu1 %v2186_v63  ;;  %v2183_v13 = vsel %vm106_vm0, %v8137_v40, 0.0  ;;  %v2247_v51 = vmul.f32 %v8137_v40, %v8137_v40  ;;  %6727 = vrcp.f32 %v1805_v15 }
 0x9f3   :  { %v2096_v19 = vpop.f32.mrb[31].mxu1  ;;  %2184 = vadd.xlane.f32.xlu0 %v2183_v13  ;;  %v8147_v26 = vmul.f32 %v6710_v59, %v5721_v53  ;;  %v2266_v23 = vsel %vm106_vm0, %v2248_v18, 0.0  ;;  %v6722_v59 = vpop.eup %6721 }
 0x9f4   :  { %v8150_v25 = vmul.f32 %v6712_v50, %v2096_v19  ;;  %v2263_v32 = vsel %vm106_vm0, %v2247_v51, 0.0  ;;  %v6724_v41 = vpop.eup %6723  ;;  %v1792_v50 = vpop.xlane.xlu1 %1791 }
 0x9f5   :  { %v2192_v17 = vsel %vm106_vm0, %v8147_v26, 0.0  ;;  %v2250_v33 = vmul.f32 %v8147_v26, %v8147_v26 }
 0x9f6   :  { %v5724_v24 = vpop.f32.mrb[32].mxu1  ;;  %2267 = vadd.xlane.f32.xlu1 %v2266_v23  ;;  %v2189_v37 = vsel %vm106_vm0, %v8150_v25, 0.0  ;;  %v2249_v62 = vmul.f32 %v8150_v25, %v8150_v25 }
 0x9f7   :  { %v2106_v52 = vpop.f32.mrb[33].mxu1  ;;  %2264 = vadd.xlane.f32.xlu0 %v2263_v32  ;;  %v8161_v39 = vmul.f32 %v6714_v3, %v5724_v24  ;;  %v2272_v60 = vsel %vm106_vm0, %v2250_v33, 0.0  ;;  %v1808_v24 = vadd.f32 %v1790_v10, %v1756_v44 }
 0x9f8   :  { %v8164_v14 = vmul.f32 %v6716_v8, %v2106_v52  ;;  %v2269_v38 = vsel %vm106_vm0, %v2249_v62, 0.0  ;;  %v1807_v52 = vadd.f32 %v1788_v9, %v1753_v22  ;;  %v1762_v62 = vpop.xlane.xlu0 %1761 }
 0x9f9   :  { %v2198_v34 = vsel %vm106_vm0, %v8161_v39, 0.0  ;;  %v2252_v57 = vmul.f32 %v8161_v39, %v8161_v39  ;;  %6729 = vrcp.f32 %v1808_v24 }
 0x9fa   :  { %v5727_v29 = vpop.f32.mrb[34].mxu1  ;;  %2193 = vadd.xlane.f32.xlu1 %v2192_v17  ;;  %v2195_v42 = vsel %vm106_vm0, %v8164_v14, 0.0  ;;  %v2251_v56 = vmul.f32 %v8164_v14, %v8164_v14  ;;  %6731 = vrcp.f32 %v1807_v52 }
 0x9fb   :  { %v2116_v21 = vpop.f32.mrb[35].mxu1  ;;  %2190 = vadd.xlane.f32.xlu0 %v2189_v37  ;;  %v8175_v4 = vmul.f32 %v6718_v46, %v5727_v29  ;;  %v2278_v43 = vsel %vm106_vm0, %v2252_v57, 0.0  ;;  %v1794_v37 = vpop.xlane.xlu1 %1793 }
 0x9fc   :  { %v8178_v45 = vmul.f32 %v6720_v58, %v2116_v21  ;;  %v2275_v11 = vsel %vm106_vm0, %v2251_v56, 0.0  ;;  %v6726_v35 = vpop.eup %6725 }
 0x9fd   :  { %v2204_v63 = vsel %vm106_vm0, %v8175_v4, 0.0  ;;  %v2254_v18 = vmul.f32 %v8175_v4, %v8175_v4  ;;  %v6728_v21 = vpop.eup %6727 }
 0x9fe   :  { %v5730_v30 = vpop.f32.mrb[36].mxu1  ;;  %2273 = vadd.xlane.f32.xlu1 %v2272_v60  ;;  %v2201_v13 = vsel %vm106_vm0, %v8178_v45, 0.0  ;;  %v2253_v51 = vmul.f32 %v8178_v45, %v8178_v45  ;;  %v1810_v60 = vadd.f32 %v1794_v37, %v1762_v62 }
 0x9ff   :  { %v2126_v36 = vpop.f32.mrb[37].mxu1  ;;  %2270 = vadd.xlane.f32.xlu0 %v2269_v38  ;;  %v8191_v23 = vmul.f32 %v6722_v59, %v5730_v30  ;;  %v2284_v0 = vsel %vm106_vm0, %v2254_v18, 0.0  ;;  %v1809_v38 = vadd.f32 %v1792_v50, %v1759_v6 }
 0xa00   :  { %v8194_v32 = vmul.f32 %v6724_v41, %v2126_v36  ;;  %v2281_v27 = vsel %vm106_vm0, %v2253_v51, 0.0  ;;  %6733 = vrcp.f32 %v1810_v60 }
 0xa01   :  { %v2210_v17 = vsel %vm106_vm0, %v8191_v23, 0.0  ;;  %v2256_v33 = vmul.f32 %v8191_v23, %v8191_v23  ;;  %6735 = vrcp.f32 %v1809_v38 }
 0xa02   :  { %v5733_v28 = vpop.f32.mrb[38].mxu1  ;;  %2199 = vadd.xlane.f32.xlu1 %v2198_v34  ;;  %v2207_v55 = vsel %vm106_vm0, %v8194_v32, 0.0  ;;  %v2255_v29 = vmul.f32 %v8194_v32, %v8194_v32 }
 0xa03   :  { %v2136_v7 = vpop.f32.mrb[39].mxu1  ;;  %2196 = vadd.xlane.f32.xlu0 %v2195_v42  ;;  %v8205_v3 = vmul.f32 %v6726_v35, %v5733_v28  ;;  %v2290_v8 = vsel %vm106_vm0, %v2256_v33, 0.0  ;;  %v6730_v34 = vpop.eup %6729 }
 0xa04   :  { %v8208_v20 = vmul.f32 %v6728_v21, %v2136_v7  ;;  %v2287_v30 = vsel %vm106_vm0, %v2255_v29, 0.0  ;;  %v6732_v57 = vpop.eup %6731 }
 0xa05   :  { %v2216_v2 = vsel %vm106_vm0, %v8205_v3, 0.0  ;;  %v2258_v36 = vmul.f32 %v8205_v3, %v8205_v3 }
 0xa06   :  { %v5736_v12 = vpop.f32.mrb[40].mxu1  ;;  %2279 = vadd.xlane.f32.xlu1 %v2278_v43  ;;  %v2213_v9 = vsel %vm106_vm0, %v8208_v20, 0.0  ;;  %v2257_v22 = vmul.f32 %v8208_v20, %v8208_v20 }
 0xa07   :  { %v2146_v49 = vpop.f32.mrb[41].mxu1  ;;  %2276 = vadd.xlane.f32.xlu0 %v2275_v11  ;;  %v8219_v28 = vmul.f32 %v6730_v34, %v5736_v12  ;;  %v2296_v42 = vsel %vm106_vm0, %v2258_v36, 0.0 }
 0xa08   :  { %v8222_v56 = vmul.f32 %v6732_v57, %v2146_v49  ;;  %v2293_v7 = vsel %vm106_vm0, %v2257_v22, 0.0 }
 0xa09   :  { %v2222_v46 = vsel %vm106_vm0, %v8219_v28, 0.0  ;;  %v2260_v58 = vmul.f32 %v8219_v28, %v8219_v28 }
 0xa0a   :  { %v8185_v53 = vpop.f32.mrb[42].mxu1  ;;  %2205 = vadd.xlane.f32.xlu1 %v2204_v63  ;;  %v2219_v43 = vsel %vm106_vm0, %v8222_v56, 0.0  ;;  %v2259_v31 = vmul.f32 %v8222_v56, %v8222_v56  ;;  %v6734_v10 = vpop.eup %6733 }
 0xa0b   :  { %v2156_v19 = vpop.f32.mrb[43].mxu1  ;;  %2202 = vadd.xlane.f32.xlu0 %v2201_v13  ;;  %v6736_v12 = vpop.eup %6735  ;;  %v8234_v11 = vmul.f32 %v6734_v10, %v8185_v53  ;;  %v2302_v15 = vsel %vm106_vm0, %v2260_v58, 0.0 }
 0xa0c   :  { %v8237_v44 = vmul.f32 %v6736_v12, %v2156_v19  ;;  %v2299_v49 = vsel %vm106_vm0, %v2259_v31, 0.0 }
 0xa0d   :  { %v2228_v63 = vsel %vm106_vm0, %v8234_v11, 0.0  ;;  %v2262_v18 = vmul.f32 %v8234_v11, %v8234_v11 }
 0xa0e   :  { %2285 = vadd.xlane.f32.xlu1 %v2284_v0  ;;  %v2225_v13 = vsel %vm106_vm0, %v8237_v44, 0.0  ;;  %v2261_v53 = vmul.f32 %v8237_v44, %v8237_v44 }
 0xa0f   :  { %2282 = vadd.xlane.f32.xlu0 %v2281_v27  ;;  %v2308_v51 = vsel %vm106_vm0, %v2262_v18, 0.0 }
 0xa10   :  { %v2305_v19 = vsel %vm106_vm0, %v2261_v53, 0.0 }
 0xa12   :  { %2211 = vadd.xlane.f32.xlu1 %v2210_v17 }
 0xa13   :  { %2208 = vadd.xlane.f32.xlu0 %v2207_v55 }
 0xa16   :  { %2291 = vadd.xlane.f32.xlu1 %v2290_v8 }
 0xa17   :  { %2288 = vadd.xlane.f32.xlu0 %v2287_v30 }
 0xa1a   :  { %2217 = vadd.xlane.f32.xlu1 %v2216_v2 }
 0xa1b   :  { %2214 = vadd.xlane.f32.xlu0 %v2213_v9 }
 0xa1e   :  { %2297 = vadd.xlane.f32.xlu1 %v2296_v42 }
 0xa1f   :  { %2294 = vadd.xlane.f32.xlu0 %v2293_v7 }
 0xa22   :  { %2223 = vadd.xlane.f32.xlu1 %v2222_v46 }
 0xa23   :  { %2220 = vadd.xlane.f32.xlu0 %v2219_v43 }
 0xa26   :  { %2303 = vadd.xlane.f32.xlu1 %v2302_v15 }
 0xa27   :  { %2300 = vadd.xlane.f32.xlu0 %v2299_v49 }
 0xa2a   :  { %2229 = vadd.xlane.f32.xlu1 %v2228_v63  ;;  %v8267_v63 = vld [vmem:[%s9302_s12 + $0x3] ss:$0 sm:$0xff] }
 0xa2b   :  { %2226 = vadd.xlane.f32.xlu0 %v2225_v13 }
 0xa2e   :  { %2309 = vadd.xlane.f32.xlu1 %v2308_v51 }
 0xa2f   :  { %2306 = vadd.xlane.f32.xlu0 %v2305_v19 }
 0xa7f   :  { %v2188_v59 = vpop.xlane.xlu1 %2187 }
 0xa80   :  { %v2232_v41 = vmul.f32 0.03125, %v2188_v59  ;;  %v2185_v50 = vpop.xlane.xlu0 %2184 }
 0xa81   :  { %v2231_v6 = vmul.f32 0.03125, %v2185_v50 }
 0xa82   :  { %v2328_v24 = vmul.f32 %v2232_v41, %v2232_v41  ;;  %v2360_v10 = vsub.f32 %v8135_v5, %v2232_v41 }
 0xa83   :  { %v2268_v0 = vpop.xlane.xlu1 %2267  ;;  %v2327_v17 = vmul.f32 %v2231_v6, %v2231_v6  ;;  %v2359_v49 = vsub.f32 %v8137_v40, %v2231_v6 }
 0xa84   :  { %v2312_v27 = vmul.f32 0.03125, %v2268_v0  ;;  %v2265_v52 = vpop.xlane.xlu0 %2264 }
 0xa85   :  { %v2311_v33 = vmul.f32 0.03125, %v2265_v52  ;;  %v8277_v52 = vld [vmem:[%s9303_s13 + $0x3] ss:$0 sm:$0xff] }
 0xa86   :  { %v2344_v55 = vsub.f32 %v2312_v27, %v2328_v24 }
 0xa87   :  { %v2343_v29 = vsub.f32 %v2311_v33, %v2327_v17  ;;  %v2194_v37 = vpop.xlane.xlu1 %2193 }
 0xa88   :  { %v2376_v62 = vadd.f32 1e-05, %v2344_v55  ;;  %v8250_v35 = vmul.f32 0.03125, %v2194_v37  ;;  %v2191_v21 = vpop.xlane.xlu0 %2190 }
 0xa89   :  { %v2375_v8 = vadd.f32 1e-05, %v2343_v29  ;;  %v8252_v60 = vmul.f32 0.03125, %v2191_v21 }
 0xa8a   :  { %6737 = vrsqrt.f32 %v2376_v62  ;;  %v2330_v38 = vmul.f32 %v8250_v35, %v8250_v35 }
 0xa8b   :  { %6739 = vrsqrt.f32 %v2375_v8  ;;  %v2274_v30 = vpop.xlane.xlu1 %2273  ;;  %v2329_v9 = vmul.f32 %v8252_v60, %v8252_v60  ;;  %v2362_v8 = vsub.f32 %v8147_v26, %v8250_v35 }
 0xa8c   :  { %v2314_v2 = vmul.f32 0.03125, %v2274_v30  ;;  %v2271_v36 = vpop.xlane.xlu0 %2270 }
 0xa8d   :  { %v2313_v22 = vmul.f32 0.03125, %v2271_v36  ;;  %v2361_v36 = vsub.f32 %v8150_v25, %v8252_v60 }
 0xa8e   :  { %v2346_v34 = vsub.f32 %v2314_v2, %v2330_v38 }
 0xa8f   :  { %v2345_v57 = vsub.f32 %v2313_v22, %v2329_v9  ;;  %v2200_v42 = vpop.xlane.xlu1 %2199 }
 0xa90   :  { %v2378_v7 = vadd.f32 1e-05, %v2346_v34  ;;  %v8258_v46 = vmul.f32 0.03125, %v2200_v42  ;;  %v2197_v58 = vpop.xlane.xlu0 %2196 }
 0xa91   :  { %v2377_v43 = vadd.f32 1e-05, %v2345_v57  ;;  %v8260_v31 = vmul.f32 0.03125, %v2197_v58 }
 0xa92   :  { %6741 = vrsqrt.f32 %v2378_v7  ;;  %v2332_v18 = vmul.f32 %v8258_v46, %v8258_v46  ;;  %v8298_v7 = vpack.c.bf16 %v7573_v16, %v7576_v61 }
 0xa93   :  { %6743 = vrsqrt.f32 %v2377_v43  ;;  %v2280_v12 = vpop.xlane.xlu1 %2279  ;;  %v2331_v59 = vmul.f32 %v8260_v31, %v8260_v31 }
 0xa94   :  { %v6738_v15 = vpop.eup %6737  ;;  %v2316_v13 = vmul.f32 0.03125, %v2280_v12  ;;  %v2277_v53 = vpop.xlane.xlu0 %2276 }
 0xa95   :  { %v6740_v51 = vpop.eup %6739  ;;  %v2408_v19 = vmul.f32 %v6738_v15, %v2360_v10  ;;  %v2315_v41 = vmul.f32 0.03125, %v2277_v53 }
 0xa96   :  { %v2348_v50 = vsub.f32 %v2316_v13, %v2332_v18  ;;  %v2407_v0 = vmul.f32 %v6740_v51, %v2359_v49 }
 0xa97   :  { %v2428_v6 = vmul.f32 %v8267_v63, %v2408_v19  ;;  %v2347_v24 = vsub.f32 %v2315_v41, %v2331_v59  ;;  %v2206_v27 = vpop.xlane.xlu1 %2205  ;;  %v2364_v41 = vsub.f32 %v8161_v39, %v8258_v46 }
 0xa98   :  { %v2380_v17 = vadd.f32 1e-05, %v2348_v50  ;;  %v8279_v33 = vmul.f32 0.03125, %v2206_v27  ;;  %v2203_v55 = vpop.xlane.xlu0 %2202  ;;  %v2427_v29 = vmul.f32 %v8267_v63, %v2407_v0 }
 0xa99   :  { %v2379_v37 = vadd.f32 1e-05, %v2347_v24  ;;  %v8282_v62 = vmul.f32 0.03125, %v2203_v55  ;;  %v2448_v38 = vadd.f32 %v8277_v52, %v2428_v6  ;;  %v2363_v24 = vsub.f32 %v8164_v14, %v8260_v31 }
 0xa9a   :  { %6745 = vrsqrt.f32 %v2380_v17  ;;  %v2447_v21 = vadd.f32 %v8277_v52, %v2427_v29  ;;  %v2334_v9 = vmul.f32 %v8279_v33, %v8279_v33 }
 0xa9b   :  { %6747 = vrsqrt.f32 %v2379_v37  ;;  %v2286_v30 = vpop.xlane.xlu1 %2285  ;;  %v2333_v42 = vmul.f32 %v8282_v62, %v8282_v62 }
 0xa9c   :  { %v6742_v2 = vpop.eup %6741  ;;  %v2318_v22 = vmul.f32 0.03125, %v2286_v30  ;;  %5748 = vmatprep.mubr.msk.f32.mxu0 %vm106_vm0, %v2447_v21  ;;  %v2283_v34 = vpop.xlane.xlu0 %2282 }
 0xa9d   :  { %v6744_v57 = vpop.eup %6743  ;;  %v2317_v35 = vmul.f32 0.03125, %v2283_v34  ;;  %5749 = vmatmul.mubr.msk.f32.vlgmr.msra.gmra.mrb[24].mxu0 %vm106_vm0, %v2448_v38  ;;  %v2410_v58 = vmul.f32 %v6742_v2, %v2362_v8 }
 0xa9e   :  { %v2350_v60 = vsub.f32 %v2318_v22, %v2334_v9  ;;  %6337 = vmatpush3.bf16.xpose.msk.msra.mxu0 %vm7521_vm1, %v7746_v48  ;;  %v2409_v43 = vmul.f32 %v6744_v57, %v2361_v36 }
 0xa9f   :  { %v2349_v10 = vsub.f32 %v2317_v35, %v2333_v42  ;;  %6340 = vmatprep.subr.msk.bf16.mxu0 %vm7521_vm1, %v8298_v7  ;;  %v2212_v12 = vpop.xlane.xlu1 %2211  ;;  %v2430_v15 = vmul.f32 %v8267_v63, %v2410_v58  ;;  %v2366_v58 = vsub.f32 %v8175_v4, %v8279_v33 }
 0xaa0   :  { %v2382_v49 = vadd.f32 1e-05, %v2350_v60  ;;  %v8307_v18 = vmul.f32 0.03125, %v2212_v12  ;;  %v2209_v13 = vpop.xlane.xlu0 %2208  ;;  %v2429_v53 = vmul.f32 %v8267_v63, %v2409_v43  ;;  %v2365_v12 = vsub.f32 %v8178_v45, %v8282_v62 }
 0xaa1   :  { %v2381_v51 = vadd.f32 1e-05, %v2349_v10  ;;  %v8310_v19 = vmul.f32 0.03125, %v2209_v13  ;;  %v2450_v0 = vadd.f32 %v8277_v52, %v2430_v15 }
 0xaa2   :  { %6749 = vrsqrt.f32 %v2382_v49  ;;  %v2449_v59 = vadd.f32 %v8277_v52, %v2429_v53  ;;  %v2336_v27 = vmul.f32 %v8307_v18, %v8307_v18 }
 0xaa3   :  { %6751 = vrsqrt.f32 %v2381_v51  ;;  %v2292_v50 = vpop.xlane.xlu1 %2291  ;;  %v2335_v37 = vmul.f32 %v8310_v19, %v8310_v19 }
 0xaa4   :  { %v6746_v6 = vpop.eup %6745  ;;  %v2320_v17 = vmul.f32 0.03125, %v2292_v50  ;;  %5751 = vmatprep.mubr.msk.f32.mxu0 %vm106_vm0, %v2449_v59  ;;  %v2289_v55 = vpop.xlane.xlu0 %2288 }
 0xaa5   :  { %v6748_v29 = vpop.eup %6747  ;;  %v2319_v46 = vmul.f32 0.03125, %v2289_v55  ;;  %5752 = vmatmul.mubr.msk.f32.gmra.mrb[26].mxu0 %vm106_vm0, %v2450_v0  ;;  %v2412_v21 = vmul.f32 %v6746_v6, %v2364_v41 }
 0xaa6   :  { %v2352_v8 = vsub.f32 %v2320_v17, %v2336_v27  ;;  %6343 = vmatpush3.bf16.xpose.msk.msra.mxu0 %vm7521_vm1, %v8298_v7  ;;  %v2411_v31 = vmul.f32 %v6748_v29, %v2363_v24 }
 0xaa7   :  { %v2351_v30 = vsub.f32 %v2319_v46, %v2335_v37  ;;  %6345 = vmatprep.subr.bf16.mxu0 %v7746_v48  ;;  %v2218_v38 = vpop.xlane.xlu1 %2217  ;;  %v2432_v2 = vmul.f32 %v8267_v63, %v2412_v21  ;;  %v2368_v21 = vsub.f32 %v8191_v23, %v8307_v18 }
 0xaa8   :  { %v2384_v36 = vadd.f32 1e-05, %v2352_v8  ;;  %v8329_v9 = vmul.f32 0.03125, %v2218_v38  ;;  %v2215_v22 = vpop.xlane.xlu0 %2214  ;;  %v2431_v34 = vmul.f32 %v8267_v63, %v2411_v31  ;;  %v2367_v38 = vsub.f32 %v8194_v32, %v8310_v19 }
 0xaa9   :  { %v2383_v57 = vadd.f32 1e-05, %v2351_v30  ;;  %v8332_v42 = vmul.f32 0.03125, %v2215_v22  ;;  %v2452_v43 = vadd.f32 %v8277_v52, %v2432_v2 }
 0xaaa   :  { %6753 = vrsqrt.f32 %v2384_v36  ;;  %v2451_v35 = vadd.f32 %v8277_v52, %v2431_v34  ;;  %v2338_v15 = vmul.f32 %v8329_v9, %v8329_v9 }
 0xaab   :  { %6755 = vrsqrt.f32 %v2383_v57  ;;  %v2298_v60 = vpop.xlane.xlu1 %2297  ;;  %v2337_v51 = vmul.f32 %v8332_v42, %v8332_v42 }
 0xaac   :  { %v6750_v10 = vpop.eup %6749  ;;  %v2322_v49 = vmul.f32 0.03125, %v2298_v60  ;;  %5754 = vmatprep.mubr.msk.f32.mxu0 %vm106_vm0, %v2451_v35  ;;  %v2295_v13 = vpop.xlane.xlu0 %2294 }
 0xaad   :  { %v6752_v53 = vpop.eup %6751  ;;  %v2321_v33 = vmul.f32 0.03125, %v2295_v13  ;;  %5755 = vmatmul.mubr.msk.f32.gmra.mrb[28].mxu0 %vm106_vm0, %v2452_v43  ;;  %v2414_v59 = vmul.f32 %v6750_v10, %v2366_v58 }
 0xaae   :  { %v2354_v41 = vsub.f32 %v2322_v49, %v2338_v15  ;;  %v2413_v50 = vmul.f32 %v6752_v53, %v2365_v12 }
 0xaaf   :  { %v2353_v0 = vsub.f32 %v2321_v33, %v2337_v51  ;;  %v2224_v6 = vpop.xlane.xlu1 %2223  ;;  %v2434_v62 = vmul.f32 %v8267_v63, %v2414_v59  ;;  %v2370_v59 = vsub.f32 %v8205_v3, %v8329_v9 }
 0xab0   :  { %v2386_v24 = vadd.f32 1e-05, %v2354_v41  ;;  %v8347_v27 = vmul.f32 0.03125, %v2224_v6  ;;  %v2221_v17 = vpop.xlane.xlu0 %2220  ;;  %v2433_v55 = vmul.f32 %v8267_v63, %v2413_v50  ;;  %v2369_v6 = vsub.f32 %v8208_v20, %v8332_v42 }
 0xab1   :  { %v2385_v29 = vadd.f32 1e-05, %v2353_v0  ;;  %v8350_v37 = vmul.f32 0.03125, %v2221_v17  ;;  %v2454_v31 = vadd.f32 %v8277_v52, %v2434_v62 }
 0xab2   :  { %6757 = vrsqrt.f32 %v2386_v24  ;;  %v2453_v46 = vadd.f32 %v8277_v52, %v2433_v55  ;;  %v2340_v2 = vmul.f32 %v8347_v27, %v8347_v27 }
 0xab3   :  { %6759 = vrsqrt.f32 %v2385_v29  ;;  %v2304_v8 = vpop.xlane.xlu1 %2303  ;;  %v2339_v57 = vmul.f32 %v8350_v37, %v8350_v37 }
 0xab4   :  { %v6754_v30 = vpop.eup %6753  ;;  %v2324_v36 = vmul.f32 0.03125, %v2304_v8  ;;  %5757 = vmatprep.mubr.msk.f32.mxu0 %vm106_vm0, %v2453_v46  ;;  %v2301_v22 = vpop.xlane.xlu0 %2300 }
 0xab5   :  { %v6756_v34 = vpop.eup %6755  ;;  %v2323_v18 = vmul.f32 0.03125, %v2301_v22  ;;  %5758 = vmatmul.mubr.msk.f32.gmra.mrb[30].mxu0 %vm106_vm0, %v2454_v31  ;;  %v2416_v35 = vmul.f32 %v6754_v30, %v2368_v21  ;;  %v2372_v22 = vsub.f32 %v8219_v28, %v8347_v27 }
 0xab6   :  { %v2356_v58 = vsub.f32 %v2324_v36, %v2340_v2  ;;  %v2415_v60 = vmul.f32 %v6756_v34, %v2367_v38 }
 0xab7   :  { %v2355_v43 = vsub.f32 %v2323_v18, %v2339_v57  ;;  %v2230_v10 = vpop.xlane.xlu1 %2229  ;;  %v2436_v19 = vmul.f32 %v8267_v63, %v2416_v35  ;;  %v2371_v18 = vsub.f32 %v8222_v56, %v8350_v37 }
 0xab8   :  { %v2388_v12 = vadd.f32 1e-05, %v2356_v58  ;;  %v2246_v15 = vmul.f32 0.03125, %v2230_v10  ;;  %v2227_v49 = vpop.xlane.xlu0 %2226  ;;  %v2435_v13 = vmul.f32 %v8267_v63, %v2415_v60 }
 0xab9   :  { %v2387_v53 = vadd.f32 1e-05, %v2355_v43  ;;  %v2245_v51 = vmul.f32 0.03125, %v2227_v49  ;;  %v2456_v50 = vadd.f32 %v8277_v52, %v2436_v19 }
 0xaba   :  { %6761 = vrsqrt.f32 %v2388_v12  ;;  %v2455_v33 = vadd.f32 %v8277_v52, %v2435_v13  ;;  %v2342_v62 = vmul.f32 %v2246_v15, %v2246_v15  ;;  %v2374_v19 = vsub.f32 %v8234_v11, %v2246_v15 }
 0xabb   :  { %6763 = vrsqrt.f32 %v2387_v53  ;;  %v2310_v41 = vpop.xlane.xlu1 %2309  ;;  %v2341_v29 = vmul.f32 %v2245_v51, %v2245_v51  ;;  %v2373_v37 = vsub.f32 %v8237_v44, %v2245_v51  ;;  %v2669_v51 = vmul.f32 0.17677669, %v7561_v54 }
 0xabc   :  { %v6758_v0 = vpop.eup %6757  ;;  %v2326_v24 = vmul.f32 0.03125, %v2310_v41  ;;  %5760 = vmatprep.mubr.msk.f32.mxu0 %vm106_vm0, %v2455_v33  ;;  %v2307_v17 = vpop.xlane.xlu0 %2306 }
 0xabd   :  { %v6760_v55 = vpop.eup %6759  ;;  %v2325_v46 = vmul.f32 0.03125, %v2307_v17  ;;  %5761 = vmatmul.mubr.msk.f32.gmra.mrb[32].mxu0 %vm106_vm0, %v2456_v50  ;;  %v2418_v21 = vmul.f32 %v6758_v0, %v2370_v59  ;;  %v8402_v0 = vmul.f32 0.17677669, %v7576_v61 }
 0xabe   :  { %v2358_v9 = vsub.f32 %v2326_v24, %v2342_v62  ;;  %v2417_v8 = vmul.f32 %v6760_v55, %v2369_v6 }
 0xabf   :  { %v2357_v31 = vsub.f32 %v2325_v46, %v2341_v29  ;;  %v2438_v30 = vmul.f32 %v8267_v63, %v2418_v21 }
 0xac0   :  { %v2390_v38 = vadd.f32 1e-05, %v2358_v9  ;;  %v2437_v2 = vmul.f32 %v8267_v63, %v2417_v8 }
 0xac1   :  { %v2389_v42 = vadd.f32 1e-05, %v2357_v31  ;;  %v2458_v34 = vadd.f32 %v8277_v52, %v2438_v30 }
 0xac2   :  { %6765 = vrsqrt.f32 %v2390_v38  ;;  %v2457_v36 = vadd.f32 %v8277_v52, %v2437_v2 }
 0xac3   :  { %6767 = vrsqrt.f32 %v2389_v42 }
 0xac4   :  { %v6762_v57 = vpop.eup %6761  ;;  %5763 = vmatprep.mubr.msk.f32.mxu0 %vm106_vm0, %v2457_v36 }
 0xac5   :  { %v6764_v35 = vpop.eup %6763  ;;  %5764 = vmatmul.mubr.msk.f32.gmra.mrb[34].mxu0 %vm106_vm0, %v2458_v34  ;;  %v2420_v58 = vmul.f32 %v6762_v57, %v2372_v22  ;;  %v2664_v34 = vld [vmem:[%s9296_s6] sm:$0xff] }
 0xac6   :  { %v2419_v60 = vmul.f32 %v6764_v35, %v2371_v18  ;;  %v2665_v18 = vld [vmem:[%s9296_s6 + $0x8] sm:$0xff] }
 0xac7   :  { %v2440_v43 = vmul.f32 %v8267_v63, %v2420_v58 }
 0xac8   :  { %v2439_v10 = vmul.f32 %v8267_v63, %v2419_v60 }
 0xac9   :  { %v2460_v12 = vadd.f32 %v8277_v52, %v2440_v43 }
 0xaca   :  { %v2459_v27 = vadd.f32 %v8277_v52, %v2439_v10 }
 0xacc   :  { %v6766_v49 = vpop.eup %6765  ;;  %5766 = vmatprep.mubr.msk.f32.mxu0 %vm106_vm0, %v2459_v27 }
 0xacd   :  { %v6768_v13 = vpop.eup %6767  ;;  %5767 = vmatmul.mubr.msk.f32.gmra.mrb[36].mxu0 %vm106_vm0, %v2460_v12  ;;  %v2422_v53 = vmul.f32 %v6766_v49, %v2374_v19  ;;  %v2666_v19 = vld [vmem:[%s9296_s6 + $0x10] sm:$0xff] }
 0xace   :  { %v2421_v33 = vmul.f32 %v6768_v13, %v2373_v37  ;;  %v2667_v37 = vld [vmem:[%s9296_s6 + $0x18] sm:$0xff] }
 0xacf   :  { %v2442_v59 = vmul.f32 %v8267_v63, %v2422_v53 }
 0xad0   :  { %v2441_v41 = vmul.f32 %v8267_v63, %v2421_v33  ;;  %v2671_v63 = vmul.f32 0.17677669, %v7573_v16 }
 0xad1   :  { %v2462_v15 = vadd.f32 %v8277_v52, %v2442_v59  ;;  %v2660_v59 = vld [vmem:[%s9295_s5] sm:$0xff] }
 0xad2   :  { %v2461_v50 = vadd.f32 %v8277_v52, %v2441_v41 }
 0xad4   :  { %5769 = vmatprep.mubr.msk.f32.mxu0 %vm106_vm0, %v2461_v50 }
 0xad5   :  { %5770 = vmatmul.mubr.msk.f32.gmra.mrb[38].mxu0 %vm106_vm0, %v2462_v15 }
 0xad6   :  { %5818 = vmatprep.mubr.msk.f32.mxu0 %vm106_vm0, %v8130_v47 }
 0xad9   :  { %5819 = vmatmul.mubr.msk.f32.vlgmr.msra.gmra.mrb[40].mxu0 %vm106_vm0, %v2669_v51 }
 0xada   :  { %6347 = vmatpush3.bf16.msra.mxu0 %v7746_v48  ;;  %5821 = vmatprep.mubr.msk.f32.mxu0 %vm106_vm0, %v8402_v0 }
 0xadb   :  { %6349 = vmatprep.subr.bf16.mxu0 %v8298_v7 }
 0xadd   :  { %5822 = vmatmul.mubr.msk.f32.gmra.mrb[42].mxu0 %vm106_vm0, %v2671_v63 }
 0xade   :  { %6351 = vmatpush3.bf16.msra.mxu0 %v8298_v7 }
 0xb70   :  { %v5750_v47 = vpop.f32.mrb[24].mxu0 }
 0xb71   :  { %v2581_v54 = vpop.f32.mrb[25].mxu0 }
 0xb72   :  { %v8412_v52 = vpack.c.bf16 %v5750_v47, %v2581_v54  ;;  %v2662_v54 = vld [vmem:[%s9295_s5 + $0x10] sm:$0xff] }
 0xb74   :  { %6286 = vmatprep.subr.msk.bf16.mxu1 %vm7521_vm1, %v8412_v52  ;;  %6353 = vmatprep.subr.bf16.mxu0 %v8412_v52 }
 0xb75   :  { %6289 = vmatpush3.bf16.xpose.msk.msra.mxu1 %vm7521_vm1, %v8412_v52 }
 0xb78   :  { %v5753_v61 = vpop.f32.mrb[26].mxu0 }
 0xb79   :  { %v2591_v16 = vpop.f32.mrb[27].mxu0 }
 0xb7a   :  { %v8421_v48 = vpack.c.bf16 %v5753_v61, %v2591_v16  ;;  %v2663_v16 = vld [vmem:[%s9295_s5 + $0x18] sm:$0xff] }
 0xb7c   :  { %6292 = vmatprep.subr.msk.bf16.mxu1 %vm7521_vm1, %v8421_v48 }
 0xb7d   :  { %6295 = vmatpush3.bf16.xpose.msk.msra.mxu1 %vm7521_vm1, %v8421_v48 }
 0xb80   :  { %v5756_v7 = vpop.f32.mrb[28].mxu0 }
 0xb81   :  { %v2601_v6 = vpop.f32.mrb[29].mxu0 }
 0xb82   :  { %v8429_v62 = vpack.c.bf16 %v5756_v7, %v2601_v6 }
 0xb84   :  { %6298 = vmatprep.subr.msk.bf16.mxu1 %vm7521_vm1, %v8429_v62 }
 0xb85   :  { %6301 = vmatpush3.bf16.xpose.msk.msra.mxu1 %vm7521_vm1, %v8429_v62 }
 0xb88   :  { %v5759_v24 = vpop.f32.mrb[30].mxu0 }
 0xb89   :  { %v2611_v17 = vpop.f32.mrb[31].mxu0 }
 0xb8a   :  { %v8437_v55 = vpack.c.bf16 %v5759_v24, %v2611_v17 }
 0xb8c   :  { %6304 = vmatprep.subr.msk.bf16.mxu1 %vm7521_vm1, %v8437_v55 }
 0xb8d   :  { %6307 = vmatpush3.bf16.xpose.msk.msra.mxu1 %vm7521_vm1, %v8437_v55 }
 0xb90   :  { %v5762_v29 = vpop.f32.mrb[32].mxu0 }
 0xb91   :  { %v2621_v46 = vpop.f32.mrb[33].mxu0 }
 0xb92   :  { %v8445_v21 = vpack.c.bf16 %v5762_v29, %v2621_v46 }
 0xb94   :  { %6310 = vmatprep.subr.msk.bf16.mxu1 %vm7521_vm1, %v8445_v21 }
 0xb95   :  { %6313 = vmatpush3.bf16.xpose.msk.msra.mxu1 %vm7521_vm1, %v8445_v21 }
 0xb98   :  { %v5765_v9 = vpop.f32.mrb[34].mxu0 }
 0xb99   :  { %v2631_v8 = vpop.f32.mrb[35].mxu0 }
 0xb9a   :  { %v8453_v31 = vpack.c.bf16 %v5765_v9, %v2631_v8 }
 0xb9c   :  { %6316 = vmatprep.subr.msk.bf16.mxu1 %vm7521_vm1, %v8453_v31 }
 0xb9d   :  { %6319 = vmatpush3.bf16.xpose.msk.msra.mxu1 %vm7521_vm1, %v8453_v31 }
 0xba0   :  { %v5768_v30 = vpop.f32.mrb[36].mxu0 }
 0xba1   :  { %v2641_v38 = vpop.f32.mrb[37].mxu0 }
 0xba2   :  { %v8461_v2 = vpack.c.bf16 %v5768_v30, %v2641_v38 }
 0xba4   :  { %6322 = vmatprep.subr.msk.bf16.mxu1 %vm7521_vm1, %v8461_v2 }
 0xba5   :  { %6325 = vmatpush3.bf16.xpose.msk.msra.mxu1 %vm7521_vm1, %v8461_v2 }
 0xba8   :  { %v5771_v42 = vpop.f32.mrb[38].mxu0 }
 0xba9   :  { %v2651_v36 = vpop.f32.mrb[39].mxu0 }
 0xbaa   :  { %v8469_v22 = vpack.c.bf16 %v5771_v42, %v2651_v36 }
 0xbac   :  { %6328 = vmatprep.subr.msk.bf16.mxu1 %vm7521_vm1, %v8469_v22  ;;  %v5820_v57 = vpop.f32.mrb[40].mxu0 }
 0xbad   :  { %6331 = vmatpush3.bf16.xpose.msk.msra.mxu1 %vm7521_vm1, %v8469_v22  ;;  %v2895_v35 = vpop.f32.mrb[41].mxu0  ;;  %v2901_v60 = vadd.f32 %v5820_v57, %v2665_v18 }
 0xbae   :  { %v2896_v58 = vadd.f32 %v2895_v35, %v2664_v34 }
 0xbaf   :  { %v2925_v49 = vsel %vm106_vm0, %v2901_v60, -inf }
 0xbb0   :  { %v5823_v43 = vpop.f32.mrb[42].mxu0  ;;  %v2922_v10 = vsel %vm106_vm0, %v2896_v58, -inf }
 0xbb1   :  { %v2905_v27 = vpop.f32.mrb[43].mxu0  ;;  %2923 = vmax.xlane.f32.xlu1 %v2922_v10  ;;  %v2911_v13 = vadd.f32 %v5823_v43, %v2667_v37 }
 0xbb2   :  { %v2906_v12 = vadd.f32 %v2905_v27, %v2666_v19 }
 0xbb3   :  { %v2931_v33 = vsel %vm106_vm0, %v2911_v13, -inf }
 0xbb4   :  { %5805 = vmatmul.mubr.msk.f32.vlgmr.msra.gmra.mrb[44].mxu1 %vm106_vm0, %v2669_v51  ;;  %v2928_v53 = vsel %vm106_vm0, %v2906_v12, -inf  ;;  %v2661_v51 = vld [vmem:[%s9295_s5 + $0x8] sm:$0xff] }
 0xbb5   :  { %2926 = vmax.xlane.f32.xlu1 %v2925_v49  ;;  %5807 = vmatprep.mubr.msk.f32.mxu1 %vm106_vm0, %v8402_v0 }
 0xbb8   :  { %5808 = vmatmul.mubr.msk.f32.gmra.mrb[46].mxu1 %vm106_vm0, %v2671_v63 }
 0xbb9   :  { %2929 = vmax.xlane.f32.xlu1 %v2928_v53 }
 0xbbd   :  { %2932 = vmax.xlane.f32.xlu1 %v2931_v33 }
 0xc3e   :  { %v2924_v6 = vpop.xlane.xlu1 %2923 }
 0xc42   :  { %v2927_v24 = vpop.xlane.xlu1 %2926 }
 0xc46   :  { %v2930_v36 = vpop.xlane.xlu1 %2929 }
 0xc4a   :  { %v2933_v49 = vpop.xlane.xlu1 %2932 }
 0xc87   :  { %v5806_v41 = vpop.f32.mrb[44].mxu1 }
 0xc88   :  { %v2798_v50 = vpop.f32.mrb[45].mxu1  ;;  %v2804_v47 = vadd.f32 %v5806_v41, %v2661_v51 }
 0xc89   :  { %v2799_v15 = vadd.f32 %v2798_v50, %v2660_v59 }
 0xc8b   :  { %v5809_v0 = vpop.f32.mrb[46].mxu1  ;;  %2914 = vmax.xlane.f32.xlu0 %v2799_v15 }
 0xc8c   :  { %v2808_v63 = vpop.f32.mrb[47].mxu1  ;;  %v2814_v7 = vadd.f32 %v5809_v0, %v2663_v16 }
 0xc8d   :  { %v2809_v61 = vadd.f32 %v2808_v63, %v2662_v54 }
 0xc8f   :  { %2916 = vmax.xlane.f32.xlu0 %v2804_v47 }
 0xc93   :  { %2918 = vmax.xlane.f32.xlu0 %v2809_v61 }
 0xc97   :  { %2920 = vmax.xlane.f32.xlu0 %v2814_v7 }
 0xd18   :  { %v2915_v17 = vpop.xlane.xlu0 %2914 }
 0xd19   :  { %v2934_v29 = vmax.f32 %v2915_v17, %v2924_v6  ;;  %v3672_v6 = vld [vmem:[#allocation6 + $0x8] sm:$0xff]  ;;  %v3674_v17 = vld [vmem:[#allocation6 + $0x18] sm:$0xff] }
 0xd1b   :  { %v2938_v46 = vsub.f32 %v2799_v15, %v2934_v29  ;;  %v2950_v9 = vsub.f32 %v2896_v58, %v2934_v29 }
 0xd1c   :  { %v2917_v8 = vpop.xlane.xlu0 %2916 }
 0xd1d   :  { %v2942_v30 = vmul.f32 1.442695, %v2938_v46  ;;  %v2954_v38 = vmul.f32 1.442695, %v2950_v9  ;;  %v2935_v42 = vmax.f32 %v2917_v8, %v2927_v24  ;;  %v3673_v24 = vld [vmem:[#allocation6 + $0x10] sm:$0xff] }
 0xd1f   :  { %6769 = vpow2.f32 %v2942_v30  ;;  %v2939_v34 = vsub.f32 %v2804_v47, %v2935_v42  ;;  %v2951_v57 = vsub.f32 %v2901_v60, %v2935_v42 }
 0xd20   :  { %6771 = vpow2.f32 %v2954_v38  ;;  %v2919_v18 = vpop.xlane.xlu0 %2918 }
 0xd21   :  { %v2944_v35 = vmul.f32 1.442695, %v2939_v34  ;;  %v2956_v43 = vmul.f32 1.442695, %v2951_v57  ;;  %v2936_v10 = vmax.f32 %v2919_v18, %v2930_v36 }
 0xd23   :  { %6773 = vpow2.f32 %v2944_v35  ;;  %v2940_v27 = vsub.f32 %v2809_v61, %v2936_v10  ;;  %v2952_v19 = vsub.f32 %v2906_v12, %v2936_v10 }
 0xd24   :  { %6775 = vpow2.f32 %v2956_v43  ;;  %v2921_v37 = vpop.xlane.xlu0 %2920 }
 0xd25   :  { %v2946_v58 = vmul.f32 1.442695, %v2940_v27  ;;  %v2958_v53 = vmul.f32 1.442695, %v2952_v19  ;;  %v2937_v33 = vmax.f32 %v2921_v37, %v2933_v49 }
 0xd27   :  { %6777 = vpow2.f32 %v2946_v58  ;;  %v2941_v59 = vsub.f32 %v2814_v7, %v2937_v33  ;;  %v2953_v41 = vsub.f32 %v2911_v13, %v2937_v33 }
 0xd28   :  { %6779 = vpow2.f32 %v2958_v53 }
 0xd29   :  { %v6770_v50 = vpop.eup %6769  ;;  %v2948_v60 = vmul.f32 1.442695, %v2941_v59  ;;  %v2960_v15 = vmul.f32 1.442695, %v2953_v41 }
 0xd2a   :  { %v6772_v51 = vpop.eup %6771  ;;  %2962 = vadd.xlane.f32.xlu0 %v6770_v50 }
 0xd2b   :  { %6781 = vpow2.f32 %v2948_v60  ;;  %5832 = vmatprep.mubr.msk.f32.mxu0 %vm106_vm0, %v6772_v51  ;;  %v2970_v12 = vsel %vm106_vm0, %v6772_v51, 0.0 }
 0xd2c   :  { %6783 = vpow2.f32 %v2960_v15  ;;  %2971 = vadd.xlane.f32.xlu1 %v2970_v12 }
 0xd2d   :  { %v6774_v0 = vpop.eup %6773 }
 0xd2e   :  { %v6776_v63 = vpop.eup %6775  ;;  %2964 = vadd.xlane.f32.xlu0 %v6774_v0 }
 0xd2f   :  { %5833 = vmatmul.mubr.msk.f32.vlgmr.msra.gmra.mrb[44].mxu0 %vm106_vm0, %v6776_v63  ;;  %v2973_v13 = vsel %vm106_vm0, %v6776_v63, 0.0 }
 0xd30   :  { %6355 = vmatpush3.bf16.msra.mxu0 %v8412_v52  ;;  %2974 = vadd.xlane.f32.xlu1 %v2973_v13 }
 0xd31   :  { %v6778_v47 = vpop.eup %6777  ;;  %6357 = vmatprep.subr.bf16.mxu0 %v8421_v48 }
 0xd32   :  { %v6780_v54 = vpop.eup %6779  ;;  %2966 = vadd.xlane.f32.xlu0 %v6778_v47 }
 0xd33   :  { %5835 = vmatprep.mubr.msk.f32.mxu0 %vm106_vm0, %v6780_v54  ;;  %v2976_v61 = vsel %vm106_vm0, %v6780_v54, 0.0 }
 0xd34   :  { %6359 = vmatpush3.bf16.msra.mxu0 %v8421_v48  ;;  %2977 = vadd.xlane.f32.xlu1 %v2976_v61  ;;  %v3671_v48 = vld [vmem:[#allocation6] sm:$0xff] }
 0xd35   :  { %v6782_v16 = vpop.eup %6781  ;;  %6361 = vmatprep.subr.bf16.mxu0 %v8429_v62  ;;  %v3254_v61 = vld [vmem:[#allocation4] sm:$0xff] }
 0xd36   :  { %v6784_v7 = vpop.eup %6783  ;;  %2968 = vadd.xlane.f32.xlu0 %v6782_v16 }
 0xd37   :  { %5836 = vmatmul.mubr.msk.f32.gmra.mrb[46].mxu0 %vm106_vm0, %v6784_v7  ;;  %v2979_v52 = vsel %vm106_vm0, %v6784_v7, 0.0 }
 0xd38   :  { %6363 = vmatpush3.bf16.msra.mxu0 %v8429_v62  ;;  %5870 = vmatprep.mubr.f32.mxu0 %v6770_v50  ;;  %v6412_v62 = vpack.c.bf16 %v3672_v6, %v3671_v48  ;;  %v3257_v48 = vld [vmem:[#allocation4 + $0x18] sm:$0xff] }
 0xd39   :  { %6365 = vmatprep.subr.bf16.mxu0 %v8437_v55  ;;  %2980 = vadd.xlane.f32.xlu1 %v2979_v52  ;;  %v3256_v52 = vld [vmem:[#allocation4 + $0x10] sm:$0xff] }
 0xd3a   :  { %v6388_v6 = vpack.c.bf16 %v3257_v48, %v3256_v52 }
 0xd3c   :  { %6367 = vmatpush3.bf16.msra.mxu0 %v8437_v55  ;;  %v6416_v55 = vpack.c.bf16 %v3674_v17, %v3673_v24 }
 0xd3d   :  { %6369 = vmatprep.subr.bf16.mxu0 %v8445_v21 }
 0xd40   :  { %6371 = vmatpush3.bf16.msra.mxu0 %v8445_v21  ;;  %v8534_v21 = vpack.c.bf16 %v8135_v5, %v8137_v40 }
 0xd41   :  { %6373 = vmatprep.subr.bf16.mxu0 %v8453_v31 }
 0xd44   :  { %6375 = vmatpush3.bf16.msra.mxu0 %v8453_v31 }
 0xd45   :  { %6377 = vmatprep.subr.bf16.mxu0 %v8461_v2 }
 0xd48   :  { %6379 = vmatpush3.bf16.msra.mxu0 %v8461_v2 }
 0xd49   :  { %6381 = vmatprep.subr.bf16.mxu0 %v8469_v22 }
 0xd4c   :  { %6383 = vmatpush3.bf16.msra.mxu0 %v8469_v22 }
 0xd4d   :  { %6413 = vmatprep.subr.bf16.mxu0 %v6412_v62 }
 0xd4f   :  { %5871 = vmatmul.mubr.f32.vlgmr.msra.gmra.mrb[44].mxu0 %v6774_v0 }
 0xd50   :  { %5873 = vmatprep.mubr.f32.mxu0 %v6778_v47  ;;  %6415 = vmatpush3.bf16.msra.mxu0 %v6412_v62 }
 0xd51   :  { %6417 = vmatprep.subr.bf16.mxu0 %v6416_v55 }
 0xd53   :  { %5874 = vmatmul.mubr.f32.gmra.mrb[46].mxu0 %v6782_v16  ;;  %v3255_v16 = vld [vmem:[#allocation4 + $0x8] sm:$0xff] }
 0xd54   :  { %6419 = vmatpush3.bf16.msra.mxu0 %v6416_v55  ;;  %v6384_v7 = vpack.c.bf16 %v3255_v16, %v3254_v61 }
 0xd55   :  { %6434 = vmatprep.subr.msk.bf16.mxu0 %vm7521_vm1, %v8534_v21 }
 0xd56   :  { %6385 = vmatprep.subr.bf16.mxu1 %v6384_v7 }
 0xd57   :  { %6387 = vmatpush3.bf16.msra.mxu1 %v6384_v7 }
 0xd58   :  { %6389 = vmatprep.subr.bf16.mxu1 %v6388_v6 }
 0xd5b   :  { %6391 = vmatpush3.bf16.msra.mxu1 %v6388_v6 }
 0xdb7   :  { %v2963_v31 = vpop.xlane.xlu0 %2962 }
 0xdb9   :  { %v2972_v2 = vpop.xlane.xlu1 %2971 }
 0xdba   :  { %v2982_v30 = vadd.f32 %v2972_v2, %v2963_v31 }
 0xdbb   :  { %v2965_v29 = vpop.xlane.xlu0 %2964 }
 0xdbd   :  { %v2975_v22 = vpop.xlane.xlu1 %2974 }
 0xdbe   :  { %v2983_v8 = vadd.f32 %v2975_v22, %v2965_v29 }
 0xdbf   :  { %v2967_v46 = vpop.xlane.xlu0 %2966 }
 0xdc0   :  { %6785 = vrcp.f32 %v2983_v8 }
 0xdc1   :  { %v2978_v9 = vpop.xlane.xlu1 %2977  ;;  %6787 = vrcp.f32 %v2982_v30 }
 0xdc2   :  { %v2984_v34 = vadd.f32 %v2978_v9, %v2967_v46 }
 0xdc3   :  { %v2969_v38 = vpop.xlane.xlu0 %2968 }
 0xdc6   :  { %v2981_v42 = vpop.xlane.xlu1 %2980 }
 0xdc7   :  { %v2985_v36 = vadd.f32 %v2981_v42, %v2969_v38 }
 0xdc9   :  { %6789 = vrcp.f32 %v2985_v36 }
 0xdca   :  { %6791 = vrcp.f32 %v2984_v34  ;;  %v6786_v57 = vpop.eup %6785 }
 0xdcb   :  { %v6788_v35 = vpop.eup %6787 }
 0xdd3   :  { %v6790_v59 = vpop.eup %6789 }
 0xdd4   :  { %v6792_v41 = vpop.eup %6791 }
 0xe22   :  { %v5872_v18 = vpop.f32.mrb[44].mxu0 }
 0xe23   :  { %v8539_v43 = vmul.f32 %v6786_v57, %v5872_v18  ;;  %v3153_v10 = vpop.f32.mrb[45].mxu0 }
 0xe24   :  { %v8541_v27 = vmul.f32 %v6788_v35, %v3153_v10 }
 0xe25   :  { %v3181_v19 = vsel %vm106_vm0, %v8539_v43, 0.0  ;;  %v3195_v49 = vmul.f32 %v8539_v43, %v8539_v43 }
 0xe26   :  { %v5875_v37 = vpop.f32.mrb[46].mxu0  ;;  %3182 = vadd.xlane.f32.xlu1 %v3181_v19  ;;  %v3178_v58 = vsel %vm106_vm0, %v8541_v27, 0.0  ;;  %v3194_v53 = vmul.f32 %v8541_v27, %v8541_v27 }
 0xe27   :  { %v3163_v33 = vpop.f32.mrb[47].mxu0  ;;  %3179 = vadd.xlane.f32.xlu0 %v3178_v58  ;;  %v8551_v50 = vmul.f32 %v6790_v59, %v5875_v37  ;;  %v3201_v60 = vsel %vm106_vm0, %v3195_v49, 0.0 }
 0xe28   :  { %v8554_v15 = vmul.f32 %v6792_v41, %v3163_v33  ;;  %v3198_v51 = vsel %vm106_vm0, %v3194_v53, 0.0 }
 0xe29   :  { %v3187_v12 = vsel %vm106_vm0, %v8551_v50, 0.0  ;;  %v3197_v0 = vmul.f32 %v8551_v50, %v8551_v50 }
 0xe2a   :  { %3202 = vadd.xlane.f32.xlu1 %v3201_v60  ;;  %v3184_v63 = vsel %vm106_vm0, %v8554_v15, 0.0  ;;  %v3196_v13 = vmul.f32 %v8554_v15, %v8554_v15 }
 0xe2b   :  { %3199 = vadd.xlane.f32.xlu0 %v3198_v51  ;;  %v3207_v47 = vsel %vm106_vm0, %v3197_v0, 0.0  ;;  %v5010_v0 = vld [vmem:[%s9302_s12 + $0x4] ss:$0 sm:$0xff] }
 0xe2c   :  { %v3204_v54 = vsel %vm106_vm0, %v3196_v13, 0.0 }
 0xe2e   :  { %3188 = vadd.xlane.f32.xlu1 %v3187_v12 }
 0xe2f   :  { %3185 = vadd.xlane.f32.xlu0 %v3184_v63 }
 0xe32   :  { %3208 = vadd.xlane.f32.xlu1 %v3207_v47  ;;  %v5011_v47 = vld [vmem:[%s9303_s13 + $0x4] ss:$0 sm:$0xff] }
 0xe33   :  { %3205 = vadd.xlane.f32.xlu0 %v3204_v54 }
 0xeb3   :  { %v3183_v62 = vpop.xlane.xlu1 %3182 }
 0xeb4   :  { %v3191_v24 = vmul.f32 0.03125, %v3183_v62  ;;  %v3180_v17 = vpop.xlane.xlu0 %3179 }
 0xeb5   :  { %v3190_v55 = vmul.f32 0.03125, %v3180_v17 }
 0xeb6   :  { %v3215_v2 = vmul.f32 %v3191_v24, %v3191_v24  ;;  %v3223_v60 = vsub.f32 %v8539_v43, %v3191_v24 }
 0xeb7   :  { %v3203_v31 = vpop.xlane.xlu1 %3202  ;;  %v3214_v46 = vmul.f32 %v3190_v55, %v3190_v55  ;;  %v3222_v12 = vsub.f32 %v8541_v27, %v3190_v55 }
 0xeb8   :  { %v3211_v29 = vmul.f32 0.03125, %v3203_v31  ;;  %v3200_v22 = vpop.xlane.xlu0 %3199 }
 0xeb9   :  { %v3210_v9 = vmul.f32 0.03125, %v3200_v22 }
 0xeba   :  { %v3219_v8 = vsub.f32 %v3211_v29, %v3215_v2 }
 0xebb   :  { %v3218_v30 = vsub.f32 %v3210_v9, %v3214_v46  ;;  %v3189_v38 = vpop.xlane.xlu1 %3188 }
 0xebc   :  { %v3227_v42 = vadd.f32 1e-05, %v3219_v8  ;;  %v3193_v36 = vmul.f32 0.03125, %v3189_v38  ;;  %v3186_v34 = vpop.xlane.xlu0 %3185 }
 0xebd   :  { %v3226_v57 = vadd.f32 1e-05, %v3218_v30  ;;  %v3192_v18 = vmul.f32 0.03125, %v3186_v34 }
 0xebe   :  { %6793 = vrsqrt.f32 %v3227_v42  ;;  %v3217_v10 = vmul.f32 %v3193_v36, %v3193_v36  ;;  %v3225_v43 = vsub.f32 %v8551_v50, %v3193_v36  ;;  %v6937_v42 = vld [vmem:[%s9292_s2 + $0x8] sm:$0xff] }
 0xebf   :  { %6795 = vrsqrt.f32 %v3226_v57  ;;  %v3209_v35 = vpop.xlane.xlu1 %3208  ;;  %v3216_v37 = vmul.f32 %v3192_v18, %v3192_v18  ;;  %v3224_v27 = vsub.f32 %v8554_v15, %v3192_v18  ;;  %v6938_v57 = vld [vmem:[%s9292_s2] sm:$0xff] }
 0xec0   :  { %v3213_v19 = vmul.f32 0.03125, %v3209_v35  ;;  %v3206_v49 = vpop.xlane.xlu0 %3205 }
 0xec1   :  { %v3212_v58 = vmul.f32 0.03125, %v3206_v49  ;;  %v6939_v49 = vld [vmem:[%s9292_s2 + $0x18] sm:$0xff] }
 0xec2   :  { %v3221_v53 = vsub.f32 %v3213_v19, %v3217_v10 }
 0xec3   :  { %v3220_v33 = vsub.f32 %v3212_v58, %v3216_v37 }
 0xec4   :  { %v3229_v59 = vadd.f32 1e-05, %v3221_v53  ;;  %v6940_v53 = vld [vmem:[%s9292_s2 + $0x10] sm:$0xff] }
 0xec5   :  { %v3228_v41 = vadd.f32 1e-05, %v3220_v33 }
 0xec6   :  { %6797 = vrsqrt.f32 %v3229_v59 }
 0xec7   :  { %6799 = vrsqrt.f32 %v3228_v41 }
 0xec8   :  { %v6794_v51 = vpop.eup %6793 }
 0xec9   :  { %v6796_v63 = vpop.eup %6795  ;;  %v3235_v13 = vmul.f32 %v6794_v51, %v3223_v60 }
 0xeca   :  { %v3234_v54 = vmul.f32 %v6796_v63, %v3222_v12 }
 0xecb   :  { %v3243_v61 = vmul.f32 %v5010_v0, %v3235_v13 }
 0xecc   :  { %v3242_v16 = vmul.f32 %v5010_v0, %v3234_v54 }
 0xecd   :  { %v3251_v7 = vadd.f32 %v5011_v47, %v3243_v61 }
 0xece   :  { %v3250_v52 = vadd.f32 %v5011_v47, %v3242_v16 }
 0xed0   :  { %v6798_v48 = vpop.eup %6797  ;;  %5884 = vmatprep.mubr.msk.f32.mxu1 %vm106_vm0, %v3250_v52  ;;  %v6404_v6 = vpack.c.bf16 %v3251_v7, %v3250_v52 }
 0xed1   :  { %v6800_v62 = vpop.eup %6799  ;;  %5885 = vmatmul.mubr.msk.f32.vlgmr.msra.gmra.mrb[48].mxu1 %vm106_vm0, %v3251_v7  ;;  %v3237_v24 = vmul.f32 %v6798_v48, %v3225_v43 }
 0xed2   :  { %v3236_v17 = vmul.f32 %v6800_v62, %v3224_v27 }
 0xed3   :  { %v3245_v55 = vmul.f32 %v5010_v0, %v3237_v24 }
 0xed4   :  { %v3244_v31 = vmul.f32 %v5010_v0, %v3236_v17 }
 0xed5   :  { %v3253_v2 = vadd.f32 %v5011_v47, %v3245_v55 }
 0xed6   :  { %v3252_v29 = vadd.f32 %v5011_v47, %v3244_v31  ;;  %v8617_v31 = vmul.f32 0.17677669, %v8137_v40 }
 0xed8   :  { %5887 = vmatprep.mubr.msk.f32.mxu1 %vm106_vm0, %v3252_v29  ;;  %v6408_v22 = vpack.c.bf16 %v3253_v2, %v3252_v29 }
 0xed9   :  { %5888 = vmatmul.mubr.msk.f32.gmra.mrb[50].mxu1 %vm106_vm0, %v3253_v2 }
 0xfa4   :  { %v5886_v50 = vpop.f32.mrb[48].mxu1 }
 0xfa5   :  { %v3336_v46 = vpop.f32.mrb[49].mxu1 }
 0xfa6   :  { %v6392_v15 = vpack.c.bf16 %v5886_v50, %v3336_v46  ;;  %5898 = vmatprep.mubr.msk.f32.mxu1 %vm106_vm0, %v3336_v46 }
 0xfa8   :  { %6394 = vmatprep.subr.msk.bf16.mxu1 %vm7521_vm1, %v6392_v15 }
 0xfa9   :  { %6397 = vmatpush3.bf16.xpose.msk.msra.mxu1 %vm7521_vm1, %v6392_v15 }
 0xfac   :  { %v5889_v9 = vpop.f32.mrb[50].mxu1 }
 0xfad   :  { %v3346_v8 = vpop.f32.mrb[51].mxu1 }
 0xfae   :  { %v6398_v30 = vpack.c.bf16 %v5889_v9, %v3346_v8 }
 0xfb0   :  { %6400 = vmatprep.subr.msk.bf16.mxu1 %vm7521_vm1, %v6398_v30 }
 0xfb1   :  { %6403 = vmatpush3.bf16.xpose.msk.msra.mxu1 %vm7521_vm1, %v6398_v30 }
 0xfb2   :  { %6405 = vmatprep.subr.bf16.mxu1 %v6404_v6 }
 0xfb8   :  { %5899 = vmatmul.mubr.msk.f32.vlgmr.msra.gmra.mrb[52].mxu1 %vm106_vm0, %v5886_v50 }
 0xfb9   :  { %5901 = vmatprep.mubr.msk.f32.mxu1 %vm106_vm0, %v3346_v8  ;;  %6407 = vmatpush3.bf16.msra.mxu1 %v6404_v6 }
 0xfba   :  { %6409 = vmatprep.subr.bf16.mxu1 %v6408_v22 }
 0xfbc   :  { %5902 = vmatmul.mubr.msk.f32.gmra.mrb[54].mxu1 %vm106_vm0, %v5889_v9 }
 0xfbd   :  { %6411 = vmatpush3.bf16.msra.mxu1 %v6408_v22 }
0x108b   :  { %v5900_v38 = vpop.f32.mrb[52].mxu1 }
0x108c   :  { %v3439_v36 = vadd.f32 %v6937_v42, %v5900_v38  ;;  %v3433_v34 = vpop.f32.mrb[53].mxu1 }
0x108d   :  { %v3434_v18 = vadd.f32 %v6938_v57, %v3433_v34 }
0x108e   :  { %v3455_v35 = vsel %vm106_vm0, %v3439_v36, -inf }
0x108f   :  { %3456 = vmax.xlane.f32.xlu1 %v3455_v35  ;;  %v5903_v10 = vpop.f32.mrb[54].mxu1  ;;  %v3452_v19 = vsel %vm106_vm0, %v3434_v18, -inf }
0x1090   :  { %v3449_v37 = vadd.f32 %v6939_v49, %v5903_v10  ;;  %v3443_v58 = vpop.f32.mrb[55].mxu1  ;;  %3453 = vmax.xlane.f32.xlu0 %v3452_v19 }
0x1091   :  { %v3444_v33 = vadd.f32 %v6940_v53, %v3443_v58 }
0x1092   :  { %v3461_v59 = vsel %vm106_vm0, %v3449_v37, -inf }
0x1093   :  { %3462 = vmax.xlane.f32.xlu1 %v3461_v59  ;;  %v3458_v41 = vsel %vm106_vm0, %v3444_v33, -inf }
0x1094   :  { %3459 = vmax.xlane.f32.xlu0 %v3458_v41 }
0x111c   :  { %v3457_v60 = vpop.xlane.xlu1 %3456 }
0x111d   :  { %v3465_v51 = vsub.f32 %v3439_v36, %v3457_v60  ;;  %v3454_v12 = vpop.xlane.xlu0 %3453 }
0x111e   :  { %v3464_v0 = vsub.f32 %v3434_v18, %v3454_v12 }
0x111f   :  { %v3470_v63 = vmul.f32 1.442695, %v3465_v51 }
0x1120   :  { %v3468_v13 = vmul.f32 1.442695, %v3464_v0  ;;  %v3463_v47 = vpop.xlane.xlu1 %3462 }
0x1121   :  { %6801 = vpow2.f32 %v3470_v63  ;;  %v3467_v54 = vsub.f32 %v3449_v37, %v3463_v47  ;;  %v3460_v61 = vpop.xlane.xlu0 %3459 }
0x1122   :  { %6803 = vpow2.f32 %v3468_v13  ;;  %v3466_v16 = vsub.f32 %v3444_v33, %v3460_v61 }
0x1123   :  { %v3474_v7 = vmul.f32 1.442695, %v3467_v54 }
0x1124   :  { %v3472_v52 = vmul.f32 1.442695, %v3466_v16 }
0x1125   :  { %6805 = vpow2.f32 %v3474_v7 }
0x1126   :  { %6807 = vpow2.f32 %v3472_v52 }
0x112b   :  { %v6802_v43 = vpop.eup %6801 }
0x112c   :  { %v6804_v48 = vpop.eup %6803  ;;  %v3479_v27 = vsel %vm106_vm0, %v6802_v43, 0.0 }
0x112d   :  { %3480 = vadd.xlane.f32.xlu1 %v3479_v27  ;;  %5912 = vmatprep.mubr.msk.f32.mxu1 %vm106_vm0, %v6804_v48  ;;  %v3476_v6 = vsel %vm106_vm0, %v6804_v48, 0.0 }
0x112e   :  { %5913 = vmatmul.mubr.msk.f32.vlgmr.msra.gmra.mrb[56].mxu1 %vm106_vm0, %v6802_v43  ;;  %3477 = vadd.xlane.f32.xlu0 %v3476_v6 }
0x112f   :  { %v6806_v62 = vpop.eup %6805 }
0x1130   :  { %v6808_v24 = vpop.eup %6807  ;;  %v3485_v17 = vsel %vm106_vm0, %v6806_v62, 0.0 }
0x1131   :  { %3486 = vadd.xlane.f32.xlu1 %v3485_v17  ;;  %5915 = vmatprep.mubr.msk.f32.mxu1 %vm106_vm0, %v6808_v24  ;;  %v3482_v55 = vsel %vm106_vm0, %v6808_v24, 0.0 }
0x1132   :  { %5916 = vmatmul.mubr.msk.f32.gmra.mrb[58].mxu1 %vm106_vm0, %v6806_v62  ;;  %3483 = vadd.xlane.f32.xlu0 %v3482_v55 }
0x1133   :  { %5940 = vmatprep.mubr.msk.f32.mxu1 %vm106_vm0, %v8617_v31 }
0x11ba   :  { %v3481_v2 = vpop.xlane.xlu1 %3480 }
0x11bb   :  { %v3478_v29 = vpop.xlane.xlu0 %3477  ;;  %6809 = vrcp.f32 %v3481_v2 }
0x11bc   :  { %6811 = vrcp.f32 %v3478_v29 }
0x11be   :  { %v3487_v22 = vpop.xlane.xlu1 %3486 }
0x11bf   :  { %v3484_v50 = vpop.xlane.xlu0 %3483  ;;  %6813 = vrcp.f32 %v3487_v22 }
0x11c0   :  { %6815 = vrcp.f32 %v3484_v50 }
0x11c5   :  { %v6810_v46 = vpop.eup %6809 }
0x11c6   :  { %v6812_v9 = vpop.eup %6811 }
0x11c9   :  { %v6814_v35 = vpop.eup %6813 }
0x11ca   :  { %v6816_v10 = vpop.eup %6815 }
0x1201   :  { %v5914_v15 = vpop.f32.mrb[56].mxu1 }
0x1202   :  { %v8622_v8 = vmul.f32 %v6810_v46, %v5914_v15  ;;  %v3570_v40 = vpop.f32.mrb[57].mxu1 }
0x1203   :  { %v8624_v30 = vmul.f32 %v6812_v9, %v3570_v40 }
0x1204   :  { %v3598_v38 = vsel %vm106_vm0, %v8622_v8, 0.0  ;;  %v3612_v42 = vmul.f32 %v8622_v8, %v8622_v8 }
0x1205   :  { %3599 = vadd.xlane.f32.xlu1 %v3598_v38  ;;  %v5917_v36 = vpop.f32.mrb[58].mxu1  ;;  %v3595_v34 = vsel %vm106_vm0, %v8624_v30, 0.0  ;;  %v3611_v57 = vmul.f32 %v8624_v30, %v8624_v30 }
0x1206   :  { %v3580_v18 = vpop.f32.mrb[59].mxu1  ;;  %3596 = vadd.xlane.f32.xlu0 %v3595_v34  ;;  %v8634_v19 = vmul.f32 %v6814_v35, %v5917_v36  ;;  %v3618_v49 = vsel %vm106_vm0, %v3612_v42, 0.0 }
0x1207   :  { %v8637_v37 = vmul.f32 %v6816_v10, %v3580_v18  ;;  %v3615_v58 = vsel %vm106_vm0, %v3611_v57, 0.0  ;;  %v5028_v18 = vld [vmem:[%s9302_s12 + $0x5] ss:$0 sm:$0xff] }
0x1208   :  { %v3604_v53 = vsel %vm106_vm0, %v8634_v19, 0.0  ;;  %v3614_v33 = vmul.f32 %v8634_v19, %v8634_v19 }
0x1209   :  { %3619 = vadd.xlane.f32.xlu1 %v3618_v49  ;;  %v3601_v59 = vsel %vm106_vm0, %v8637_v37, 0.0  ;;  %v3613_v41 = vmul.f32 %v8637_v37, %v8637_v37 }
0x120a   :  { %3616 = vadd.xlane.f32.xlu0 %v3615_v58  ;;  %v3624_v60 = vsel %vm106_vm0, %v3614_v33, 0.0  ;;  %v5029_v58 = vld [vmem:[%s9303_s13 + $0x5] ss:$0 sm:$0xff] }
0x120b   :  { %v3621_v51 = vsel %vm106_vm0, %v3613_v41, 0.0 }
0x120d   :  { %3605 = vadd.xlane.f32.xlu1 %v3604_v53 }
0x120e   :  { %3602 = vadd.xlane.f32.xlu0 %v3601_v59 }
0x1211   :  { %3625 = vadd.xlane.f32.xlu1 %v3624_v60 }
0x1212   :  { %3622 = vadd.xlane.f32.xlu0 %v3621_v51 }
0x1292   :  { %v3600_v12 = vpop.xlane.xlu1 %3599 }
0x1293   :  { %v3608_v0 = vmul.f32 0.03125, %v3600_v12  ;;  %v3597_v63 = vpop.xlane.xlu0 %3596  ;;  %v8663_v12 = vpack.c.bf16 %v8147_v26, %v8150_v25 }
0x1294   :  { %v3607_v13 = vmul.f32 0.03125, %v3597_v63 }
0x1295   :  { %v3632_v54 = vmul.f32 %v3608_v0, %v3608_v0  ;;  %v3640_v36 = vsub.f32 %v8622_v8, %v3608_v0 }
0x1296   :  { %v3620_v47 = vpop.xlane.xlu1 %3619  ;;  %v3631_v7 = vmul.f32 %v3607_v13, %v3607_v13  ;;  %v3639_v57 = vsub.f32 %v8624_v30, %v3607_v13 }
0x1297   :  { %v3628_v61 = vmul.f32 0.03125, %v3620_v47  ;;  %v3617_v16 = vpop.xlane.xlu0 %3616 }
0x1298   :  { %v3627_v52 = vmul.f32 0.03125, %v3617_v16  ;;  %v8698_v16 = vpack.c.bf16 %v8191_v23, %v8194_v32 }
0x1299   :  { %v3636_v43 = vsub.f32 %v3628_v61, %v3632_v54  ;;  %v8675_v54 = vpack.c.bf16 %v8161_v39, %v8164_v14  ;;  %v8688_v61 = vpack.c.bf16 %v8175_v4, %v8178_v45 }
0x129a   :  { %v3635_v48 = vsub.f32 %v3627_v52, %v3631_v7  ;;  %v3606_v27 = vpop.xlane.xlu1 %3605  ;;  %v8718_v7 = vpack.c.bf16 %v8219_v28, %v8222_v56  ;;  %v8728_v52 = vpack.c.bf16 %v8234_v11, %v8237_v44 }
0x129b   :  { %v3644_v6 = vadd.f32 1e-05, %v3636_v43  ;;  %v3610_v62 = vmul.f32 0.03125, %v3606_v27  ;;  %v3603_v24 = vpop.xlane.xlu0 %3602  ;;  %v3773_v43 = vmul.f32 0.17677669, %v8135_v5 }
0x129c   :  { %v3643_v17 = vadd.f32 1e-05, %v3635_v48  ;;  %v3609_v55 = vmul.f32 0.03125, %v3603_v24  ;;  %v3774_v48 = vmul.f32 0.17677669, %v8150_v25 }
0x129d   :  { %6817 = vrsqrt.f32 %v3644_v6  ;;  %v3634_v29 = vmul.f32 %v3610_v62, %v3610_v62  ;;  %v3642_v8 = vsub.f32 %v8634_v19, %v3610_v62  ;;  %v3775_v27 = vmul.f32 0.17677669, %v8147_v26 }
0x129e   :  { %6819 = vrsqrt.f32 %v3643_v17  ;;  %v3626_v2 = vpop.xlane.xlu1 %3625  ;;  %v3633_v46 = vmul.f32 %v3609_v55, %v3609_v55  ;;  %v3641_v30 = vsub.f32 %v8637_v37, %v3609_v55  ;;  %v3776_v6 = vmul.f32 0.17677669, %v8164_v14  ;;  %v6941_v55 = vld [vmem:[%s9294_s4 + $0x18] sm:$0xff] }
0x129f   :  { %v3630_v22 = vmul.f32 0.03125, %v3626_v2  ;;  %v3623_v50 = vpop.xlane.xlu0 %3622  ;;  %v3777_v5 = vmul.f32 0.17677669, %v8161_v39  ;;  %v3778_v25 = vmul.f32 0.17677669, %v8178_v45 }
0x12a0   :  { %v3629_v15 = vmul.f32 0.03125, %v3623_v50  ;;  %v3779_v26 = vmul.f32 0.17677669, %v8175_v4  ;;  %v3780_v14 = vmul.f32 0.17677669, %v8194_v32  ;;  %v6942_v50 = vld [vmem:[%s9294_s4 + $0x10] sm:$0xff] }
0x12a1   :  { %v3638_v9 = vsub.f32 %v3630_v22, %v3634_v29  ;;  %v3781_v39 = vmul.f32 0.17677669, %v8191_v23  ;;  %v3782_v45 = vmul.f32 0.17677669, %v8208_v20  ;;  %v3783_v4 = vmul.f32 0.17677669, %v8205_v3 }
0x12a2   :  { %v3637_v40 = vsub.f32 %v3629_v15, %v3633_v46  ;;  %v3784_v32 = vmul.f32 0.17677669, %v8222_v56  ;;  %v3785_v23 = vmul.f32 0.17677669, %v8219_v28 }
0x12a3   :  { %v3646_v38 = vadd.f32 1e-05, %v3638_v9 }
0x12a4   :  { %v3645_v42 = vadd.f32 1e-05, %v3637_v40  ;;  %v6943_v40 = vld [vmem:[%s9294_s4 + $0x28] sm:$0xff] }
0x12a5   :  { %6821 = vrsqrt.f32 %v3646_v38 }
0x12a6   :  { %6823 = vrsqrt.f32 %v3645_v42 }
0x12a7   :  { %v6818_v34 = vpop.eup %6817 }
0x12a8   :  { %v6820_v35 = vpop.eup %6819  ;;  %v3652_v10 = vmul.f32 %v6818_v34, %v3640_v36  ;;  %v6944_v34 = vld [vmem:[%s9294_s4 + $0x20] sm:$0xff] }
0x12a9   :  { %v3651_v49 = vmul.f32 %v6820_v35, %v3639_v57 }
0x12aa   :  { %v3660_v53 = vmul.f32 %v5028_v18, %v3652_v10  ;;  %v6945_v10 = vld [vmem:[%s9294_s4 + $0x38] sm:$0xff] }
0x12ab   :  { %v3659_v33 = vmul.f32 %v5028_v18, %v3651_v49 }
0x12ac   :  { %v3668_v41 = vadd.f32 %v5029_v58, %v3660_v53 }
0x12ad   :  { %v3667_v59 = vadd.f32 %v5029_v58, %v3659_v33  ;;  %v6946_v33 = vld [vmem:[%s9294_s4 + $0x30] sm:$0xff] }
0x12af   :  { %v6822_v60 = vpop.eup %6821  ;;  %5926 = vmatprep.mubr.msk.f32.mxu0 %vm106_vm0, %v3667_v59 }
0x12b0   :  { %v6824_v51 = vpop.eup %6823  ;;  %5927 = vmatmul.mubr.msk.f32.vlgmr.msra.gmra.mrb[48].mxu0 %vm106_vm0, %v3668_v41  ;;  %v3654_v0 = vmul.f32 %v6822_v60, %v3642_v8  ;;  %v6947_v60 = vld [vmem:[%s9294_s4 + $0x48] sm:$0xff] }
0x12b1   :  { %6437 = vmatpush3.bf16.xpose.msk.msra.mxu0 %vm7521_vm1, %v8534_v21  ;;  %v3653_v63 = vmul.f32 %v6824_v51, %v3641_v30 }
0x12b2   :  { %6440 = vmatprep.subr.msk.bf16.mxu0 %vm7521_vm1, %v8663_v12  ;;  %v3662_v19 = vmul.f32 %v5028_v18, %v3654_v0 }
0x12b3   :  { %v3661_v37 = vmul.f32 %v5028_v18, %v3653_v63  ;;  %v6949_v63 = vld [vmem:[%s9294_s4 + $0x58] sm:$0xff] }
0x12b4   :  { %v3670_v47 = vadd.f32 %v5029_v58, %v3662_v19 }
0x12b5   :  { %v3669_v13 = vadd.f32 %v5029_v58, %v3661_v37  ;;  %v6950_v37 = vld [vmem:[%s9294_s4 + $0x50] sm:$0xff] }
0x12b7   :  { %5929 = vmatprep.mubr.msk.f32.mxu0 %vm106_vm0, %v3669_v13 }
0x12b8   :  { %5930 = vmatmul.mubr.msk.f32.gmra.mrb[50].mxu0 %vm106_vm0, %v3670_v47  ;;  %v6951_v47 = vld [vmem:[%s9294_s4 + $0x68] sm:$0xff] }
0x12b9   :  { %6443 = vmatpush3.bf16.xpose.msk.msra.mxu0 %vm7521_vm1, %v8663_v12  ;;  %5996 = vmatprep.mubr.msk.f32.mxu0 %vm106_vm0, %v8617_v31  ;;  %v8708_v31 = vpack.c.bf16 %v8205_v3, %v8208_v20  ;;  %v3786_v20 = vmul.f32 0.17677669, %v8237_v44  ;;  %v3787_v3 = vmul.f32 0.17677669, %v8234_v11 }
0x12ba   :  { %6446 = vmatprep.subr.msk.bf16.mxu0 %vm7521_vm1, %v8675_v54 }
0x12c1   :  { %6449 = vmatpush3.bf16.xpose.msk.msra.mxu0 %vm7521_vm1, %v8675_v54 }
0x12c2   :  { %6452 = vmatprep.subr.msk.bf16.mxu0 %vm7521_vm1, %v8688_v61 }
0x12c9   :  { %6455 = vmatpush3.bf16.xpose.msk.msra.mxu0 %vm7521_vm1, %v8688_v61 }
0x12ca   :  { %6458 = vmatprep.subr.msk.bf16.mxu0 %vm7521_vm1, %v8698_v16 }
0x12d1   :  { %6461 = vmatpush3.bf16.xpose.msk.msra.mxu0 %vm7521_vm1, %v8698_v16 }
0x12d2   :  { %6464 = vmatprep.subr.msk.bf16.mxu0 %vm7521_vm1, %v8708_v31 }
0x12d9   :  { %6467 = vmatpush3.bf16.xpose.msk.msra.mxu0 %vm7521_vm1, %v8708_v31 }
0x12da   :  { %6470 = vmatprep.subr.msk.bf16.mxu0 %vm7521_vm1, %v8718_v7 }
0x12e1   :  { %6473 = vmatpush3.bf16.xpose.msk.msra.mxu0 %vm7521_vm1, %v8718_v7 }
0x12e2   :  { %6476 = vmatprep.subr.msk.bf16.mxu0 %vm7521_vm1, %v8728_v52 }
0x12e9   :  { %6479 = vmatpush3.bf16.xpose.msk.msra.mxu0 %vm7521_vm1, %v8728_v52 }
0x12ea   :  { %6481 = vmatprep.subr.bf16.mxu0 %v8534_v21 }
0x12f0   :  { %5997 = vmatmul.mubr.msk.f32.vlgmr.msra.gmra.mrb[52].mxu0 %vm106_vm0, %v3773_v43 }
0x12f1   :  { %5999 = vmatprep.mubr.msk.f32.mxu0 %vm106_vm0, %v3774_v48  ;;  %6483 = vmatpush3.bf16.msra.mxu0 %v8534_v21 }
0x12f2   :  { %6485 = vmatprep.subr.bf16.mxu0 %v8663_v12 }
0x12f4   :  { %6000 = vmatmul.mubr.msk.f32.gmra.mrb[54].mxu0 %vm106_vm0, %v3775_v27 }
0x12f5   :  { %6002 = vmatprep.mubr.msk.f32.mxu0 %vm106_vm0, %v3776_v6  ;;  %6487 = vmatpush3.bf16.msra.mxu0 %v8663_v12 }
0x12f6   :  { %6489 = vmatprep.subr.bf16.mxu0 %v8675_v54 }
0x12f8   :  { %6003 = vmatmul.mubr.msk.f32.gmra.mrb[56].mxu0 %vm106_vm0, %v3777_v5 }
0x12f9   :  { %6005 = vmatprep.mubr.msk.f32.mxu0 %vm106_vm0, %v3778_v25  ;;  %6491 = vmatpush3.bf16.msra.mxu0 %v8675_v54 }
0x12fa   :  { %6493 = vmatprep.subr.bf16.mxu0 %v8688_v61 }
0x12fc   :  { %6006 = vmatmul.mubr.msk.f32.gmra.mrb[58].mxu0 %vm106_vm0, %v3779_v26 }
0x12fd   :  { %6008 = vmatprep.mubr.msk.f32.mxu0 %vm106_vm0, %v3780_v14  ;;  %6495 = vmatpush3.bf16.msra.mxu0 %v8688_v61 }
0x12fe   :  { %6497 = vmatprep.subr.bf16.mxu0 %v8698_v16 }
0x1300   :  { %6009 = vmatmul.mubr.msk.f32.gmra.mrb[60].mxu0 %vm106_vm0, %v3781_v39 }
0x1301   :  { %6011 = vmatprep.mubr.msk.f32.mxu0 %vm106_vm0, %v3782_v45  ;;  %6499 = vmatpush3.bf16.msra.mxu0 %v8698_v16 }
0x1302   :  { %6501 = vmatprep.subr.bf16.mxu0 %v8708_v31 }
0x1304   :  { %6012 = vmatmul.mubr.msk.f32.gmra.mrb[62].mxu0 %vm106_vm0, %v3783_v4 }
0x1305   :  { %6014 = vmatprep.mubr.msk.f32.mxu0 %vm106_vm0, %v3784_v32  ;;  %6503 = vmatpush3.bf16.msra.mxu0 %v8708_v31 }
0x1306   :  { %6505 = vmatprep.subr.bf16.mxu0 %v8718_v7 }
0x1308   :  { %6015 = vmatmul.mubr.msk.f32.gmra.mrb[64].mxu0 %vm106_vm0, %v3785_v23 }
0x1309   :  { %6017 = vmatprep.mubr.msk.f32.mxu0 %vm106_vm0, %v3786_v20  ;;  %6507 = vmatpush3.bf16.msra.mxu0 %v8718_v7 }
0x130a   :  { %6509 = vmatprep.subr.bf16.mxu0 %v8728_v52 }
0x130c   :  { %6018 = vmatmul.mubr.msk.f32.gmra.mrb[66].mxu0 %vm106_vm0, %v3787_v3 }
0x130d   :  { %6511 = vmatpush3.bf16.msra.mxu0 %v8728_v52 }
0x1383   :  { %v5928_v56 = vpop.f32.mrb[48].mxu0 }
0x1384   :  { %v3753_v62 = vpop.f32.mrb[49].mxu0 }
0x1385   :  { %v8785_v24 = vpack.c.bf16 %v5928_v56, %v3753_v62  ;;  %v6959_v62 = vld [vmem:[%s9293_s3 + $0x28] sm:$0xff] }
0x1387   :  { %6422 = vmatprep.subr.msk.bf16.mxu1 %vm7521_vm1, %v8785_v24 }
0x1388   :  { %6425 = vmatpush3.bf16.xpose.msk.msra.mxu1 %vm7521_vm1, %v8785_v24 }
0x138b   :  { %v5931_v28 = vpop.f32.mrb[50].mxu0 }
0x138c   :  { %v3763_v44 = vpop.f32.mrb[51].mxu0 }
0x138d   :  { %v8793_v17 = vpack.c.bf16 %v5931_v28, %v3763_v44 }
0x138f   :  { %6428 = vmatprep.subr.msk.bf16.mxu1 %vm7521_vm1, %v8793_v17 }
0x1390   :  { %6431 = vmatpush3.bf16.xpose.msk.msra.mxu1 %vm7521_vm1, %v8793_v17 }
0x1391   :  { %6520 = vmatprep.subr.bf16.mxu1 %v8534_v21 }
0x1397   :  { %5941 = vmatmul.mubr.msk.f32.vlgmr.msra.gmra.mrb[60].mxu1 %vm106_vm0, %v3773_v43 }
0x1398   :  { %5943 = vmatprep.mubr.msk.f32.mxu1 %vm106_vm0, %v3774_v48  ;;  %6528 = vmatpush3.bf16.msra.mxu1 %v8534_v21  ;;  %v6955_v48 = vld [vmem:[%s9294_s4] sm:$0xff] }
0x1399   :  { %6521 = vmatprep.subr.bf16.mxu1 %v8663_v12 }
0x139b   :  { %5944 = vmatmul.mubr.msk.f32.gmra.mrb[62].mxu1 %vm106_vm0, %v3775_v27 }
0x139c   :  { %5946 = vmatprep.mubr.msk.f32.mxu1 %vm106_vm0, %v3776_v6  ;;  %6529 = vmatpush3.bf16.msra.mxu1 %v8663_v12  ;;  %v6948_v12 = vld [vmem:[%s9294_s4 + $0x40] sm:$0xff]  ;;  %v6956_v6 = vld [vmem:[%s9294_s4 + $0x8] sm:$0xff] }
0x139d   :  { %6522 = vmatprep.subr.bf16.mxu1 %v8675_v54 }
0x139f   :  { %5947 = vmatmul.mubr.msk.f32.gmra.mrb[64].mxu1 %vm106_vm0, %v3777_v5 }
0x13a0   :  { %5949 = vmatprep.mubr.msk.f32.mxu1 %vm106_vm0, %v3778_v25  ;;  %6530 = vmatpush3.bf16.msra.mxu1 %v8675_v54 }
0x13a1   :  { %6523 = vmatprep.subr.bf16.mxu1 %v8688_v61 }
0x13a3   :  { %5950 = vmatmul.mubr.msk.f32.gmra.mrb[66].mxu1 %vm106_vm0, %v3779_v26 }
0x13a4   :  { %5952 = vmatprep.mubr.msk.f32.mxu1 %vm106_vm0, %v3780_v14  ;;  %6531 = vmatpush3.bf16.msra.mxu1 %v8688_v61  ;;  %v6952_v61 = vld [vmem:[%s9294_s4 + $0x60] sm:$0xff] }
0x13a5   :  { %6524 = vmatprep.subr.bf16.mxu1 %v8698_v16 }
0x13a7   :  { %5953 = vmatmul.mubr.msk.f32.gmra.mrb[68].mxu1 %vm106_vm0, %v3781_v39  ;;  %v6957_v39 = vld [vmem:[%s9293_s3 + $0x18] sm:$0xff] }
0x13a8   :  { %5955 = vmatprep.mubr.msk.f32.mxu1 %vm106_vm0, %v3782_v45  ;;  %6532 = vmatpush3.bf16.msra.mxu1 %v8698_v16 }
0x13a9   :  { %6525 = vmatprep.subr.bf16.mxu1 %v8708_v31 }
0x13ab   :  { %5956 = vmatmul.mubr.msk.f32.gmra.mrb[70].mxu1 %vm106_vm0, %v3783_v4 }
0x13ac   :  { %5958 = vmatprep.mubr.msk.f32.mxu1 %vm106_vm0, %v3784_v32  ;;  %6533 = vmatpush3.bf16.msra.mxu1 %v8708_v31  ;;  %v6953_v31 = vld [vmem:[%s9294_s4 + $0x78] sm:$0xff]  ;;  %v6958_v32 = vld [vmem:[%s9293_s3 + $0x10] sm:$0xff] }
0x13ad   :  { %6526 = vmatprep.subr.bf16.mxu1 %v8718_v7 }
0x13af   :  { %5959 = vmatmul.mubr.msk.f32.gmra.mrb[72].mxu1 %vm106_vm0, %v3785_v23 }
0x13b0   :  { %5961 = vmatprep.mubr.msk.f32.mxu1 %vm106_vm0, %v3786_v20  ;;  %6534 = vmatpush3.bf16.msra.mxu1 %v8718_v7 }
0x13b1   :  { %6527 = vmatprep.subr.bf16.mxu1 %v8728_v52 }
0x13b3   :  { %5962 = vmatmul.mubr.msk.f32.gmra.mrb[74].mxu1 %vm106_vm0, %v3787_v3 }
0x13b4   :  { %6535 = vmatpush3.bf16.msra.mxu1 %v8728_v52  ;;  %v6954_v52 = vld [vmem:[%s9294_s4 + $0x70] sm:$0xff] }
0x13b5   :  { %6513 = vmatprep.subr.bf16.mxu1 %v8785_v24 }
0x13c3   :  { %v5998_v1 = vpop.f32.mrb[52].mxu0 }
0x13c4   :  { %v4107_v11 = vpop.f32.mrb[53].mxu0  ;;  %v8926_v5 = vadd.f32 %v6956_v6, %v5998_v1  ;;  %v6967_v6 = vld [vmem:[%s9293_s3 + $0x68] sm:$0xff] }
0x13c5   :  { %v8920_v27 = vadd.f32 %v6955_v48, %v4107_v11 }
0x13c7   :  { %v6001_v21 = vpop.f32.mrb[54].mxu0 }
0x13c8   :  { %v8836_v2 = vadd.f32 %v6941_v55, %v6001_v21  ;;  %v4117_v29 = vpop.f32.mrb[55].mxu0  ;;  %v6960_v21 = vld [vmem:[%s9293_s3 + $0x20] sm:$0xff] }
0x13c9   :  { %v8842_v46 = vadd.f32 %v6942_v50, %v4117_v29 }
0x13ca   :  { %4240 = vmax.xlane.f32.xlu1 %v8836_v2 }
0x13cb   :  { %v6004_v22 = vpop.f32.mrb[56].mxu0 }
0x13cc   :  { %v4127_v15 = vpop.f32.mrb[57].mxu0  ;;  %v8848_v38 = vadd.f32 %v6943_v40, %v6004_v22 }
0x13cd   :  { %v8854_v57 = vadd.f32 %v6944_v34, %v4127_v15  ;;  %v6961_v15 = vld [vmem:[%s9293_s3 + $0x38] sm:$0xff]  ;;  %v6962_v34 = vld [vmem:[%s9293_s3 + $0x30] sm:$0xff] }
0x13ce   :  { %4238 = vmax.xlane.f32.xlu1 %v8842_v46 }
0x13cf   :  { %v6007_v9 = vpop.f32.mrb[58].mxu0 }
0x13d0   :  { %v4137_v42 = vpop.f32.mrb[59].mxu0  ;;  %v8860_v49 = vadd.f32 %v6945_v10, %v6007_v9 }
0x13d1   :  { %v8866_v59 = vadd.f32 %v6946_v33, %v4137_v42 }
0x13d2   :  { %4244 = vmax.xlane.f32.xlu1 %v8848_v38 }
0x13d3   :  { %v6010_v36 = vpop.f32.mrb[60].mxu0 }
0x13d4   :  { %v4147_v18 = vpop.f32.mrb[61].mxu0  ;;  %v8872_v30 = vadd.f32 %v6947_v60, %v6010_v36 }
0x13d5   :  { %v8878_v0 = vadd.f32 %v6948_v12, %v4147_v18 }
0x13d6   :  { %4242 = vmax.xlane.f32.xlu1 %v8854_v57 }
0x13d7   :  { %v6013_v35 = vpop.f32.mrb[62].mxu0 }
0x13d8   :  { %v4157_v58 = vpop.f32.mrb[63].mxu0  ;;  %v8884_v19 = vadd.f32 %v6949_v63, %v6013_v35 }
0x13d9   :  { %v8890_v13 = vadd.f32 %v6950_v37, %v4157_v58  ;;  %v6965_v37 = vld [vmem:[%s9293_s3 + $0x58] sm:$0xff] }
0x13da   :  { %4248 = vmax.xlane.f32.xlu1 %v8860_v49 }
0x13db   :  { %v6016_v53 = vpop.f32.mrb[64].mxu0 }
0x13dc   :  { %v4167_v8 = vpop.f32.mrb[65].mxu0  ;;  %v8896_v54 = vadd.f32 %v6951_v47, %v6016_v53  ;;  %v6963_v53 = vld [vmem:[%s9293_s3 + $0x48] sm:$0xff] }
0x13dd   :  { %v8902_v16 = vadd.f32 %v6952_v61, %v4167_v8 }
0x13de   :  { %4246 = vmax.xlane.f32.xlu1 %v8866_v59 }
0x13df   :  { %v6019_v41 = vpop.f32.mrb[66].mxu0 }
0x13e0   :  { %v4177_v51 = vpop.f32.mrb[67].mxu0  ;;  %v8908_v7 = vadd.f32 %v6953_v31, %v6019_v41  ;;  %v6966_v31 = vld [vmem:[%s9293_s3 + $0x50] sm:$0xff] }
0x13e1   :  { %v8914_v43 = vadd.f32 %v6954_v52, %v4177_v51  ;;  %v6964_v51 = vld [vmem:[%s9293_s3 + $0x40] sm:$0xff] }
0x13e2   :  { %4252 = vmax.xlane.f32.xlu1 %v8872_v30 }
0x13e6   :  { %4250 = vmax.xlane.f32.xlu1 %v8878_v0 }
0x13ea   :  { %4256 = vmax.xlane.f32.xlu1 %v8884_v19 }
0x13ee   :  { %4254 = vmax.xlane.f32.xlu1 %v8890_v13 }
0x13f2   :  { %4260 = vmax.xlane.f32.xlu1 %v8896_v54 }
0x13f6   :  { %4258 = vmax.xlane.f32.xlu1 %v8902_v16 }
0x13fa   :  { %4264 = vmax.xlane.f32.xlu1 %v8908_v7 }
0x13fe   :  { %4262 = vmax.xlane.f32.xlu1 %v8914_v43 }
0x1402   :  { %4234 = vmax.xlane.f32.xlu1 %v8920_v27 }
0x1406   :  { %4236 = vmax.xlane.f32.xlu1 %v8926_v5 }
0x146a   :  { %v8929_v25 = vpop.f32.mrb[60].mxu1 }
0x146b   :  { %v8931_v26 = vpop.f32.mrb[61].mxu1 }
0x146e   :  { %v5945_v14 = vpop.f32.mrb[62].mxu1 }
0x146f   :  { %v8936_v45 = vadd.f32 %v6957_v39, %v5945_v14  ;;  %v3924_v4 = vpop.f32.mrb[63].mxu1 }
0x1470   :  { %v8941_v23 = vadd.f32 %v6958_v32, %v3924_v4  ;;  %v6968_v4 = vld [vmem:[%s9293_s3 + $0x60] sm:$0xff] }
0x1471   :  { %v4195_v20 = vsel %vm106_vm0, %v8936_v45, -inf }
0x1472   :  { %4196 = vmax.xlane.f32.xlu0 %v4195_v20  ;;  %v5948_v3 = vpop.f32.mrb[64].mxu1  ;;  %v4192_v44 = vsel %vm106_vm0, %v8941_v23, -inf }
0x1473   :  { %v3934_v56 = vpop.f32.mrb[65].mxu1  ;;  %v8948_v28 = vadd.f32 %v6959_v62, %v5948_v3  ;;  %v6969_v3 = vld [vmem:[%s9293_s3 + $0x78] sm:$0xff] }
0x1474   :  { %v8955_v55 = vadd.f32 %v6960_v21, %v3934_v56  ;;  %v6971_v21 = vld [vmem:[%s9293_s3] sm:$0xff] }
0x1475   :  { %v4201_v29 = vsel %vm106_vm0, %v8948_v28, -inf }
0x1476   :  { %v5951_v1 = vpop.f32.mrb[66].mxu1  ;;  %4193 = vmax.xlane.f32.xlu0 %v4192_v44  ;;  %v4198_v40 = vsel %vm106_vm0, %v8955_v55, -inf  ;;  %v6970_v44 = vld [vmem:[%s9293_s3 + $0x70] sm:$0xff] }
0x1477   :  { %v3944_v11 = vpop.f32.mrb[67].mxu1  ;;  %v8962_v9 = vadd.f32 %v6961_v15, %v5951_v1 }
0x1478   :  { %v8969_v18 = vadd.f32 %v6962_v34, %v3944_v11 }
0x1479   :  { %v4207_v35 = vsel %vm106_vm0, %v8962_v9, -inf }
0x147a   :  { %v5954_v22 = vpop.f32.mrb[68].mxu1  ;;  %4202 = vmax.xlane.f32.xlu0 %v4201_v29  ;;  %v4204_v8 = vsel %vm106_vm0, %v8969_v18, -inf  ;;  %v9033_v29 = vadd.f32 %v6971_v21, %v8931_v26  ;;  %v4241_v26 = vpop.xlane.xlu1 %4240 }
0x147b   :  { %v3954_v50 = vpop.f32.mrb[69].mxu1  ;;  %v8976_v33 = vadd.f32 %v6963_v53, %v5954_v22 }
0x147c   :  { %v8983_v12 = vadd.f32 %v6964_v51, %v3954_v50  ;;  %v6972_v50 = vld [vmem:[%s9293_s3 + $0x8] sm:$0xff] }
0x147d   :  { %v4213_v63 = vsel %vm106_vm0, %v8976_v33, -inf  ;;  %v9041_v15 = vadd.f32 %v6972_v50, %v8929_v25 }
0x147e   :  { %v5957_v42 = vpop.f32.mrb[70].mxu1  ;;  %4199 = vmax.xlane.f32.xlu0 %v4198_v40  ;;  %v4210_v61 = vsel %vm106_vm0, %v8983_v12, -inf  ;;  %v4186_v40 = vsel %vm106_vm0, %v9033_v29, -inf }
0x147f   :  { %v3964_v36 = vpop.f32.mrb[71].mxu1  ;;  %v8990_v47 = vadd.f32 %v6965_v37, %v5957_v42  ;;  %v4189_v42 = vsel %vm106_vm0, %v9041_v15, -inf }
0x1480   :  { %v8997_v52 = vadd.f32 %v6966_v31, %v3964_v36  ;;  %v4239_v36 = vpop.xlane.xlu1 %4238 }
0x1481   :  { %v4219_v48 = vsel %vm106_vm0, %v8990_v47, -inf }
0x1482   :  { %v5960_v10 = vpop.f32.mrb[72].mxu1  ;;  %4208 = vmax.xlane.f32.xlu0 %v4207_v35  ;;  %v4216_v39 = vsel %vm106_vm0, %v8997_v52, -inf }
0x1483   :  { %v3974_v58 = vpop.f32.mrb[73].mxu1  ;;  %v9004_v14 = vadd.f32 %v6967_v6, %v5960_v10 }
0x1484   :  { %v9011_v32 = vadd.f32 %v6968_v4, %v3974_v58  ;;  %v4245_v34 = vpop.xlane.xlu1 %4244 }
0x1485   :  { %v4225_v20 = vsel %vm106_vm0, %v9004_v14, -inf }
0x1486   :  { %v5963_v41 = vpop.f32.mrb[74].mxu1  ;;  %4205 = vmax.xlane.f32.xlu0 %v4204_v8  ;;  %v4222_v62 = vsel %vm106_vm0, %v9011_v32, -inf }
0x1487   :  { %v3984_v60 = vpop.f32.mrb[75].mxu1  ;;  %v9018_v56 = vadd.f32 %v6969_v3, %v5963_v41 }
0x1488   :  { %v9025_v1 = vadd.f32 %v6970_v44, %v3984_v60  ;;  %v4243_v35 = vpop.xlane.xlu1 %4242 }
0x1489   :  { %v4231_v11 = vsel %vm106_vm0, %v9018_v56, -inf }
0x148a   :  { %4214 = vmax.xlane.f32.xlu0 %v4213_v63  ;;  %v4228_v22 = vsel %vm106_vm0, %v9025_v1, -inf }
0x148c   :  { %v4249_v10 = vpop.xlane.xlu1 %4248 }
0x148e   :  { %4211 = vmax.xlane.f32.xlu0 %v4210_v61 }
0x1490   :  { %v4247_v58 = vpop.xlane.xlu1 %4246 }
0x1492   :  { %4220 = vmax.xlane.f32.xlu0 %v4219_v48 }
0x1494   :  { %v4253_v51 = vpop.xlane.xlu1 %4252 }
0x1496   :  { %4217 = vmax.xlane.f32.xlu0 %v4216_v39 }
0x1498   :  { %v4251_v6 = vpop.xlane.xlu1 %4250 }
0x149a   :  { %4226 = vmax.xlane.f32.xlu0 %v4225_v20 }
0x149e   :  { %4223 = vmax.xlane.f32.xlu0 %v4222_v62 }
0x14a2   :  { %4232 = vmax.xlane.f32.xlu0 %v4231_v11  ;;  %v4257_v11 = vpop.xlane.xlu1 %4256 }
0x14a6   :  { %4229 = vmax.xlane.f32.xlu0 %v4228_v22 }
0x14aa   :  { %4187 = vmax.xlane.f32.xlu0 %v4186_v40 }
0x14ae   :  { %4190 = vmax.xlane.f32.xlu0 %v4189_v42  ;;  %v4255_v42 = vpop.xlane.xlu1 %4254 }
0x14ff   :  { %v4197_v53 = vpop.xlane.xlu0 %4196 }
0x1500   :  { %v9047_v8 = vmax.f32 %v4197_v53, %v4241_v26  ;;  %v4261_v53 = vpop.xlane.xlu1 %4260 }
0x1502   :  { %v4333_v25 = vsub.f32 %v8836_v2, %v9047_v8 }
0x1503   :  { %v4194_v41 = vpop.xlane.xlu0 %4193 }
0x1504   :  { %v9051_v60 = vmax.f32 %v4194_v41, %v4239_v36  ;;  %v4352_v61 = vmul.f32 1.442695, %v4333_v25 }
0x1506   :  { %v4332_v63 = vsub.f32 %v8842_v46, %v9051_v60 }
0x1507   :  { %v4203_v37 = vpop.xlane.xlu0 %4202 }
0x1508   :  { %v4350_v31 = vmul.f32 1.442695, %v4332_v63  ;;  %v9055_v48 = vmax.f32 %v4203_v37, %v4245_v34 }
0x150a   :  { %6825 = vpow2.f32 %v4350_v31  ;;  %v4335_v4 = vsub.f32 %v8848_v38, %v9055_v48 }
0x150b   :  { %v4200_v39 = vpop.xlane.xlu0 %4199  ;;  %6827 = vpow2.f32 %v4352_v61 }
0x150c   :  { %v9059_v20 = vmax.f32 %v4200_v39, %v4243_v35  ;;  %v4356_v62 = vmul.f32 1.442695, %v4335_v4 }
0x150e   :  { %v4334_v2 = vsub.f32 %v8854_v57, %v9059_v20 }
0x150f   :  { %v4209_v3 = vpop.xlane.xlu0 %4208 }
0x1510   :  { %v4354_v46 = vmul.f32 1.442695, %v4334_v2  ;;  %v9063_v44 = vmax.f32 %v4209_v3, %v4249_v10 }
0x1512   :  { %6829 = vpow2.f32 %v4354_v46  ;;  %v4337_v22 = vsub.f32 %v8860_v49, %v9063_v44 }
0x1513   :  { %v4206_v21 = vpop.xlane.xlu0 %4205  ;;  %6831 = vpow2.f32 %v4356_v62 }
0x1514   :  { %v9067_v50 = vmax.f32 %v4206_v21, %v4247_v58  ;;  %v9069_v38 = vpop.eup %6825  ;;  %v4360_v36 = vmul.f32 1.442695, %v4337_v22 }
0x1515   :  { %v9071_v40 = vpop.eup %6827  ;;  %6055 = vmatprep.mubr.f32.mxu1 %v9069_v38 }
0x1516   :  { %v4336_v57 = vsub.f32 %v8866_v59, %v9067_v50  ;;  %6056 = vmatmul.mubr.f32.vlgmr.msra.gmra.mrb[76].mxu1 %v9071_v40 }
0x1517   :  { %v4215_v26 = vpop.xlane.xlu0 %4214  ;;  %6515 = vmatpush3.bf16.msra.mxu1 %v8785_v24 }
0x1518   :  { %v4358_v34 = vmul.f32 1.442695, %v4336_v57  ;;  %v9078_v49 = vmax.f32 %v4215_v26, %v4253_v51  ;;  %6517 = vmatprep.subr.bf16.mxu1 %v8793_v17 }
0x151a   :  { %6833 = vpow2.f32 %v4358_v34  ;;  %v4339_v59 = vsub.f32 %v8872_v30, %v9078_v49 }
0x151b   :  { %v4212_v35 = vpop.xlane.xlu0 %4211  ;;  %6835 = vpow2.f32 %v4360_v36  ;;  %6519 = vmatpush3.bf16.msra.mxu1 %v8793_v17  ;;  %v4259_v17 = vpop.xlane.xlu1 %4258 }
0x151c   :  { %v9084_v10 = vmax.f32 %v4212_v35, %v4251_v6  ;;  %v9086_v58 = vpop.eup %6829  ;;  %v4364_v51 = vmul.f32 1.442695, %v4339_v59 }
0x151d   :  { %v9088_v41 = vpop.eup %6831  ;;  %6058 = vmatprep.mubr.f32.mxu1 %v9086_v58 }
0x151e   :  { %v4338_v24 = vsub.f32 %v8878_v0, %v9084_v10  ;;  %6059 = vmatmul.mubr.f32.gmra.mrb[78].mxu1 %v9088_v41 }
0x151f   :  { %v4221_v25 = vpop.xlane.xlu0 %4220  ;;  %v4265_v46 = vpop.xlane.xlu1 %4264 }
0x1520   :  { %v4362_v63 = vmul.f32 1.442695, %v4338_v24  ;;  %v9094_v30 = vmax.f32 %v4221_v25, %v4257_v11 }
0x1522   :  { %6837 = vpow2.f32 %v4362_v63  ;;  %v4341_v61 = vsub.f32 %v8884_v19, %v9094_v30 }
0x1523   :  { %v4218_v37 = vpop.xlane.xlu0 %4217  ;;  %6839 = vpow2.f32 %v4364_v51 }
0x1524   :  { %v9098_v31 = vmax.f32 %v4218_v37, %v4255_v42  ;;  %v9100_v6 = vpop.eup %6833  ;;  %v4368_v2 = vmul.f32 1.442695, %v4341_v61  ;;  %v4263_v42 = vpop.xlane.xlu1 %4262 }
0x1525   :  { %v9102_v0 = vpop.eup %6835  ;;  %6061 = vmatprep.mubr.f32.mxu1 %v9100_v6 }
0x1526   :  { %v4340_v39 = vsub.f32 %v8890_v13, %v9098_v31  ;;  %6062 = vmatmul.mubr.f32.gmra.mrb[80].mxu1 %v9102_v0 }
0x1527   :  { %v4227_v4 = vpop.xlane.xlu0 %4226 }
0x1528   :  { %v4366_v3 = vmul.f32 1.442695, %v4340_v39  ;;  %v9108_v62 = vmax.f32 %v4227_v4, %v4261_v53 }
0x152a   :  { %6841 = vpow2.f32 %v4366_v3  ;;  %v4343_v11 = vsub.f32 %v8896_v54, %v9108_v62 }
0x152b   :  { %v4224_v19 = vpop.xlane.xlu0 %4223  ;;  %6843 = vpow2.f32 %v4368_v2  ;;  %v4284_v2 = vsub.f32 %v8941_v23, %v9051_v60  ;;  %v4286_v60 = vsub.f32 %v8955_v55, %v9059_v20  ;;  %v4289_v55 = vsub.f32 %v8962_v9, %v9063_v44 }
0x152c   :  { %v9112_v21 = vmax.f32 %v4224_v19, %v4259_v17  ;;  %v9114_v22 = vpop.eup %6837  ;;  %v4372_v36 = vmul.f32 1.442695, %v4343_v11  ;;  %v4290_v20 = vsub.f32 %v8983_v12, %v9084_v10 }
0x152d   :  { %v9116_v13 = vpop.eup %6839  ;;  %6064 = vmatprep.mubr.f32.mxu1 %v9114_v22  ;;  %v4302_v23 = vmul.f32 1.442695, %v4284_v2 }
0x152e   :  { %v4342_v57 = vsub.f32 %v8902_v16, %v9112_v21  ;;  %6065 = vmatmul.mubr.f32.gmra.mrb[82].mxu1 %v9116_v13  ;;  %v4235_v16 = vpop.xlane.xlu1 %4234  ;;  %v4314_v44 = vmul.f32 1.442695, %v4290_v20 }
0x152f   :  { %v4233_v26 = vpop.xlane.xlu0 %4232 }
0x1530   :  { %v4370_v34 = vmul.f32 1.442695, %v4342_v57  ;;  %v9122_v35 = vmax.f32 %v4233_v26, %v4265_v46 }
0x1532   :  { %6845 = vpow2.f32 %v4370_v34  ;;  %v4345_v59 = vsub.f32 %v8908_v7, %v9122_v35  ;;  %v4237_v4 = vpop.xlane.xlu1 %4236 }
0x1533   :  { %v4230_v54 = vpop.xlane.xlu0 %4229  ;;  %6847 = vpow2.f32 %v4372_v36 }
0x1534   :  { %v9126_v53 = vmax.f32 %v4230_v54, %v4263_v42  ;;  %v9128_v24 = vpop.eup %6841  ;;  %v4376_v17 = vmul.f32 1.442695, %v4345_v59  ;;  %v4285_v42 = vsub.f32 %v8936_v45, %v9047_v8  ;;  %v4287_v45 = vsub.f32 %v8948_v28, %v9055_v48 }
0x1535   :  { %v9130_v25 = vpop.eup %6843  ;;  %6067 = vmatprep.mubr.f32.mxu1 %v9128_v24 }
0x1536   :  { %v4344_v51 = vsub.f32 %v8914_v43, %v9126_v53  ;;  %6068 = vmatmul.mubr.f32.gmra.mrb[84].mxu1 %v9130_v25  ;;  %v4304_v34 = vmul.f32 1.442695, %v4285_v42  ;;  %v4308_v59 = vmul.f32 1.442695, %v4287_v45 }
0x1537   :  { %v4188_v63 = vpop.xlane.xlu0 %4187 }
0x1538   :  { %v4374_v37 = vmul.f32 1.442695, %v4344_v51  ;;  %v4266_v61 = vmax.f32 %v4188_v63, %v4235_v16  ;;  %v4291_v16 = vsub.f32 %v8976_v33, %v9078_v49  ;;  %v4292_v51 = vsub.f32 %v8997_v52, %v9098_v31 }
0x1539   :  { %v4294_v52 = vsub.f32 %v9011_v32, %v9112_v21  ;;  %v4296_v32 = vsub.f32 %v9025_v1, %v9126_v53 }
0x153a   :  { %v4282_v7 = vsub.f32 %v9033_v29, %v4266_v61  ;;  %v4330_v39 = vsub.f32 %v8920_v27, %v4266_v61  ;;  %6849 = vpow2.f32 %v4374_v37  ;;  %v4316_v10 = vmul.f32 1.442695, %v4291_v16 }
0x153b   :  { %v4191_v3 = vpop.xlane.xlu0 %4190  ;;  %6851 = vpow2.f32 %v4376_v17  ;;  %v4293_v37 = vsub.f32 %v8990_v47, %v9094_v30  ;;  %v4318_v49 = vmul.f32 1.442695, %v4292_v51  ;;  %v4295_v47 = vsub.f32 %v9004_v14, %v9108_v62 }
0x153c   :  { %v4298_v43 = vmul.f32 1.442695, %v4282_v7  ;;  %v4346_v46 = vmul.f32 1.442695, %v4330_v39  ;;  %v4267_v19 = vmax.f32 %v4191_v3, %v4237_v4  ;;  %v9140_v11 = vpop.eup %6845  ;;  %v4322_v39 = vmul.f32 1.442695, %v4294_v52 }
0x153d   :  { %v9142_v57 = vpop.eup %6847  ;;  %6070 = vmatprep.mubr.f32.mxu1 %v9140_v11  ;;  %v4320_v7 = vmul.f32 1.442695, %v4293_v37  ;;  %v4324_v2 = vmul.f32 1.442695, %v4295_v47  ;;  %v4297_v14 = vsub.f32 %v9018_v56, %v9122_v35  ;;  %v4326_v62 = vmul.f32 1.442695, %v4296_v32 }
0x153e   :  { %6853 = vpow2.f32 %v4298_v43  ;;  %v4283_v27 = vsub.f32 %v9041_v15, %v4267_v19  ;;  %v4331_v29 = vsub.f32 %v8926_v5, %v4267_v19  ;;  %6071 = vmatmul.mubr.f32.gmra.mrb[86].mxu1 %v9142_v57  ;;  %v4306_v15 = vmul.f32 1.442695, %v4286_v60 }
0x153f   :  { %6855 = vpow2.f32 %v4346_v46  ;;  %v4288_v5 = vsub.f32 %v8969_v18, %v9067_v50  ;;  %v4312_v50 = vmul.f32 1.442695, %v4289_v55  ;;  %v4328_v3 = vmul.f32 1.442695, %v4297_v14 }
0x1540   :  { %v4300_v26 = vmul.f32 1.442695, %v4283_v27  ;;  %v4348_v36 = vmul.f32 1.442695, %v4331_v29 }
0x1541   :  { %v4310_v48 = vmul.f32 1.442695, %v4288_v5 }
0x1542   :  { %6857 = vpow2.f32 %v4300_v26 }
0x1543   :  { %6859 = vpow2.f32 %v4348_v36 }
0x1544   :  { %6861 = vpow2.f32 %v4302_v23  ;;  %v9156_v8 = vpop.eup %6849 }
0x1545   :  { %v9158_v54 = vpop.eup %6851  ;;  %6863 = vpow2.f32 %v4304_v34  ;;  %6073 = vmatprep.mubr.f32.mxu1 %v9156_v8 }
0x1546   :  { %6074 = vmatmul.mubr.f32.gmra.mrb[88].mxu1 %v9158_v54  ;;  %6865 = vpow2.f32 %v4306_v15 }
0x1547   :  { %6867 = vpow2.f32 %v4308_v59 }
0x1548   :  { %v6854_v28 = vpop.eup %6853  ;;  %6869 = vpow2.f32 %v4310_v48 }
0x1549   :  { %v6856_v18 = vpop.eup %6855  ;;  %6084 = vmatprep.mubr.msk.f32.mxu1 %vm106_vm0, %v6854_v28  ;;  %v4378_v17 = vsel %vm106_vm0, %v6854_v28, 0.0  ;;  %6871 = vpow2.f32 %v4312_v50 }
0x154a   :  { %4426 = vadd.xlane.f32.xlu0 %v6856_v18  ;;  %6052 = vmatprep.mubr.f32.mxu0 %v6856_v18  ;;  %6873 = vpow2.f32 %v4314_v44 }
0x154b   :  { %6875 = vpow2.f32 %v4316_v10 }
0x154c   :  { %v6858_v9 = vpop.eup %6857  ;;  %6877 = vpow2.f32 %v4318_v49 }
0x154d   :  { %v6860_v63 = vpop.eup %6859  ;;  %6085 = vmatmul.mubr.msk.f32.vlgmr.msra.gmra.mrb[90].mxu1 %vm106_vm0, %v6858_v9  ;;  %v4381_v31 = vsel %vm106_vm0, %v6858_v9, 0.0  ;;  %6879 = vpow2.f32 %v4320_v7 }
0x154e   :  { %v6862_v12 = vpop.eup %6861  ;;  %4379 = vadd.xlane.f32.xlu0 %v4378_v17  ;;  %4428 = vadd.xlane.f32.xlu1 %v6860_v63  ;;  %6881 = vpow2.f32 %v4322_v39 }
0x154f   :  { %6053 = vmatmul.mubr.f32.vlgmr.msra.gmra.mrb[68].mxu0 %v6860_v63  ;;  %6087 = vmatprep.mubr.msk.f32.mxu1 %vm106_vm0, %v6862_v12  ;;  %v6864_v33 = vpop.eup %6863  ;;  %v4384_v21 = vsel %vm106_vm0, %v6862_v12, 0.0  ;;  %6883 = vpow2.f32 %v4324_v2 }
0x1550   :  { %v6866_v61 = vpop.eup %6865  ;;  %v4387_v1 = vsel %vm106_vm0, %v6864_v33, 0.0  ;;  %6885 = vpow2.f32 %v4326_v62 }
0x1551   :  { %6088 = vmatmul.mubr.msk.f32.gmra.mrb[76].mxu1 %vm106_vm0, %v6864_v33  ;;  %v6868_v30 = vpop.eup %6867  ;;  %6887 = vpow2.f32 %v4328_v3 }
0x1552   :  { %4430 = vadd.xlane.f32.xlu0 %v9069_v38  ;;  %4382 = vadd.xlane.f32.xlu1 %v4381_v31  ;;  %v6870_v4 = vpop.eup %6869 }
0x1553   :  { %6090 = vmatprep.mubr.msk.f32.mxu1 %vm106_vm0, %v6866_v61  ;;  %v6872_v38 = vpop.eup %6871  ;;  %v4396_v42 = vsel %vm106_vm0, %v6870_v4, 0.0 }
0x1554   :  { %v6874_v53 = vpop.eup %6873  ;;  %v4399_v29 = vsel %vm106_vm0, %v6872_v38, 0.0 }
0x1555   :  { %6091 = vmatmul.mubr.msk.f32.gmra.mrb[78].mxu1 %vm106_vm0, %v6868_v30  ;;  %v6876_v56 = vpop.eup %6875 }
0x1556   :  { %4385 = vadd.xlane.f32.xlu0 %v4384_v21  ;;  %4432 = vadd.xlane.f32.xlu1 %v9071_v40  ;;  %v4390_v40 = vsel %vm106_vm0, %v6866_v61, 0.0  ;;  %v6878_v35 = vpop.eup %6877  ;;  %v4405_v23 = vsel %vm106_vm0, %v6876_v56, 0.0 }
0x1557   :  { %6093 = vmatprep.mubr.msk.f32.mxu1 %vm106_vm0, %v6870_v4  ;;  %v6880_v43 = vpop.eup %6879 }
0x1558   :  { %v6882_v46 = vpop.eup %6881  ;;  %v4411_v60 = vsel %vm106_vm0, %v6880_v43, 0.0 }
0x1559   :  { %6094 = vmatmul.mubr.msk.f32.gmra.mrb[80].mxu1 %vm106_vm0, %v6872_v38  ;;  %v6884_v19 = vpop.eup %6883 }
0x155a   :  { %4434 = vadd.xlane.f32.xlu0 %v9086_v58  ;;  %4388 = vadd.xlane.f32.xlu1 %v4387_v1  ;;  %v4393_v58 = vsel %vm106_vm0, %v6868_v30, 0.0  ;;  %v6886_v27 = vpop.eup %6885 }
0x155b   :  { %6096 = vmatprep.mubr.msk.f32.mxu1 %vm106_vm0, %v6874_v53 }
0x155d   :  { %6097 = vmatmul.mubr.msk.f32.gmra.mrb[82].mxu1 %vm106_vm0, %v6876_v56 }
0x155e   :  { %4391 = vadd.xlane.f32.xlu0 %v4390_v40  ;;  %4436 = vadd.xlane.f32.xlu1 %v9088_v41  ;;  %v6888_v41 = vpop.eup %6887 }
0x155f   :  { %6099 = vmatprep.mubr.msk.f32.mxu1 %vm106_vm0, %v6878_v35  ;;  %v4423_v26 = vsel %vm106_vm0, %v6888_v41, 0.0 }
0x1561   :  { %6100 = vmatmul.mubr.msk.f32.gmra.mrb[84].mxu1 %vm106_vm0, %v6880_v43 }
0x1562   :  { %4438 = vadd.xlane.f32.xlu0 %v9100_v6  ;;  %4394 = vadd.xlane.f32.xlu1 %v4393_v58  ;;  %v4402_v6 = vsel %vm106_vm0, %v6874_v53, 0.0 }
0x1563   :  { %6102 = vmatprep.mubr.msk.f32.mxu1 %vm106_vm0, %v6882_v46 }
0x1565   :  { %6103 = vmatmul.mubr.msk.f32.gmra.mrb[86].mxu1 %vm106_vm0, %v6884_v19 }
0x1566   :  { %4397 = vadd.xlane.f32.xlu0 %v4396_v42  ;;  %4440 = vadd.xlane.f32.xlu1 %v9102_v0  ;;  %v4408_v0 = vsel %vm106_vm0, %v6878_v35, 0.0 }
0x1567   :  { %6105 = vmatprep.mubr.msk.f32.mxu1 %vm106_vm0, %v6886_v27 }
0x1569   :  { %6106 = vmatmul.mubr.msk.f32.gmra.mrb[88].mxu1 %vm106_vm0, %v6888_v41 }
0x156a   :  { %4442 = vadd.xlane.f32.xlu0 %v9114_v22  ;;  %4400 = vadd.xlane.f32.xlu1 %v4399_v29  ;;  %v4414_v22 = vsel %vm106_vm0, %v6882_v46, 0.0 }
0x156e   :  { %4403 = vadd.xlane.f32.xlu0 %v4402_v6  ;;  %4444 = vadd.xlane.f32.xlu1 %v9116_v13  ;;  %v4420_v13 = vsel %vm106_vm0, %v6886_v27, 0.0 }
0x1572   :  { %4446 = vadd.xlane.f32.xlu0 %v9128_v24  ;;  %4406 = vadd.xlane.f32.xlu1 %v4405_v23  ;;  %v4417_v24 = vsel %vm106_vm0, %v6884_v19, 0.0 }
0x1576   :  { %4409 = vadd.xlane.f32.xlu0 %v4408_v0  ;;  %4448 = vadd.xlane.f32.xlu1 %v9130_v25 }
0x157a   :  { %4450 = vadd.xlane.f32.xlu0 %v9140_v11  ;;  %4412 = vadd.xlane.f32.xlu1 %v4411_v60 }
0x157e   :  { %4415 = vadd.xlane.f32.xlu0 %v4414_v22  ;;  %4452 = vadd.xlane.f32.xlu1 %v9142_v57 }
0x1582   :  { %4421 = vadd.xlane.f32.xlu0 %v4420_v13  ;;  %4418 = vadd.xlane.f32.xlu1 %v4417_v24 }
0x1586   :  { %4454 = vadd.xlane.f32.xlu0 %v9156_v8  ;;  %4424 = vadd.xlane.f32.xlu1 %v4423_v26 }
0x158a   :  { %4456 = vadd.xlane.f32.xlu1 %v9158_v54 }
0x15d7   :  { %v4427_v25 = vpop.xlane.xlu0 %4426 }
0x15db   :  { %v4429_v11 = vpop.xlane.xlu1 %4428  ;;  %v4380_v36 = vpop.xlane.xlu0 %4379 }
0x15dc   :  { %v4458_v12 = vadd.f32 %v4427_v25, %v4380_v36 }
0x15de   :  { %6889 = vrcp.f32 %v4458_v12 }
0x15df   :  { %v4383_v34 = vpop.xlane.xlu1 %4382  ;;  %v4431_v45 = vpop.xlane.xlu0 %4430 }
0x15e0   :  { %v4459_v37 = vadd.f32 %v4429_v11, %v4383_v34 }
0x15e2   :  { %6891 = vrcp.f32 %v4459_v37 }
0x15e3   :  { %v4433_v15 = vpop.xlane.xlu1 %4432  ;;  %v4386_v57 = vpop.xlane.xlu0 %4385 }
0x15e4   :  { %v4460_v49 = vadd.f32 %v4431_v45, %v4386_v57 }
0x15e7   :  { %v4389_v5 = vpop.xlane.xlu1 %4388  ;;  %v4435_v59 = vpop.xlane.xlu0 %4434 }
0x15e8   :  { %v4461_v33 = vadd.f32 %v4433_v15, %v4389_v5  ;;  %v6890_v2 = vpop.eup %6889 }
0x15ea   :  { %6893 = vrcp.f32 %v4461_v33 }
0x15eb   :  { %v4437_v55 = vpop.xlane.xlu1 %4436  ;;  %v4392_v48 = vpop.xlane.xlu0 %4391  ;;  %6895 = vrcp.f32 %v4460_v49 }
0x15ec   :  { %v4462_v7 = vadd.f32 %v4435_v59, %v4392_v48  ;;  %v6892_v62 = vpop.eup %6891 }
0x15ef   :  { %v4395_v28 = vpop.xlane.xlu1 %4394  ;;  %v4439_v18 = vpop.xlane.xlu0 %4438 }
0x15f0   :  { %v4463_v31 = vadd.f32 %v4437_v55, %v4395_v28 }
0x15f2   :  { %6897 = vrcp.f32 %v4463_v31 }
0x15f3   :  { %v4441_v20 = vpop.xlane.xlu1 %4440  ;;  %v4398_v16 = vpop.xlane.xlu0 %4397  ;;  %6899 = vrcp.f32 %v4462_v7 }
0x15f4   :  { %v4464_v30 = vadd.f32 %v4439_v18, %v4398_v16  ;;  %v6894_v56 = vpop.eup %6893 }
0x15f5   :  { %v6896_v43 = vpop.eup %6895 }
0x15f7   :  { %v4401_v50 = vpop.xlane.xlu1 %4400  ;;  %v4443_v9 = vpop.xlane.xlu0 %4442 }
0x15f8   :  { %v4465_v47 = vadd.f32 %v4441_v20, %v4401_v50 }
0x15fa   :  { %6901 = vrcp.f32 %v4465_v47 }
0x15fb   :  { %v4445_v8 = vpop.xlane.xlu1 %4444  ;;  %v4404_v54 = vpop.xlane.xlu0 %4403  ;;  %6903 = vrcp.f32 %v4464_v30 }
0x15fc   :  { %v4466_v1 = vadd.f32 %v4443_v9, %v4404_v54  ;;  %v6898_v0 = vpop.eup %6897 }
0x15fd   :  { %v6900_v22 = vpop.eup %6899 }
0x15ff   :  { %v4407_v44 = vpop.xlane.xlu1 %4406  ;;  %v4447_v63 = vpop.xlane.xlu0 %4446 }
0x1600   :  { %v4467_v14 = vadd.f32 %v4445_v8, %v4407_v44 }
0x1602   :  { %6905 = vrcp.f32 %v4467_v14 }
0x1603   :  { %v4449_v51 = vpop.xlane.xlu1 %4448  ;;  %v4410_v10 = vpop.xlane.xlu0 %4409  ;;  %6907 = vrcp.f32 %v4466_v1 }
0x1604   :  { %v4468_v23 = vadd.f32 %v4447_v63, %v4410_v10  ;;  %v6902_v34 = vpop.eup %6901 }
0x1605   :  { %v6904_v57 = vpop.eup %6903 }
0x1607   :  { %v4413_v17 = vpop.xlane.xlu1 %4412  ;;  %v4451_v61 = vpop.xlane.xlu0 %4450 }
0x1608   :  { %v4469_v27 = vadd.f32 %v4449_v51, %v4413_v17 }
0x160a   :  { %6909 = vrcp.f32 %v4469_v27 }
0x160b   :  { %v4453_v52 = vpop.xlane.xlu1 %4452  ;;  %v4416_v32 = vpop.xlane.xlu0 %4415  ;;  %6911 = vrcp.f32 %v4468_v23 }
0x160c   :  { %v4470_v11 = vadd.f32 %v4451_v61, %v4416_v32  ;;  %v6906_v20 = vpop.eup %6905 }
0x160d   :  { %v6908_v50 = vpop.eup %6907 }
0x160f   :  { %v4419_v39 = vpop.xlane.xlu1 %4418  ;;  %v4422_v41 = vpop.xlane.xlu0 %4421 }
0x1610   :  { %v4471_v26 = vadd.f32 %v4453_v52, %v4419_v39 }
0x1612   :  { %6913 = vrcp.f32 %v4471_v26 }
0x1613   :  { %v4425_v58 = vpop.xlane.xlu1 %4424  ;;  %v4455_v45 = vpop.xlane.xlu0 %4454  ;;  %6915 = vrcp.f32 %v4470_v11 }
0x1614   :  { %v4472_v48 = vadd.f32 %v4455_v45, %v4422_v41  ;;  %v6910_v44 = vpop.eup %6909 }
0x1615   :  { %v6912_v51 = vpop.eup %6911 }
0x1617   :  { %v4457_v36 = vpop.xlane.xlu1 %4456 }
0x1618   :  { %v4473_v55 = vadd.f32 %v4457_v36, %v4425_v58 }
0x161a   :  { %6917 = vrcp.f32 %v4473_v55 }
0x161b   :  { %6919 = vrcp.f32 %v4472_v48 }
0x161c   :  { %v6914_v10 = vpop.eup %6913 }
0x161d   :  { %v6916_v33 = vpop.eup %6915 }
0x1620   :  { %v6086_v21 = vpop.f32.mrb[90].mxu1 }
0x1621   :  { %v4749_v4 = vpop.f32.mrb[91].mxu1 }
0x1622   :  { %v6054_v38 = vpop.f32.mrb[68].mxu0 }
0x1623   :  { %v4755_v53 = vadd.f32 %v6086_v21, %v6054_v38  ;;  %v4556_v3 = vpop.f32.mrb[69].mxu0 }
0x1624   :  { %v4750_v40 = vadd.f32 %v4749_v4, %v4556_v3  ;;  %v6089_v35 = vpop.f32.mrb[76].mxu1  ;;  %v6918_v61 = vpop.eup %6917 }
0x1625   :  { %v4829_v46 = vmul.f32 %v6892_v62, %v4755_v53  ;;  %v4831_v19 = vmul.f32 %v6894_v56, %v6089_v35  ;;  %v4759_v42 = vpop.f32.mrb[77].mxu1  ;;  %v6920_v47 = vpop.eup %6919 }
0x1626   :  { %v4828_v29 = vmul.f32 %v6890_v2, %v4750_v40  ;;  %v4830_v6 = vmul.f32 %v6896_v43, %v4759_v42 }
0x1627   :  { %4845 = vst.msk [vmem:[%s9304_s14 + $0x8] sm:$0xff] %vm106_vm0, %v4829_v46  ;;  %4847 = vst.msk [vmem:[%s9304_s14 + $0x18] sm:$0xff] %vm106_vm0, %v4831_v19 }
0x1628   :  { %4844 = vst.msk [vmem:[%s9304_s14] sm:$0xff] %vm106_vm0, %v4828_v29  ;;  %4846 = vst.msk [vmem:[%s9304_s14 + $0x10] sm:$0xff] %vm106_vm0, %v4830_v6  ;;  %v6092_v60 = vpop.f32.mrb[78].mxu1 }
0x1629   :  { %v4833_v13 = vmul.f32 %v6898_v0, %v6092_v60  ;;  %v4769_v24 = vpop.f32.mrb[79].mxu1 }
0x162a   :  { %v4832_v25 = vmul.f32 %v6900_v22, %v4769_v24 }
0x162b   :  { %4849 = vst.msk [vmem:[%s9304_s14 + $0x28] sm:$0xff] %vm106_vm0, %v4833_v13 }
0x162c   :  { %4848 = vst.msk [vmem:[%s9304_s14 + $0x20] sm:$0xff] %vm106_vm0, %v4832_v25  ;;  %v6095_v15 = vpop.f32.mrb[80].mxu1 }
0x162d   :  { %v4835_v5 = vmul.f32 %v6902_v34, %v6095_v15  ;;  %v4779_v59 = vpop.f32.mrb[81].mxu1 }
0x162e   :  { %v4834_v28 = vmul.f32 %v6904_v57, %v4779_v59 }
0x162f   :  { %4851 = vst.msk [vmem:[%s9304_s14 + $0x38] sm:$0xff] %vm106_vm0, %v4835_v5 }
0x1630   :  { %4850 = vst.msk [vmem:[%s9304_s14 + $0x30] sm:$0xff] %vm106_vm0, %v4834_v28  ;;  %v6098_v18 = vpop.f32.mrb[82].mxu1 }
0x1631   :  { %v4837_v16 = vmul.f32 %v6906_v20, %v6098_v18  ;;  %v4789_v8 = vpop.f32.mrb[83].mxu1 }
0x1632   :  { %v4836_v9 = vmul.f32 %v6908_v50, %v4789_v8 }
0x1633   :  { %4853 = vst.msk [vmem:[%s9304_s14 + $0x48] sm:$0xff] %vm106_vm0, %v4837_v16 }
0x1634   :  { %4852 = vst.msk [vmem:[%s9304_s14 + $0x40] sm:$0xff] %vm106_vm0, %v4836_v9  ;;  %v6101_v54 = vpop.f32.mrb[84].mxu1 }
0x1635   :  { %v4839_v63 = vmul.f32 %v6910_v44, %v6101_v54  ;;  %v4799_v17 = vpop.f32.mrb[85].mxu1 }
0x1636   :  { %v4838_v12 = vmul.f32 %v6912_v51, %v4799_v17 }
0x1637   :  { %4855 = vst.msk [vmem:[%s9304_s14 + $0x58] sm:$0xff] %vm106_vm0, %v4839_v63 }
0x1638   :  { %4854 = vst.msk [vmem:[%s9304_s14 + $0x50] sm:$0xff] %vm106_vm0, %v4838_v12  ;;  %v6104_v37 = vpop.f32.mrb[86].mxu1 }
0x1639   :  { %v4841_v49 = vmul.f32 %v6914_v10, %v6104_v37  ;;  %v4809_v52 = vpop.f32.mrb[87].mxu1 }
0x163a   :  { %v4840_v31 = vmul.f32 %v6916_v33, %v4809_v52 }
0x163b   :  { %4857 = vst.msk [vmem:[%s9304_s14 + $0x68] sm:$0xff] %vm106_vm0, %v4841_v49 }
0x163c   :  { %4856 = vst.msk [vmem:[%s9304_s14 + $0x60] sm:$0xff] %vm106_vm0, %v4840_v31  ;;  %v6107_v7 = vpop.f32.mrb[88].mxu1 }
0x163d   :  { %v4843_v30 = vmul.f32 %v6918_v61, %v6107_v7  ;;  %v4819_v39 = vpop.f32.mrb[89].mxu1 }
0x163e   :  { %v4842_v32 = vmul.f32 %v6920_v47, %v4819_v39 }
0x163f   :  { %4859 = vst.msk [vmem:[%s9304_s14 + $0x78] sm:$0xff] %vm106_vm0, %v4843_v30 }
0x1640   :  { %4858 = vst.msk [vmem:[%s9304_s14 + $0x70] sm:$0xff] %vm106_vm0, %v4842_v32 }
0x1641   :  { %4864 = vsyncpa [#allocation3], 1 }
0x1642   :  { %4865 = vsyncpa [#allocation5], 1 }

</bundles_post_ra>
